<compile_context>
chip_gen: v7x
topology: tpu7x:2x2x1
jax: 0.10.0
libtpu: 0.0.40
codegen_flags: <defaults>
</compile_context>

<pallas_src>
import jax
import jax.numpy as jnp
from jax.experimental import pallas as pl
from jax.experimental.pallas import tpu as pltpu


# ----------------------------------------------------------------- budgets ---
def _vmem_budgets():
    """Generation-aware (scoped_vmem_cap, per_block_budget, fused_slab_budget)."""
    try:
        phys = int(pltpu.get_tpu_info().vmem_capacity_bytes)
    except Exception:
        phys = 64 << 20  # conservative fallback (v7x-sized)
    # Leave headroom for Mosaic internal scratch below the physical size.
    scoped_cap = max(32 << 20, phys - (16 << 20))
    # Streaming path: pass-2 peak is ~2 in-bufs + 2 out-bufs + small residents.
    block_budget = min(16 << 20, max(1 << 20, scoped_cap // 6))
    # Fused path: whole slab resident (in + out, dbl-buffered, f32 pool temps).
    fused_slab_budget = max(2 << 20, (scoped_cap - (2 << 20)) // 5)
    return scoped_cap, block_budget, fused_slab_budget


def _pad_last_to_multiple(x, m):
    """Zero-pad the last dim up to a multiple of m (zeros don't affect the sum)."""
    l = x.shape[-1]
    lp = ((l + m - 1) // m) * m
    if lp == l:
        return x, l
    pad = [(0, 0)] * (x.ndim - 1) + [(0, lp - l)]
    return jnp.pad(x, pad), l


def _pick_l_tile(l_padded, col_bytes, block_budget):
    """Largest multiple-of-128 tile dividing l_padded with tile*col_bytes <= budget."""
    max_by_budget = max(128, (block_budget // max(1, col_bytes)) // 128 * 128)
    lt = min(l_padded, max_by_budget)
    lt = max(128, (lt // 128) * 128)
    while l_padded % lt != 0:      # l_padded is a multiple of 128 -> terminates
        lt -= 128
    return lt


# -------------------------------------------------------- fused single-pass ---
def _channel_attention_fused(x, w1t, w2t, true_l, scoped_cap):
    B, C, Lp = x.shape
    H = w1t.shape[1]
    inv_l = 1.0 / float(true_l)
    slab = B * C * Lp * jnp.dtype(x.dtype).itemsize
    vmem_limit = int(min(scoped_cap, max(16 << 20, 5 * slab + (4 << 20))))

    def kernel(x_ref, w1t_ref, w2t_ref, o_ref):
        # Pool (f32 accumulation), tiny gate MLP, then scale -- all resident.
        pooled = jnp.sum(x_ref[...].astype(jnp.float32), axis=-1) * inv_l   # (B, C)
        h = jnp.maximum(
            jnp.dot(pooled, w1t_ref[...], preferred_element_type=jnp.float32), 0.0)
        g = jax.nn.sigmoid(
            jnp.dot(h, w2t_ref[...], preferred_element_type=jnp.float32))   # (B, C)
        o_ref[...] = x_ref[...] * g.astype(o_ref.dtype)[..., None]

    return pl.pallas_call(
        kernel,
        out_shape=jax.ShapeDtypeStruct((B, C, Lp), x.dtype),
        grid_spec=pltpu.PrefetchScalarGridSpec(
            num_scalar_prefetch=0,
            grid=(1,),
            in_specs=[
                pl.BlockSpec((B, C, Lp), lambda i: (0, 0, 0)),
                pl.BlockSpec((C, H), lambda i: (0, 0)),
                pl.BlockSpec((H, C), lambda i: (0, 0)),
            ],
            out_specs=pl.BlockSpec((B, C, Lp), lambda i: (0, 0, 0)),
        ),
        compiler_params=pltpu.CompilerParams(
            dimension_semantics=("arbitrary",),
            vmem_limit_bytes=vmem_limit),
    )(x, w1t, w2t)


# ------------------------------------------------------- streaming two-pass ---
def _channel_attention_tiled(x, w1t, w2t, true_l, scoped_cap, block_budget):
    B, C, Lp = x.shape
    H = w1t.shape[1]
    itemsize = jnp.dtype(x.dtype).itemsize
    inv_l = 1.0 / float(true_l)

    # TODO(synk): for extreme C where C*128*itemsize alone exceeds the block
    # budget, a C-block axis would be needed; lt clamps to 128 here instead.
    lt = _pick_l_tile(Lp, C * itemsize, block_budget)
    n_lt = Lp // lt
    block_bytes = C * lt * itemsize
    resident = B * C * itemsize + 2 * C * H * itemsize + 8 * C  # gate + weights + acc
    vmem_limit = int(min(scoped_cap,
                         max(16 << 20, 6 * block_bytes + resident + (2 << 20))))

    # -------- pass 1: pool + gate MLP -> y: (B, C, 1) in x.dtype -------------
    def pool_gate_kernel(x_ref, w1t_ref, w2t_ref, y_ref, acc_ref):
        li = pl.program_id(1)

        @pl.when(li == 0)
        def _():
            acc_ref[...] = jnp.zeros_like(acc_ref)

        # f32 pool-sum accumulation over the L tiles of this batch row.
        acc_ref[...] += jnp.sum(x_ref[...].astype(jnp.float32), axis=-1)    # (1, C)

        @pl.when(li == pl.num_programs(1) - 1)
        def _():
            pooled = acc_ref[...] * inv_l                                   # (1, C)
            h = jnp.maximum(
                jnp.dot(pooled, w1t_ref[...],
                        preferred_element_type=jnp.float32), 0.0)           # (1, H)
            g = jax.nn.sigmoid(
                jnp.dot(h, w2t_ref[...],
                        preferred_element_type=jnp.float32))                # (1, C)
            y_ref[...] = g.astype(y_ref.dtype)[:, :, None]                  # (1, C, 1)

    y = pl.pallas_call(
        pool_gate_kernel,
        out_shape=jax.ShapeDtypeStruct((B, C, 1), x.dtype),
        grid_spec=pltpu.PrefetchScalarGridSpec(
            num_scalar_prefetch=0,
            grid=(B, n_lt),
            in_specs=[
                pl.BlockSpec((1, C, lt), lambda b, l: (b, 0, l)),
                pl.BlockSpec((C, H), lambda b, l: (0, 0)),   # resident weights
                pl.BlockSpec((H, C), lambda b, l: (0, 0)),
            ],
            out_specs=pl.BlockSpec((1, C, 1), lambda b, l: (b, 0, 0)),
            scratch_shapes=[pltpu.VMEM((1, C), jnp.float32)],
        ),
        compiler_params=pltpu.CompilerParams(
            dimension_semantics=("parallel", "arbitrary"),   # B parallel, L reduce
            vmem_limit_bytes=vmem_limit),
    )(x, w1t, w2t)

    # -------- pass 2: scale ---------------------------------------------------
    def scale_kernel(x_ref, y_ref, o_ref):
        # (1, C, lt) * (1, C, 1); gate already in x.dtype, broadcast along lanes.
        o_ref[...] = x_ref[...] * y_ref[...]

    out = pl.pallas_call(
        scale_kernel,
        out_shape=jax.ShapeDtypeStruct((B, C, Lp), x.dtype),
        grid_spec=pltpu.PrefetchScalarGridSpec(
            num_scalar_prefetch=0,
            grid=(B, n_lt),
            in_specs=[
                pl.BlockSpec((1, C, lt), lambda b, l: (b, 0, l)),
                pl.BlockSpec((1, C, 1), lambda b, l: (b, 0, 0)),   # resident gate
            ],
            out_specs=pl.BlockSpec((1, C, lt), lambda b, l: (b, 0, l)),
        ),
        compiler_params=pltpu.CompilerParams(
            dimension_semantics=("parallel", "parallel"),
            vmem_limit_bytes=vmem_limit),
    )(x, y)
    return out


# ----------------------------------------------------------------- wrapper ---
def channel_attention(x, w1, w2, *, force_tiled=False):
    """x: (B, C, L); w1: (C//r, C); w2: (C, C//r). Returns x * gate(x)."""
    B, C, L = x.shape
    assert w1.shape[1] == C and w2.shape[0] == C

    scoped_cap, block_budget, fused_budget = _vmem_budgets()

    # Lane-align L (zeros contribute 0 to the pool sum; mean uses the true L).
    x_pad, true_l = _pad_last_to_multiple(x, 128)
    Lp = x_pad.shape[-1]
    slab_bytes = B * C * Lp * jnp.dtype(x.dtype).itemsize

    w1t = w1.T   # (C, H)
    w2t = w2.T   # (H, C)

    if (not force_tiled) and slab_bytes <= fused_budget:
        out = _channel_attention_fused(x_pad, w1t, w2t, true_l, scoped_cap)
    else:
        out = _channel_attention_tiled(x_pad, w1t, w2t, true_l, scoped_cap,
                                       block_budget)
    if Lp != L:
        out = out[:, :, :L]
    return out


def channel_attention_ref(x, w1, w2):
    pooled = jnp.mean(x, axis=-1)                          # (B, C)
    h = jnp.maximum(pooled @ w1.T, 0.0)                    # (B, H)
    y = jax.nn.sigmoid(h @ w2.T)                           # (B, C)
    return x * y[..., None]


if __name__ == "__main__":
    B, C = 2, 64
    reduction = 16
    H = C // reduction   # 4

    key = jax.random.PRNGKey(0)
    kx, k1, k2 = jax.random.split(key, 3)
    # PyTorch Linear weights are (out_features, in_features), no bias.
    w1 = jax.random.normal(k1, (H, C), dtype=jnp.float32) * 0.1
    w2 = jax.random.normal(k2, (C, H), dtype=jnp.float32) * 0.1

    checks = [
        (4096, False),   # lane-aligned L, fused single-pass path
        (4096, True),    # lane-aligned L, streaming two-pass path
        (1000, False),   # ragged L (padded to 1024), fused path
        (1000, True),    # ragged L (padded to 1024), two-pass path
    ]
    for L, force_tiled in checks:
        x = jax.random.normal(jax.random.fold_in(kx, L), (B, C, L),
                              dtype=jnp.float32)
        out = jax.block_until_ready(
            channel_attention(x, w1, w2, force_tiled=force_tiled))
        ref = channel_attention_ref(x, w1, w2)
        assert out.shape == ref.shape, (out.shape, ref.shape)
        assert jnp.allclose(out, ref, atol=1e-5, rtol=1e-5), \
            f"mismatch vs reference (L={L}, force_tiled={force_tiled})"

    print("KERNEL_OK")
</pallas_src>

<mosaic_0001>
module attributes {stable_mosaic.version = 11 : i64} {
  func.func @kernel(%arg0: i32, %arg1: memref<2x64x4096xf32, #tpu.memory_space<vmem>>, %arg2: memref<64x4xf32, #tpu.memory_space<vmem>>, %arg3: memref<4x64xf32, #tpu.memory_space<vmem>>, %arg4: memref<2x64x4096xf32, #tpu.memory_space<vmem>>) attributes {dimension_semantics = [#tpu.dimension_semantics<arbitrary>], iteration_bounds = array<i64: 1>, scalar_prefetch = 0 : i64, scratch_operands = 0 : i64, tpu.core_type = #tpu.core_type<tc>, window_params = [{pipeline_mode = #tpu.pipeline_mode<synchronous>, transform_indices = @transform_0, window_bounds = array<i64: 2, 64, 4096>}, {pipeline_mode = #tpu.pipeline_mode<synchronous>, transform_indices = @transform_1, window_bounds = array<i64: 64, 4>}, {pipeline_mode = #tpu.pipeline_mode<synchronous>, transform_indices = @transform_2, window_bounds = array<i64: 4, 64>}, {pipeline_mode = #tpu.pipeline_mode<synchronous>, transform_indices = @transform_3, window_bounds = array<i64: 2, 64, 4096>}]} {
    %c0 = arith.constant 0 : index
    %c0_0 = arith.constant 0 : index
    %c0_1 = arith.constant 0 : index
    %0 = vector.load %arg1[%c0, %c0_0, %c0_1] : memref<2x64x4096xf32, #tpu.memory_space<vmem>>, vector<2x64x4096xf32>
    %cst = arith.constant dense<0.000000e+00> : vector<2x64xf32>
    %1 = vector.multi_reduction <add>, %0, %cst [2] : vector<2x64x4096xf32> to vector<2x64xf32>
    %cst_2 = arith.constant 2.44140625E-4 : f32
    %2 = vector.broadcast %cst_2 : f32 to vector<2x64xf32>
    %3 = arith.mulf %1, %2 : vector<2x64xf32>
    %c0_3 = arith.constant 0 : index
    %c0_4 = arith.constant 0 : index
    %4 = vector.load %arg2[%c0_3, %c0_4] : memref<64x4xf32, #tpu.memory_space<vmem>>, vector<64x4xf32>
    %cst_5 = arith.constant dense<0.000000e+00> : vector<2x4xf32>
    %5 = tpu.matmul %3, %4, %cst_5 {dimension_numbers = #tpu.dot_dimension_numbers<[1], [0], [0], [1], [0, 0, 1, 1], [], []>} : vector<2x64xf32>, vector<64x4xf32>, vector<2x4xf32> -> vector<2x4xf32>
    %cst_6 = arith.constant 0.000000e+00 : f32
    %6 = vector.broadcast %cst_6 : f32 to vector<2x4xf32>
    %7 = arith.maximumf %5, %6 : vector<2x4xf32>
    %c0_7 = arith.constant 0 : index
    %c0_8 = arith.constant 0 : index
    %8 = vector.load %arg3[%c0_7, %c0_8] : memref<4x64xf32, #tpu.memory_space<vmem>>, vector<4x64xf32>
    %cst_9 = arith.constant dense<0.000000e+00> : vector<2x64xf32>
    %9 = tpu.matmul %7, %8, %cst_9 {dimension_numbers = #tpu.dot_dimension_numbers<[1], [0], [0], [1], [0, 0, 1, 1], [], []>} : vector<2x4xf32>, vector<4x64xf32>, vector<2x64xf32> -> vector<2x64xf32>
    %10 = arith.negf %9 : vector<2x64xf32>
    %11 = math.exp %10 : vector<2x64xf32>
    %cst_10 = arith.constant 1.000000e+00 : f32
    %12 = vector.broadcast %cst_10 : f32 to vector<2x64xf32>
    %13 = arith.addf %12, %11 : vector<2x64xf32>
    %14 = arith.divf %12, %13 : vector<2x64xf32>
    %c0_11 = arith.constant 0 : index
    %c0_12 = arith.constant 0 : index
    %c0_13 = arith.constant 0 : index
    %15 = vector.load %arg1[%c0_11, %c0_12, %c0_13] : memref<2x64x4096xf32, #tpu.memory_space<vmem>>, vector<2x64x4096xf32>
    %16 = vector.shape_cast %14 : vector<2x64xf32> to vector<2x64x1xf32>
    %17 = vector.broadcast %16 : vector<2x64x1xf32> to vector<2x64x4096xf32>
    %18 = arith.mulf %15, %17 : vector<2x64x4096xf32>
    %c0_14 = arith.constant 0 : index
    %c0_15 = arith.constant 0 : index
    %c0_16 = arith.constant 0 : index
    %19 = vector.load %arg4[%c0_14, %c0_15, %c0_16] : memref<2x64x4096xf32, #tpu.memory_space<vmem>>, vector<2x64x4096xf32>
    tpu.vector_store %arg4[%c0_14, %c0_15, %c0_16], %18 {strides = array<i32>} : memref<2x64x4096xf32, #tpu.memory_space<vmem>>, vector<2x64x4096xf32>,
    return
  }
  func.func @transform_0(%arg0: i32) -> (i32, i32, i32) {
    %c0_i32 = arith.constant 0 : i32
    %c0_i32_0 = arith.constant 0 : i32
    %c0_i32_1 = arith.constant 0 : i32
    %c0_i32_2 = arith.constant 0 : i32
    return %c0_i32, %c0_i32_0, %c0_i32_1 : i32, i32, i32
  }
  func.func @transform_1(%arg0: i32) -> (i32, i32) {
    %c0_i32 = arith.constant 0 : i32
    %c0_i32_0 = arith.constant 0 : i32
    %c0_i32_1 = arith.constant 0 : i32
    return %c0_i32, %c0_i32_0 : i32, i32
  }
  func.func @transform_2(%arg0: i32) -> (i32, i32) {
    %c0_i32 = arith.constant 0 : i32
    %c0_i32_0 = arith.constant 0 : i32
    %c0_i32_1 = arith.constant 0 : i32
    return %c0_i32, %c0_i32_0 : i32, i32
  }
  func.func @transform_3(%arg0: i32) -> (i32, i32, i32) {
    %c0_i32 = arith.constant 0 : i32
    %c0_i32_0 = arith.constant 0 : i32
    %c0_i32_1 = arith.constant 0 : i32
    %c0_i32_2 = arith.constant 0 : i32
    return %c0_i32, %c0_i32_0, %c0_i32_1 : i32, i32, i32
  }
}

</mosaic_0001>

<bundles_post_ra>
// kernel: tpu_custom_call.1
= control target key start
LH: loop header
LB: loop body
LE: loop exit
PB: predicated region body
PF: predicated region fallthrough
CT: control target
= control target key end

     0   :  { %8 = vsyncpa [#allocation3], 0  ;;  %s3804_s0 = inlined_call_operand.hbm [shape: f32[2,64,4096], index: 0, kind: input, shape index: {}]   ;;  %s3805_s1 = inlined_call_operand.vmem [shape: f32[64,4], index: 1, kind: input, shape index: {}]   ;;  %s3806_s2 = inlined_call_operand.hbm [shape: f32[4,64], index: 2, kind: input, shape index: {}]   ;;  %s3807_s3 = inlined_call_operand.hbm [shape: f32[2,64,4096], index: 3, kind: output, shape index: {}]  }
   0x1   :  { %9 = vsyncpa [#allocation6], 0 }
   0x2   :  { %10 = vsyncpa [#allocation4], 0  ;;  %s3135_s12 = smov [#allocation2]   ;;  %s3063_s16 = scalar_lea.hbm %s3804_s0, 65536 }
   0x3   :  { %s16_s13 = sshll.u32 %s3135_s12, 4  ;;  %p3064_p0 = scmp.ne.s32.totalorder %s3804_s0, %s3063_s16  ;;  %s17_s13 = int_to_ptr.vmem [resolvable:$true] %s16_s13 }
   0x4   :  { %p3067_p1 = scmp.lt.u32.totalorder %s3063_s16, %s3804_s0 }
   0x6   :  { %p3069_p2 = pnand %p3067_p1, %p3064_p0 }
   0x8   :  { %3072 = shalt.err (!%p3069_p2)
}
   0x9   :  { %s3073_s21 = scalar_lea.vmem %s17_s13, 65536  ;;  %p3078_p4 = scmp.lt.s32.totalorder %s17_s13, %s17_s13 }
   0xa   :  { %p3074_p3 = scmp.ne.s32.totalorder %s17_s13, %s3073_s21  ;;  %p3079_p5 = scmp.lt.s32.totalorder %s3073_s21, %s3073_s21 }
   0xc   :  { %p3080_p6 = por %p3079_p5, %p3078_p4 }
   0xe   :  { %p3081_p7 = pnand %p3080_p6, %p3074_p3 }
  0x10   :  { %3084 = shalt.err (!%p3081_p7)
}
  0x11   :  { %s3136_s22 = smov 4096   ;;  %s3137_s23 = smov 256  }
  0x12   :  { %22 = dma.hbm_to_vmem [thread:$0]  %s3804_s0, 65536, %s17_s13, [#allocation3], %s3136_s22, %s3136_s22, %s3137_s23  }
  0x13   :  { %s3138_s26 = smov [#allocation5]   ;;  %s3085_s30 = scalar_lea.hbm %s3806_s2, 64 }
  0x14   :  { %s31_s27 = sshll.u32 %s3138_s26, 4  ;;  %p3086_p8 = scmp.ne.s32.totalorder %s3806_s2, %s3085_s30  ;;  %s32_s27 = int_to_ptr.vmem [resolvable:$true] %s31_s27 }
  0x15   :  { %p3089_p9 = scmp.lt.u32.totalorder %s3085_s30, %s3806_s2 }
  0x17   :  { %p3091_p10 = pnand %p3089_p9, %p3086_p8 }
  0x19   :  { %3094 = shalt.err (!%p3091_p10)
}
  0x1a   :  { %s3095_s8 = scalar_lea.vmem %s32_s27, 64  ;;  %p3100_p12 = scmp.lt.s32.totalorder %s32_s27, %s32_s27 }
  0x1b   :  { %p3096_p11 = scmp.ne.s32.totalorder %s32_s27, %s3095_s8  ;;  %p3101_p13 = scmp.lt.s32.totalorder %s3095_s8, %s3095_s8 }
  0x1d   :  { %p3102_p0 = por %p3101_p13, %p3100_p12 }
  0x1f   :  { %p3103_p1 = pnand %p3102_p0, %p3096_p11 }
  0x21   :  { %3106 = shalt.err (!%p3103_p1)
}
  0x22   :  { %34 = dma.hbm_to_vmem [thread:$0]  %s3806_s2, 64, %s32_s27, [#allocation6]  }
  0x23   :  { %3129 = dma.done.wait [#allocation3], 65536  }
  0x24   :  { %3130 = vsyncadd [#allocation3], 4294901760 }
  0x25   :  { %3131 = dma.done.wait [#allocation6], 64  }
  0x26   :  { %3132 = vsyncadd [#allocation6], 4294967232  ;;  %v297_v0 = vld [vmem:[#allocation2 + $0x800] sm:$0xff]  ;;  %v298_v1 = vld [vmem:[#allocation2 + $0x808] sm:$0xff]  ;;  %vm3140_vm0 = vmmov 0   ;;  %vm1132_vm1 = vcmask 130112  }
  0x27   :  { %v299_v2 = vld [vmem:[#allocation2 + $0x810] sm:$0xff]  ;;  %v817_v3 = vadd.f32 %v298_v1, %v297_v0  ;;  %v300_v4 = vld [vmem:[#allocation2 + $0x818] sm:$0xff]  ;;  %v301_v6 = vld [vmem:[#allocation2 + $0x820] sm:$0xff]  ;;  %vm1139_vm2 = vcmask 195712   ;;  %vm1146_vm3 = vcmask 261312   ;;  %vm1153_vm4 = vcmask 326912  }
  0x28   :  { %v302_v8 = vld [vmem:[#allocation2 + $0x828] sm:$0xff]  ;;  %v303_v10 = vld [vmem:[#allocation2 + $0x830] sm:$0xff]  ;;  %v304_v12 = vld [vmem:[#allocation2 + $0x838] sm:$0xff]  ;;  %vm1160_vm5 = vcmask 392512   ;;  %vm1167_vm6 = vcmask 458112   ;;  %vm1174_vm7 = vcmask 523712  }
  0x29   :  { %v818_v5 = vadd.f32 %v817_v3, %v299_v2  ;;  %v41_v13 = vld [vmem:[#allocation2] sm:$0xff]  ;;  %v42_v15 = vld [vmem:[#allocation2 + $0x8] sm:$0xff]  ;;  %v43_v16 = vld [vmem:[#allocation2 + $0x10] sm:$0xff]  ;;  %vm1215_vm8 = vcmask 1041409   ;;  %vm1217_vm9 = vcmask 523264   ;;  %vm1296_vm10 = vcmask 1043456  }
  0x2a   :  { %v305_v17 = vld [vmem:[#allocation2 + $0x840] sm:$0xff]  ;;  %v553_v18 = vadd.f32 %v42_v15, %v41_v13  ;;  %v44_v20 = vld [vmem:[#allocation2 + $0x18] sm:$0xff]  ;;  %v306_v21 = vld [vmem:[#allocation2 + $0x848] sm:$0xff]  ;;  %vm1292_vm11 = vcmask 31744  }
  0x2b   :  { %v819_v7 = vadd.f32 %v818_v5, %v300_v4  ;;  %v45_v24 = vld [vmem:[#allocation2 + $0x20] sm:$0xff]  ;;  %v307_v25 = vld [vmem:[#allocation2 + $0x850] sm:$0xff]  ;;  %v46_v28 = vld [vmem:[#allocation2 + $0x28] sm:$0xff] }
  0x2c   :  { %v554_v22 = vadd.f32 %v553_v18, %v43_v16  ;;  %v308_v29 = vld [vmem:[#allocation2 + $0x858] sm:$0xff]  ;;  %v47_v32 = vld [vmem:[#allocation2 + $0x30] sm:$0xff]  ;;  %v309_v33 = vld [vmem:[#allocation2 + $0x860] sm:$0xff] }
  0x2d   :  { %v820_v9 = vadd.f32 %v819_v7, %v301_v6  ;;  %v48_v36 = vld [vmem:[#allocation2 + $0x38] sm:$0xff]  ;;  %v329_v37 = vld [vmem:[#allocation2 + $0x900] sm:$0xff]  ;;  %v330_v38 = vld [vmem:[#allocation2 + $0x908] sm:$0xff] }
  0x2e   :  { %v555_v26 = vadd.f32 %v554_v22, %v44_v20  ;;  %v310_v39 = vld [vmem:[#allocation2 + $0x868] sm:$0xff]  ;;  %v331_v41 = vld [vmem:[#allocation2 + $0x910] sm:$0xff]  ;;  %v850_v42 = vadd.f32 %v330_v38, %v329_v37  ;;  %v49_v44 = vld [vmem:[#allocation2 + $0x40] sm:$0xff] }
  0x2f   :  { %v821_v11 = vadd.f32 %v820_v9, %v302_v8  ;;  %v332_v45 = vld [vmem:[#allocation2 + $0x918] sm:$0xff]  ;;  %v311_v46 = vld [vmem:[#allocation2 + $0x870] sm:$0xff]  ;;  %v50_v50 = vld [vmem:[#allocation2 + $0x48] sm:$0xff] }
  0x30   :  { %v556_v30 = vadd.f32 %v555_v26, %v45_v24  ;;  %v851_v48 = vadd.f32 %v850_v42, %v331_v41  ;;  %v333_v51 = vld [vmem:[#allocation2 + $0x920] sm:$0xff]  ;;  %v312_v52 = vld [vmem:[#allocation2 + $0x878] sm:$0xff]  ;;  %v51_v56 = vld [vmem:[#allocation2 + $0x50] sm:$0xff] }
  0x31   :  { %v822_v14 = vadd.f32 %v821_v11, %v303_v10  ;;  %v334_v57 = vld [vmem:[#allocation2 + $0x928] sm:$0xff]  ;;  %v313_v58 = vld [vmem:[#allocation2 + $0x880] sm:$0xff]  ;;  %v52_v62 = vld [vmem:[#allocation2 + $0x58] sm:$0xff] }
  0x32   :  { %v557_v34 = vadd.f32 %v556_v30, %v46_v28  ;;  %v852_v54 = vadd.f32 %v851_v48, %v332_v45  ;;  %v335_v63 = vld [vmem:[#allocation2 + $0x930] sm:$0xff]  ;;  %v314_v0 = vld [vmem:[#allocation2 + $0x888] sm:$0xff]  ;;  %v53_v5 = vld [vmem:[#allocation2 + $0x60] sm:$0xff] }
  0x33   :  { %v823_v19 = vadd.f32 %v822_v14, %v304_v12  ;;  %v315_v3 = vld [vmem:[#allocation2 + $0x890] sm:$0xff]  ;;  %v336_v6 = vld [vmem:[#allocation2 + $0x938] sm:$0xff]  ;;  %v73_v9 = vld [vmem:[#allocation2 + $0x100] sm:$0xff] }
  0x34   :  { %v558_v40 = vadd.f32 %v557_v34, %v47_v32  ;;  %v853_v60 = vadd.f32 %v852_v54, %v333_v51  ;;  %v74_v10 = vld [vmem:[#allocation2 + $0x108] sm:$0xff]  ;;  %v75_v11 = vld [vmem:[#allocation2 + $0x110] sm:$0xff]  ;;  %v337_v14 = vld [vmem:[#allocation2 + $0x940] sm:$0xff] }
  0x35   :  { %v824_v23 = vadd.f32 %v823_v19, %v305_v17  ;;  %v54_v13 = vld [vmem:[#allocation2 + $0x68] sm:$0xff]  ;;  %v586_v15 = vadd.f32 %v74_v10, %v73_v9  ;;  %v316_v16 = vld [vmem:[#allocation2 + $0x898] sm:$0xff]  ;;  %v317_v24 = vld [vmem:[#allocation2 + $0x8a0] sm:$0xff] }
  0x36   :  { %v559_v47 = vadd.f32 %v558_v40, %v48_v36  ;;  %v854_v2 = vadd.f32 %v853_v60, %v334_v57  ;;  %v76_v19 = vld [vmem:[#allocation2 + $0x118] sm:$0xff]  ;;  %v338_v22 = vld [vmem:[#allocation2 + $0x948] sm:$0xff]  ;;  %v339_v30 = vld [vmem:[#allocation2 + $0x950] sm:$0xff] }
  0x37   :  { %v825_v27 = vadd.f32 %v824_v23, %v306_v21  ;;  %v55_v21 = vld [vmem:[#allocation2 + $0x70] sm:$0xff]  ;;  %v587_v23 = vadd.f32 %v586_v15, %v75_v11  ;;  %v318_v32 = vld [vmem:[#allocation2 + $0x8a8] sm:$0xff]  ;;  %v57_v37 = vld [vmem:[#allocation2 + $0x80] sm:$0xff] }
  0x38   :  { %v560_v53 = vadd.f32 %v559_v47, %v49_v44  ;;  %v855_v8 = vadd.f32 %v854_v2, %v335_v63  ;;  %v340_v38 = vld [vmem:[#allocation2 + $0x958] sm:$0xff]  ;;  %v319_v40 = vld [vmem:[#allocation2 + $0x8b0] sm:$0xff]  ;;  %v341_v47 = vld [vmem:[#allocation2 + $0x960] sm:$0xff] }
  0x39   :  { %v826_v31 = vadd.f32 %v825_v27, %v307_v25  ;;  %v77_v27 = vld [vmem:[#allocation2 + $0x120] sm:$0xff]  ;;  %v320_v44 = vld [vmem:[#allocation2 + $0x8b8] sm:$0xff]  ;;  %v362_v57 = vld [vmem:[#allocation2 + $0xa08] sm:$0xff] }
  0x3a   :  { %v561_v59 = vadd.f32 %v560_v53, %v50_v50  ;;  %v856_v18 = vadd.f32 %v855_v8, %v336_v6  ;;  %v361_v53 = vld [vmem:[#allocation2 + $0xa00] sm:$0xff]  ;;  %v343_v2 = vld [vmem:[#allocation2 + $0x970] sm:$0xff]  ;;  %v82_v8 = vld [vmem:[#allocation2 + $0x148] sm:$0xff] }
  0x3b   :  { %v827_v35 = vadd.f32 %v826_v31, %v308_v29  ;;  %v56_v29 = vld [vmem:[#allocation2 + $0x78] sm:$0xff]  ;;  %v588_v31 = vadd.f32 %v587_v23, %v76_v19  ;;  %v883_v63 = vadd.f32 %v362_v57, %v361_v53  ;;  %v61_v11 = vld [vmem:[#allocation2 + $0xa0] sm:$0xff]  ;;  %v323_v15 = vld [vmem:[#allocation2 + $0x8d0] sm:$0xff] }
  0x3c   :  { %v562_v1 = vadd.f32 %v561_v59, %v51_v56  ;;  %v857_v26 = vadd.f32 %v856_v18, %v337_v14  ;;  %v321_v59 = vld [vmem:[#allocation2 + $0x8c0] sm:$0xff]  ;;  %v83_v18 = vld [vmem:[#allocation2 + $0x150] sm:$0xff] }
  0x3d   :  { %v828_v43 = vadd.f32 %v827_v35, %v309_v33  ;;  %v78_v35 = vld [vmem:[#allocation2 + $0x128] sm:$0xff]  ;;  %v365_v14 = vld [vmem:[#allocation2 + $0xa20] sm:$0xff]  ;;  %v107_v53 = vld [vmem:[#allocation2 + $0x210] sm:$0xff] }
  0x3e   :  { %v563_v7 = vadd.f32 %v562_v1, %v52_v62  ;;  %v858_v34 = vadd.f32 %v857_v26, %v338_v22  ;;  %v81_v62 = vld [vmem:[#allocation2 + $0x140] sm:$0xff]  ;;  %v60_v1 = vld [vmem:[#allocation2 + $0x98] sm:$0xff] }
  0x3f   :  { %v829_v49 = vadd.f32 %v828_v43, %v310_v39  ;;  %v589_v39 = vadd.f32 %v588_v31, %v77_v27  ;;  %v79_v43 = vld [vmem:[#allocation2 + $0x130] sm:$0xff]  ;;  %v345_v22 = vld [vmem:[#allocation2 + $0x980] sm:$0xff] }
  0x40   :  { %v564_v17 = vadd.f32 %v563_v7, %v53_v5  ;;  %v859_v42 = vadd.f32 %v858_v34, %v339_v30  ;;  %v322_v5 = vld [vmem:[#allocation2 + $0x8c8] sm:$0xff]  ;;  %v325_v26 = vld [vmem:[#allocation2 + $0x8e0] sm:$0xff] }
  0x41   :  { %v830_v55 = vadd.f32 %v829_v49, %v311_v46  ;;  %v58_v46 = vld [vmem:[#allocation2 + $0x88] sm:$0xff]  ;;  %v590_v48 = vadd.f32 %v589_v39, %v78_v35  ;;  %v59_v49 = vld [vmem:[#allocation2 + $0x90] sm:$0xff] }
  0x42   :  { %v565_v25 = vadd.f32 %v564_v17, %v54_v13  ;;  %v860_v51 = vadd.f32 %v859_v42, %v340_v38  ;;  %v367_v35 = vld [vmem:[#allocation2 + $0xa30] sm:$0xff] }
  0x43   :  { %v831_v61 = vadd.f32 %v830_v55, %v312_v52  ;;  %v80_v52 = vld [vmem:[#allocation2 + $0x138] sm:$0xff]  ;;  %v342_v55 = vld [vmem:[#allocation2 + $0x968] sm:$0xff]  ;;  %v591_v56 = vadd.f32 %v590_v48, %v79_v43  ;;  %v347_v39 = vld [vmem:[#allocation2 + $0x990] sm:$0xff] }
  0x44   :  { %v566_v33 = vadd.f32 %v565_v25, %v55_v21  ;;  %v62_v21 = vld [vmem:[#allocation2 + $0xa8] sm:$0xff]  ;;  %v324_v25 = vld [vmem:[#allocation2 + $0x8d8] sm:$0xff]  ;;  %v65_v48 = vld [vmem:[#allocation2 + $0xc0] sm:$0xff] }
  0x45   :  { %v832_v4 = vadd.f32 %v831_v61, %v313_v58  ;;  %v363_v58 = vld [vmem:[#allocation2 + $0xa10] sm:$0xff]  ;;  %v861_v61 = vadd.f32 %v860_v51, %v341_v47  ;;  %v106_v47 = vld [vmem:[#allocation2 + $0x208] sm:$0xff] }
  0x46   :  { %v567_v41 = vadd.f32 %v566_v33, %v56_v29  ;;  %v884_v9 = vadd.f32 %v883_v63, %v363_v58  ;;  %v84_v29 = vld [vmem:[#allocation2 + $0x158] sm:$0xff]  ;;  %v346_v33 = vld [vmem:[#allocation2 + $0x988] sm:$0xff]  ;;  %v369_v58 = vld [vmem:[#allocation2 + $0xa40] sm:$0xff] }
  0x47   :  { %v833_v12 = vadd.f32 %v832_v4, %v314_v0  ;;  %v364_v4 = vld [vmem:[#allocation2 + $0xa18] sm:$0xff]  ;;  %v862_v7 = vadd.f32 %v861_v61, %v342_v55  ;;  %v86_v51 = vld [vmem:[#allocation2 + $0x168] sm:$0xff] }
  0x48   :  { %v568_v50 = vadd.f32 %v567_v41, %v57_v37  ;;  %v885_v19 = vadd.f32 %v884_v9, %v364_v4  ;;  %v64_v37 = vld [vmem:[#allocation2 + $0xb8] sm:$0xff]  ;;  %v85_v41 = vld [vmem:[#allocation2 + $0x160] sm:$0xff]  ;;  %v66_v61 = vld [vmem:[#allocation2 + $0xc8] sm:$0xff] }
  0x49   :  { %v834_v20 = vadd.f32 %v833_v12, %v315_v3  ;;  %v592_v3 = vadd.f32 %v591_v56, %v80_v52  ;;  %v344_v12 = vld [vmem:[#allocation2 + $0x978] sm:$0xff]  ;;  %v863_v17 = vadd.f32 %v862_v7, %v343_v2  ;;  %v349_v4 = vld [vmem:[#allocation2 + $0x9a0] sm:$0xff]  ;;  %v67_v9 = vld [vmem:[#allocation2 + $0xd0] sm:$0xff] }
  0x4a   :  { %v569_v60 = vadd.f32 %v568_v50, %v58_v46  ;;  %v886_v30 = vadd.f32 %v885_v19, %v365_v14  ;;  %v105_v46 = vld [vmem:[#allocation2 + $0x200] sm:$0xff]  ;;  %v348_v56 = vld [vmem:[#allocation2 + $0x998] sm:$0xff]  ;;  %v110_v19 = vld [vmem:[#allocation2 + $0x228] sm:$0xff] }
  0x4b   :  { %v835_v28 = vadd.f32 %v834_v20, %v316_v16  ;;  %v593_v13 = vadd.f32 %v592_v3, %v81_v62  ;;  %v109_v7 = vld [vmem:[#allocation2 + $0x220] sm:$0xff] }
  0x4c   :  { %v570_v6 = vadd.f32 %v569_v60, %v59_v49  ;;  %v327_v60 = vld [vmem:[#allocation2 + $0x8f0] sm:$0xff] }
  0x4d   :  { %v836_v36 = vadd.f32 %v835_v28, %v317_v24  ;;  %v594_v23 = vadd.f32 %v593_v13, %v82_v8  ;;  %v366_v24 = vld [vmem:[#allocation2 + $0xa28] sm:$0xff]  ;;  %v864_v28 = vadd.f32 %v863_v17, %v344_v12  ;;  %v328_v8 = vld [vmem:[#allocation2 + $0x8f8] sm:$0xff] }
  0x4e   :  { %v571_v16 = vadd.f32 %v570_v6, %v60_v1  ;;  %v887_v42 = vadd.f32 %v886_v30, %v366_v24  ;;  %v370_v6 = vld [vmem:[#allocation2 + $0xa48] sm:$0xff]  ;;  %v88_v12 = vld [vmem:[#allocation2 + $0x178] sm:$0xff]  ;;  %v111_v30 = vld [vmem:[#allocation2 + $0x230] sm:$0xff] }
  0x4f   :  { %v837_v45 = vadd.f32 %v836_v36, %v318_v32  ;;  %v63_v32 = vld [vmem:[#allocation2 + $0xb0] sm:$0xff]  ;;  %v595_v34 = vadd.f32 %v594_v23, %v83_v18  ;;  %v326_v36 = vld [vmem:[#allocation2 + $0x8e8] sm:$0xff]  ;;  %v89_v23 = vld [vmem:[#allocation2 + $0x180] sm:$0xff] }
  0x50   :  { %v572_v27 = vadd.f32 %v571_v16, %v61_v11  ;;  %v888_v52 = vadd.f32 %v887_v42, %v367_v35  ;;  %v350_v16 = vld [vmem:[#allocation2 + $0x9a8] sm:$0xff]  ;;  %v371_v18 = vld [vmem:[#allocation2 + $0xa50] sm:$0xff]  ;;  %v112_v42 = vld [vmem:[#allocation2 + $0x238] sm:$0xff] }
  0x51   :  { %v838_v54 = vadd.f32 %v837_v45, %v319_v40  ;;  %v865_v40 = vadd.f32 %v864_v28, %v345_v22  ;;  %v368_v45 = vld [vmem:[#allocation2 + $0xa38] sm:$0xff]  ;;  %v90_v35 = vld [vmem:[#allocation2 + $0x188] sm:$0xff] }
  0x52   :  { %v573_v38 = vadd.f32 %v572_v27, %v62_v21  ;;  %v889_v1 = vadd.f32 %v888_v52, %v368_v45  ;;  %v351_v27 = vld [vmem:[#allocation2 + $0x9b0] sm:$0xff]  ;;  %v374_v52 = vld [vmem:[#allocation2 + $0xa68] sm:$0xff] }
  0x53   :  { %v839_v0 = vadd.f32 %v838_v54, %v320_v44  ;;  %v596_v44 = vadd.f32 %v595_v34, %v84_v29  ;;  %v866_v50 = vadd.f32 %v865_v40, %v346_v33  ;;  %v619_v54 = vadd.f32 %v106_v47, %v105_v46  ;;  %v372_v29 = vld [vmem:[#allocation2 + $0xa58] sm:$0xff]  ;;  %v393_v47 = vld [vmem:[#allocation2 + $0xb00] sm:$0xff] }
  0x54   :  { %v574_v49 = vadd.f32 %v573_v38, %v63_v32  ;;  %v890_v13 = vadd.f32 %v889_v1, %v369_v58  ;;  %v352_v33 = vld [vmem:[#allocation2 + $0x9b8] sm:$0xff]  ;;  %v70_v38 = vld [vmem:[#allocation2 + $0xe8] sm:$0xff] }
  0x55   :  { %v840_v10 = vadd.f32 %v839_v0, %v321_v59  ;;  %v597_v57 = vadd.f32 %v596_v44, %v85_v41  ;;  %v108_v59 = vld [vmem:[#allocation2 + $0x218] sm:$0xff]  ;;  %v867_v63 = vadd.f32 %v866_v50, %v347_v39  ;;  %v87_v0 = vld [vmem:[#allocation2 + $0x170] sm:$0xff]  ;;  %v620_v2 = vadd.f32 %v619_v54, %v107_v53  ;;  %v373_v41 = vld [vmem:[#allocation2 + $0xa60] sm:$0xff] }
  0x56   :  { %v575_v62 = vadd.f32 %v574_v49, %v64_v37  ;;  %v891_v24 = vadd.f32 %v890_v13, %v370_v6  ;;  %v91_v39 = vld [vmem:[#allocation2 + $0x190] sm:$0xff]  ;;  %v353_v50 = vld [vmem:[#allocation2 + $0x9c0] sm:$0xff]  ;;  %v92_v58 = vld [vmem:[#allocation2 + $0x198] sm:$0xff] }
  0x57   :  { %v841_v20 = vadd.f32 %v840_v10, %v322_v5  ;;  %v598_v5 = vadd.f32 %v597_v57, %v86_v51  ;;  %v868_v11 = vadd.f32 %v867_v63, %v348_v56  ;;  %v621_v14 = vadd.f32 %v620_v2, %v108_v59  ;;  %v395_v49 = vld [vmem:[#allocation2 + $0xb10] sm:$0xff]  ;;  %v113_v53 = vld [vmem:[#allocation2 + $0x240] sm:$0xff]  ;;  %v114_v1 = vld [vmem:[#allocation2 + $0x248] sm:$0xff] }
  0x58   :  { %v576_v10 = vadd.f32 %v575_v62, %v65_v48  ;;  %v394_v48 = vld [vmem:[#allocation2 + $0xb08] sm:$0xff]  ;;  %v93_v6 = vld [vmem:[#allocation2 + $0x1a0] sm:$0xff]  ;;  %v115_v13 = vld [vmem:[#allocation2 + $0x250] sm:$0xff] }
  0x59   :  { %v842_v31 = vadd.f32 %v841_v20, %v323_v15  ;;  %v599_v17 = vadd.f32 %v598_v5, %v87_v0  ;;  %v68_v20 = vld [vmem:[#allocation2 + $0xd8] sm:$0xff]  ;;  %v869_v22 = vadd.f32 %v868_v11, %v349_v4  ;;  %v916_v54 = vadd.f32 %v394_v48, %v393_v47  ;;  %v354_v62 = vld [vmem:[#allocation2 + $0x9c8] sm:$0xff]  ;;  %v375_v0 = vld [vmem:[#allocation2 + $0xa70] sm:$0xff] }
  0x5a   :  { %v577_v21 = vadd.f32 %v576_v10, %v66_v61  ;;  %v396_v61 = vld [vmem:[#allocation2 + $0xb18] sm:$0xff]  ;;  %v355_v10 = vld [vmem:[#allocation2 + $0x9d0] sm:$0xff]  ;;  %v138_v48 = vld [vmem:[#allocation2 + $0x308] sm:$0xff] }
  0x5b   :  { %v843_v43 = vadd.f32 %v842_v31, %v324_v25  ;;  %v622_v25 = vadd.f32 %v621_v14, %v109_v7  ;;  %v600_v28 = vadd.f32 %v599_v17, %v88_v12  ;;  %v69_v31 = vld [vmem:[#allocation2 + $0xe0] sm:$0xff]  ;;  %v870_v34 = vadd.f32 %v869_v22, %v350_v16  ;;  %v376_v12 = vld [vmem:[#allocation2 + $0xa78] sm:$0xff]  ;;  %v94_v17 = vld [vmem:[#allocation2 + $0x1a8] sm:$0xff] }
  0x5c   :  { %v578_v32 = vadd.f32 %v577_v21, %v67_v9  ;;  %v917_v2 = vadd.f32 %v916_v54, %v395_v49  ;;  %v397_v9 = vld [vmem:[#allocation2 + $0xb20] sm:$0xff]  ;;  %v356_v21 = vld [vmem:[#allocation2 + $0x9d8] sm:$0xff]  ;;  %v139_v49 = vld [vmem:[#allocation2 + $0x310] sm:$0xff] }
  0x5d   :  { %v844_v55 = vadd.f32 %v843_v43, %v325_v26  ;;  %v623_v37 = vadd.f32 %v622_v25, %v110_v19  ;;  %v601_v40 = vadd.f32 %v600_v28, %v89_v23  ;;  %v871_v44 = vadd.f32 %v870_v34, %v351_v27  ;;  %v377_v23 = vld [vmem:[#allocation2 + $0xa80] sm:$0xff]  ;;  %v96_v34 = vld [vmem:[#allocation2 + $0x1b8] sm:$0xff] }
  0x5e   :  { %v579_v43 = vadd.f32 %v578_v32, %v68_v20  ;;  %v918_v14 = vadd.f32 %v917_v2, %v396_v61  ;;  %v398_v20 = vld [vmem:[#allocation2 + $0xb28] sm:$0xff]  ;;  %v357_v27 = vld [vmem:[#allocation2 + $0x9e0] sm:$0xff]  ;;  %v399_v32 = vld [vmem:[#allocation2 + $0xb30] sm:$0xff] }
  0x5f   :  { %v845_v3 = vadd.f32 %v844_v55, %v326_v36  ;;  %v892_v36 = vadd.f32 %v891_v24, %v371_v18  ;;  %v624_v46 = vadd.f32 %v623_v37, %v111_v30  ;;  %v602_v51 = vadd.f32 %v601_v40, %v90_v35  ;;  %v71_v55 = vld [vmem:[#allocation2 + $0xf0] sm:$0xff]  ;;  %v116_v24 = vld [vmem:[#allocation2 + $0x258] sm:$0xff]  ;;  %v117_v37 = vld [vmem:[#allocation2 + $0x260] sm:$0xff] }
  0x60   :  { %v580_v56 = vadd.f32 %v579_v43, %v69_v31  ;;  %v872_v57 = vadd.f32 %v871_v44, %v352_v33  ;;  %v919_v25 = vadd.f32 %v918_v14, %v397_v9  ;;  %v358_v33 = vld [vmem:[#allocation2 + $0x9e8] sm:$0xff]  ;;  %v379_v40 = vld [vmem:[#allocation2 + $0xa90] sm:$0xff]  ;;  %v400_v43 = vld [vmem:[#allocation2 + $0xb38] sm:$0xff] }
  0x61   :  { %v846_v15 = vadd.f32 %v845_v3, %v327_v60  ;;  %v893_v45 = vadd.f32 %v892_v36, %v372_v29  ;;  %v625_v60 = vadd.f32 %v624_v46, %v112_v42  ;;  %v603_v63 = vadd.f32 %v602_v51, %v91_v39  ;;  %v72_v3 = vld [vmem:[#allocation2 + $0xf8] sm:$0xff]  ;;  %v95_v29 = vld [vmem:[#allocation2 + $0x1b0] sm:$0xff]  ;;  %v378_v36 = vld [vmem:[#allocation2 + $0xa88] sm:$0xff] }
  0x62   :  { %v581_v4 = vadd.f32 %v580_v56, %v70_v38  ;;  %v873_v5 = vadd.f32 %v872_v57, %v353_v50  ;;  %v920_v38 = vadd.f32 %v919_v25, %v398_v20  ;;  %v137_v44 = vld [vmem:[#allocation2 + $0x300] sm:$0xff]  ;;  %v118_v46 = vld [vmem:[#allocation2 + $0x268] sm:$0xff]  ;;  %v359_v50 = vld [vmem:[#allocation2 + $0x9f0] sm:$0xff] }
  0x63   :  { %v847_v26 = vadd.f32 %v846_v15, %v328_v8  ;;  %v894_v59 = vadd.f32 %v893_v45, %v373_v41  ;;  %v626_v8 = vadd.f32 %v625_v60, %v113_v53  ;;  %v604_v11 = vadd.f32 %v603_v63, %v92_v58  ;;  %v380_v58 = vld [vmem:[#allocation2 + $0xa98] sm:$0xff]  ;;  %v141_v9 = vld [vmem:[#allocation2 + $0x320] sm:$0xff]  ;;  %v403_v14 = vld [vmem:[#allocation2 + $0xb50] sm:$0xff] }
  0x64   :  { %v582_v15 = vadd.f32 %v581_v4, %v71_v55  ;;  %v874_v16 = vadd.f32 %v873_v5, %v354_v62  ;;  %v921_v47 = vadd.f32 %v920_v38, %v399_v32  ;;  %v401_v55 = vld [vmem:[#allocation2 + $0xb40] sm:$0xff]  ;;  %v652_v56 = vadd.f32 %v138_v48, %v137_v44  ;;  %v140_v61 = vld [vmem:[#allocation2 + $0x318] sm:$0xff]  ;;  %v142_v20 = vld [vmem:[#allocation2 + $0x328] sm:$0xff] }
  0x65   :  { %848 = vadd.xlane.f32.xlu1 %v847_v26  ;;  %v895_v7 = vadd.f32 %v894_v59, %v374_v52  ;;  %v627_v19 = vadd.f32 %v626_v8, %v114_v1  ;;  %v605_v22 = vadd.f32 %v604_v11, %v93_v6  ;;  %v97_v52 = vld [vmem:[#allocation2 + $0x1c0] sm:$0xff]  ;;  %v119_v59 = vld [vmem:[#allocation2 + $0x270] sm:$0xff]  ;;  %v360_v62 = vld [vmem:[#allocation2 + $0x9f8] sm:$0xff] }
  0x66   :  { %v583_v26 = vadd.f32 %v582_v15, %v72_v3  ;;  %v875_v28 = vadd.f32 %v874_v16, %v355_v10  ;;  %v922_v60 = vadd.f32 %v921_v47, %v400_v43  ;;  %v402_v3 = vld [vmem:[#allocation2 + $0xb48] sm:$0xff]  ;;  %v653_v4 = vadd.f32 %v652_v56, %v139_v49  ;;  %v381_v6 = vld [vmem:[#allocation2 + $0xaa0] sm:$0xff]  ;;  %v99_v11 = vld [vmem:[#allocation2 + $0x1d0] sm:$0xff] }
  0x67   :  { %v896_v18 = vadd.f32 %v895_v7, %v375_v0  ;;  %v628_v31 = vadd.f32 %v627_v19, %v115_v13  ;;  %v606_v35 = vadd.f32 %v605_v22, %v94_v17  ;;  %v98_v0 = vld [vmem:[#allocation2 + $0x1c8] sm:$0xff]  ;;  %v120_v7 = vld [vmem:[#allocation2 + $0x278] sm:$0xff]  ;;  %v143_v32 = vld [vmem:[#allocation2 + $0x330] sm:$0xff] }
  0x68   :  { %584 = vadd.xlane.f32.xlu0 %v583_v26  ;;  %v876_v39 = vadd.f32 %v875_v28, %v356_v21  ;;  %v923_v8 = vadd.f32 %v922_v60, %v401_v55  ;;  %v654_v15 = vadd.f32 %v653_v4, %v140_v61  ;;  %v382_v17 = vld [vmem:[#allocation2 + $0xaa8] sm:$0xff]  ;;  %v100_v22 = vld [vmem:[#allocation2 + $0x1d8] sm:$0xff]  ;;  %v405_v38 = vld [vmem:[#allocation2 + $0xb60] sm:$0xff] }
  0x69   :  { %v897_v30 = vadd.f32 %v896_v18, %v376_v12  ;;  %v629_v42 = vadd.f32 %v628_v31, %v116_v24  ;;  %v607_v45 = vadd.f32 %v606_v35, %v95_v29  ;;  %v121_v18 = vld [vmem:[#allocation2 + $0x280] sm:$0xff]  ;;  %v404_v26 = vld [vmem:[#allocation2 + $0xb58] sm:$0xff]  ;;  %v383_v29 = vld [vmem:[#allocation2 + $0xab0] sm:$0xff] }
  0x6a   :  { %v877_v51 = vadd.f32 %v876_v39, %v357_v27  ;;  %v924_v19 = vadd.f32 %v923_v8, %v402_v3  ;;  %v655_v27 = vadd.f32 %v654_v15, %v141_v9  ;;  %v425_v43 = vld [vmem:[#allocation2 + $0xc00] sm:$0xff]  ;;  %v426_v44 = vld [vmem:[#allocation2 + $0xc08] sm:$0xff]  ;;  %v428_v56 = vld [vmem:[#allocation2 + $0xc18] sm:$0xff] }
  0x6b   :  { %v898_v41 = vadd.f32 %v897_v30, %v377_v23  ;;  %v630_v54 = vadd.f32 %v629_v42, %v117_v37  ;;  %v608_v57 = vadd.f32 %v607_v45, %v96_v34  ;;  %v101_v23 = vld [vmem:[#allocation2 + $0x1e0] sm:$0xff]  ;;  %v122_v30 = vld [vmem:[#allocation2 + $0x288] sm:$0xff]  ;;  %v384_v34 = vld [vmem:[#allocation2 + $0xab8] sm:$0xff] }
  0x6c   :  { %v878_v63 = vadd.f32 %v877_v51, %v358_v33  ;;  %v925_v31 = vadd.f32 %v924_v19, %v403_v14  ;;  %v102_v33 = vld [vmem:[#allocation2 + $0x1e8] sm:$0xff]  ;;  %v656_v39 = vadd.f32 %v655_v27, %v142_v20  ;;  %v144_v42 = vld [vmem:[#allocation2 + $0x338] sm:$0xff]  ;;  %v385_v45 = vld [vmem:[#allocation2 + $0xac0] sm:$0xff]  ;;  %v949_v51 = vadd.f32 %v426_v44, %v425_v43 }
  0x6d   :  { %v899_v53 = vadd.f32 %v898_v41, %v378_v36  ;;  %v631_v2 = vadd.f32 %v630_v54, %v118_v46  ;;  %v609_v5 = vadd.f32 %v608_v57, %v97_v52  ;;  %v123_v36 = vld [vmem:[#allocation2 + $0x290] sm:$0xff]  ;;  %v406_v48 = vld [vmem:[#allocation2 + $0xb68] sm:$0xff]  ;;  %v145_v55 = vld [vmem:[#allocation2 + $0x340] sm:$0xff] }
  0x6e   :  { %v879_v10 = vadd.f32 %v878_v63, %v359_v50  ;;  %v926_v41 = vadd.f32 %v925_v31, %v404_v26  ;;  %v657_v49 = vadd.f32 %v656_v39, %v143_v32  ;;  %v427_v50 = vld [vmem:[#allocation2 + $0xc10] sm:$0xff]  ;;  %v146_v3 = vld [vmem:[#allocation2 + $0x348] sm:$0xff]  ;;  %v429_v4 = vld [vmem:[#allocation2 + $0xc20] sm:$0xff] }
  0x6f   :  { %v900_v1 = vadd.f32 %v899_v53, %v379_v40  ;;  %v632_v13 = vadd.f32 %v631_v2, %v119_v59  ;;  %v610_v16 = vadd.f32 %v609_v5, %v98_v0  ;;  %v124_v53 = vld [vmem:[#allocation2 + $0x298] sm:$0xff]  ;;  %v103_v57 = vld [vmem:[#allocation2 + $0x1f0] sm:$0xff]  ;;  %v950_v63 = vadd.f32 %v949_v51, %v427_v50  ;;  %v409_v20 = vld [vmem:[#allocation2 + $0xb80] sm:$0xff] }
  0x70   :  { %v880_v21 = vadd.f32 %v879_v10, %v360_v62  ;;  %v927_v54 = vadd.f32 %v926_v41, %v405_v38  ;;  %v407_v61 = vld [vmem:[#allocation2 + $0xb70] sm:$0xff]  ;;  %v658_v62 = vadd.f32 %v657_v49, %v144_v42  ;;  %v104_v5 = vld [vmem:[#allocation2 + $0x1f8] sm:$0xff]  ;;  %v410_v32 = vld [vmem:[#allocation2 + $0xb88] sm:$0xff] }
  0x71   :  { %v901_v12 = vadd.f32 %v900_v1, %v380_v58  ;;  %v633_v25 = vadd.f32 %v632_v13, %v120_v7  ;;  %v611_v28 = vadd.f32 %v610_v16, %v99_v11  ;;  %v386_v58 = vld [vmem:[#allocation2 + $0xac8] sm:$0xff]  ;;  %v125_v1 = vld [vmem:[#allocation2 + $0x2a0] sm:$0xff]  ;;  %v408_v9 = vld [vmem:[#allocation2 + $0xb78] sm:$0xff]  ;;  %v951_v11 = vadd.f32 %v950_v63, %v428_v56 }
  0x72   :  { %881 = vadd.xlane.f32.xlu1 %v880_v21  ;;  %v928_v2 = vadd.f32 %v927_v54, %v406_v48  ;;  %v659_v10 = vadd.f32 %v658_v62, %v145_v55  ;;  %v126_v13 = vld [vmem:[#allocation2 + $0x2a8] sm:$0xff]  ;;  %v147_v15 = vld [vmem:[#allocation2 + $0x350] sm:$0xff]  ;;  %v148_v26 = vld [vmem:[#allocation2 + $0x358] sm:$0xff] }
  0x73   :  { %v902_v24 = vadd.f32 %v901_v12, %v381_v6  ;;  %v634_v37 = vadd.f32 %v633_v25, %v121_v18  ;;  %v612_v40 = vadd.f32 %v611_v28, %v100_v22  ;;  %v387_v6 = vld [vmem:[#allocation2 + $0xad0] sm:$0xff]  ;;  %v430_v16 = vld [vmem:[#allocation2 + $0xc28] sm:$0xff]  ;;  %v952_v22 = vadd.f32 %v951_v11, %v429_v4  ;;  %v389_v28 = vld [vmem:[#allocation2 + $0xae0] sm:$0xff] }
  0x74   :  { %v929_v14 = vadd.f32 %v928_v2, %v407_v61  ;;  %v660_v21 = vadd.f32 %v659_v10, %v146_v3  ;;  %v431_v27 = vld [vmem:[#allocation2 + $0xc30] sm:$0xff]  ;;  %v149_v38 = vld [vmem:[#allocation2 + $0x360] sm:$0xff]  ;;  %v432_v39 = vld [vmem:[#allocation2 + $0xc38] sm:$0xff] }
  0x75   :  { %v903_v35 = vadd.f32 %v902_v24, %v382_v17  ;;  %v635_v47 = vadd.f32 %v634_v37, %v122_v30  ;;  %v613_v52 = vadd.f32 %v612_v40, %v101_v23  ;;  %v388_v17 = vld [vmem:[#allocation2 + $0xad8] sm:$0xff]  ;;  %v127_v24 = vld [vmem:[#allocation2 + $0x2b0] sm:$0xff]  ;;  %v169_v44 = vld [vmem:[#allocation2 + $0x400] sm:$0xff] }
  0x76   :  { %v930_v25 = vadd.f32 %v929_v14, %v408_v9  ;;  %v128_v30 = vld [vmem:[#allocation2 + $0x2b8] sm:$0xff]  ;;  %v150_v49 = vld [vmem:[#allocation2 + $0x368] sm:$0xff]  ;;  %v433_v50 = vld [vmem:[#allocation2 + $0xc40] sm:$0xff] }
  0x77   :  { %v904_v46 = vadd.f32 %v903_v35, %v383_v29  ;;  %v636_v60 = vadd.f32 %v635_v47, %v123_v36  ;;  %v614_v0 = vadd.f32 %v613_v52, %v102_v33  ;;  %v661_v33 = vadd.f32 %v660_v21, %v147_v15  ;;  %v390_v35 = vld [vmem:[#allocation2 + $0xae8] sm:$0xff]  ;;  %v411_v36 = vld [vmem:[#allocation2 + $0xb90] sm:$0xff]  ;;  %v129_v47 = vld [vmem:[#allocation2 + $0x2c0] sm:$0xff] }
  0x78   :  { %v931_v37 = vadd.f32 %v930_v25, %v409_v20  ;;  %v391_v52 = vld [vmem:[#allocation2 + $0xaf0] sm:$0xff]  ;;  %v412_v55 = vld [vmem:[#allocation2 + $0xb98] sm:$0xff]  ;;  %v434_v62 = vld [vmem:[#allocation2 + $0xc48] sm:$0xff] }
  0x79   :  { %v905_v59 = vadd.f32 %v904_v46, %v384_v34  ;;  %v637_v8 = vadd.f32 %v636_v60, %v124_v53  ;;  %v615_v12 = vadd.f32 %v614_v0, %v103_v57  ;;  %v953_v34 = vadd.f32 %v952_v22, %v430_v16  ;;  %v171_v46 = vld [vmem:[#allocation2 + $0x410] sm:$0xff]  ;;  %v392_v0 = vld [vmem:[#allocation2 + $0xaf8] sm:$0xff]  ;;  %v413_v3 = vld [vmem:[#allocation2 + $0xba0] sm:$0xff] }
  0x7a   :  { %v662_v42 = vadd.f32 %v661_v33, %v148_v26  ;;  %v932_v48 = vadd.f32 %v931_v37, %v410_v32  ;;  %v151_v61 = vld [vmem:[#allocation2 + $0x370] sm:$0xff]  ;;  %v152_v9 = vld [vmem:[#allocation2 + $0x378] sm:$0xff]  ;;  %v414_v14 = vld [vmem:[#allocation2 + $0xba8] sm:$0xff] }
  0x7b   :  { %v906_v7 = vadd.f32 %v905_v59, %v385_v45  ;;  %v638_v19 = vadd.f32 %v637_v8, %v125_v1  ;;  %v616_v23 = vadd.f32 %v615_v12, %v104_v5  ;;  %v954_v43 = vadd.f32 %v953_v34, %v431_v27  ;;  %v170_v45 = vld [vmem:[#allocation2 + $0x408] sm:$0xff]  ;;  %v435_v10 = vld [vmem:[#allocation2 + $0xc50] sm:$0xff]  ;;  %v153_v20 = vld [vmem:[#allocation2 + $0x380] sm:$0xff] }
  0x7c   :  { %v685_v51 = vadd.f32 %v170_v45, %v169_v44  ;;  %v663_v56 = vadd.f32 %v662_v42, %v149_v38  ;;  %v130_v59 = vld [vmem:[#allocation2 + $0x2c8] sm:$0xff]  ;;  %v933_v60 = vadd.f32 %v932_v48, %v411_v36  ;;  %v436_v21 = vld [vmem:[#allocation2 + $0xc58] sm:$0xff]  ;;  %v415_v26 = vld [vmem:[#allocation2 + $0xbb0] sm:$0xff] }
  0x7d   :  { %v907_v18 = vadd.f32 %v906_v7, %v386_v58  ;;  %v639_v31 = vadd.f32 %v638_v19, %v126_v13  ;;  %617 = vadd.xlane.f32.xlu0 %v616_v23  ;;  %v955_v57 = vadd.f32 %v954_v43, %v432_v39  ;;  %v172_v58 = vld [vmem:[#allocation2 + $0x418] sm:$0xff]  ;;  %v131_v7 = vld [vmem:[#allocation2 + $0x2d0] sm:$0xff]  ;;  %v154_v33 = vld [vmem:[#allocation2 + $0x388] sm:$0xff] }
  0x7e   :  { %v686_v63 = vadd.f32 %v685_v51, %v171_v46  ;;  %v664_v4 = vadd.f32 %v663_v56, %v150_v49  ;;  %v934_v8 = vadd.f32 %v933_v60, %v412_v55  ;;  %v437_v34 = vld [vmem:[#allocation2 + $0xc60] sm:$0xff]  ;;  %v155_v37 = vld [vmem:[#allocation2 + $0x390] sm:$0xff]  ;;  %v438_v43 = vld [vmem:[#allocation2 + $0xc68] sm:$0xff] }
  0x7f   :  { %v908_v29 = vadd.f32 %v907_v18, %v387_v6  ;;  %v640_v41 = vadd.f32 %v639_v31, %v127_v24  ;;  %v956_v5 = vadd.f32 %v955_v57, %v433_v50  ;;  %v173_v6 = vld [vmem:[#allocation2 + $0x420] sm:$0xff]  ;;  %v132_v18 = vld [vmem:[#allocation2 + $0x2d8] sm:$0xff]  ;;  %v458_v45 = vld [vmem:[#allocation2 + $0xd08] sm:$0xff] }
  0x80   :  { %v687_v11 = vadd.f32 %v686_v63, %v172_v58  ;;  %v665_v15 = vadd.f32 %v664_v4, %v151_v61  ;;  %v935_v19 = vadd.f32 %v934_v8, %v413_v3  ;;  %v133_v24 = vld [vmem:[#allocation2 + $0x2e0] sm:$0xff]  ;;  %v416_v31 = vld [vmem:[#allocation2 + $0xbb8] sm:$0xff]  ;;  %v459_v46 = vld [vmem:[#allocation2 + $0xd10] sm:$0xff] }
  0x81   :  { %v909_v40 = vadd.f32 %v908_v29, %v388_v17  ;;  %v641_v54 = vadd.f32 %v640_v41, %v128_v30  ;;  %v957_v16 = vadd.f32 %v956_v5, %v434_v62  ;;  %v174_v17 = vld [vmem:[#allocation2 + $0x428] sm:$0xff]  ;;  %v175_v29 = vld [vmem:[#allocation2 + $0x430] sm:$0xff]  ;;  %v457_v41 = vld [vmem:[#allocation2 + $0xd00] sm:$0xff] }
  0x82   :  { %v688_v22 = vadd.f32 %v687_v11, %v173_v6  ;;  %v666_v27 = vadd.f32 %v665_v15, %v152_v9  ;;  %v134_v30 = vld [vmem:[#allocation2 + $0x2e8] sm:$0xff]  ;;  %v936_v32 = vadd.f32 %v935_v19, %v414_v14  ;;  %v417_v49 = vld [vmem:[#allocation2 + $0xbc0] sm:$0xff]  ;;  %v156_v55 = vld [vmem:[#allocation2 + $0x398] sm:$0xff] }
  0x83   :  { %v910_v53 = vadd.f32 %v909_v40, %v389_v28  ;;  %v642_v2 = vadd.f32 %v641_v54, %v129_v47  ;;  %v958_v28 = vadd.f32 %v957_v16, %v435_v10  ;;  %v176_v40 = vld [vmem:[#allocation2 + $0x438] sm:$0xff]  ;;  %v135_v47 = vld [vmem:[#allocation2 + $0x2f0] sm:$0xff]  ;;  %v418_v61 = vld [vmem:[#allocation2 + $0xbc8] sm:$0xff] }
  0x84   :  { %v667_v38 = vadd.f32 %v666_v27, %v153_v20  ;;  %v937_v42 = vadd.f32 %v936_v32, %v415_v26  ;;  %v439_v56 = vld [vmem:[#allocation2 + $0xc70] sm:$0xff]  ;;  %v460_v58 = vld [vmem:[#allocation2 + $0xd18] sm:$0xff]  ;;  %v157_v3 = vld [vmem:[#allocation2 + $0x3a0] sm:$0xff] }
  0x85   :  { %v911_v1 = vadd.f32 %v910_v53, %v390_v35  ;;  %v643_v13 = vadd.f32 %v642_v2, %v130_v59  ;;  %v689_v35 = vadd.f32 %v688_v22, %v174_v17  ;;  %v959_v39 = vadd.f32 %v958_v28, %v436_v21  ;;  %v136_v59 = vld [vmem:[#allocation2 + $0x2f8] sm:$0xff]  ;;  %v461_v6 = vld [vmem:[#allocation2 + $0xd20] sm:$0xff]  ;;  %v419_v8 = vld [vmem:[#allocation2 + $0xbd0] sm:$0xff] }
  0x86   :  { %v668_v50 = vadd.f32 %v667_v38, %v154_v33  ;;  %v982_v53 = vadd.f32 %v458_v45, %v457_v41  ;;  %v938_v54 = vadd.f32 %v937_v42, %v416_v31  ;;  %v440_v4 = vld [vmem:[#allocation2 + $0xc78] sm:$0xff]  ;;  %v179_v11 = vld [vmem:[#allocation2 + $0x450] sm:$0xff]  ;;  %v158_v14 = vld [vmem:[#allocation2 + $0x3a8] sm:$0xff] }
  0x87   :  { %v912_v12 = vadd.f32 %v911_v1, %v391_v52  ;;  %v644_v25 = vadd.f32 %v643_v13, %v131_v7  ;;  %v690_v44 = vadd.f32 %v689_v35, %v175_v29  ;;  %v960_v51 = vadd.f32 %v959_v39, %v437_v34  ;;  %v177_v52 = vld [vmem:[#allocation2 + $0x440] sm:$0xff]  ;;  %v462_v17 = vld [vmem:[#allocation2 + $0xd28] sm:$0xff]  ;;  %v420_v19 = vld [vmem:[#allocation2 + $0xbd8] sm:$0xff] }
  0x88   :  { %v669_v62 = vadd.f32 %v668_v50, %v155_v37  ;;  %v983_v1 = vadd.f32 %v982_v53, %v459_v46  ;;  %v939_v2 = vadd.f32 %v938_v54, %v417_v49  ;;  %v441_v15 = vld [vmem:[#allocation2 + $0xc80] sm:$0xff]  ;;  %v159_v26 = vld [vmem:[#allocation2 + $0x3b0] sm:$0xff]  ;;  %v442_v27 = vld [vmem:[#allocation2 + $0xc88] sm:$0xff] }
  0x89   :  { %v913_v23 = vadd.f32 %v912_v12, %v392_v0  ;;  %v645_v36 = vadd.f32 %v644_v25, %v132_v18  ;;  %v691_v57 = vadd.f32 %v690_v44, %v176_v40  ;;  %v961_v63 = vadd.f32 %v960_v51, %v438_v43  ;;  %v178_v0 = vld [vmem:[#allocation2 + $0x448] sm:$0xff]  ;;  %v421_v20 = vld [vmem:[#allocation2 + $0xbe0] sm:$0xff]  ;;  %v463_v29 = vld [vmem:[#allocation2 + $0xd30] sm:$0xff] }
  0x8a   :  { %v670_v9 = vadd.f32 %v669_v62, %v156_v55  ;;  %v984_v12 = vadd.f32 %v983_v1, %v460_v58  ;;  %v940_v13 = vadd.f32 %v939_v2, %v418_v61  ;;  %v160_v31 = vld [vmem:[#allocation2 + $0x3b8] sm:$0xff]  ;;  %v443_v33 = vld [vmem:[#allocation2 + $0xc90] sm:$0xff]  ;;  %v181_v35 = vld [vmem:[#allocation2 + $0x460] sm:$0xff] }
  0x8b   :  { %914 = vadd.xlane.f32.xlu1 %v913_v23  ;;  %v646_v48 = vadd.f32 %v645_v36, %v133_v24  ;;  %v692_v5 = vadd.f32 %v691_v57, %v177_v52  ;;  %v962_v10 = vadd.f32 %v961_v63, %v439_v56  ;;  %v180_v23 = vld [vmem:[#allocation2 + $0x458] sm:$0xff]  ;;  %v201_v40 = vld [vmem:[#allocation2 + $0x500] sm:$0xff]  ;;  %v202_v41 = vld [vmem:[#allocation2 + $0x508] sm:$0xff] }
  0x8c   :  { %v671_v21 = vadd.f32 %v670_v9, %v157_v3  ;;  %v985_v24 = vadd.f32 %v984_v12, %v461_v6  ;;  %v941_v25 = vadd.f32 %v940_v13, %v419_v8  ;;  %v464_v39 = vld [vmem:[#allocation2 + $0xd38] sm:$0xff]  ;;  %v161_v42 = vld [vmem:[#allocation2 + $0x3c0] sm:$0xff]  ;;  %v182_v45 = vld [vmem:[#allocation2 + $0x468] sm:$0xff] }
  0x8d   :  { %v647_v60 = vadd.f32 %v646_v48, %v134_v30  ;;  %v693_v16 = vadd.f32 %v692_v5, %v178_v0  ;;  %v963_v22 = vadd.f32 %v962_v10, %v440_v4  ;;  %v422_v30 = vld [vmem:[#allocation2 + $0xbe8] sm:$0xff]  ;;  %v718_v48 = vadd.f32 %v202_v41, %v201_v40  ;;  %v444_v50 = vld [vmem:[#allocation2 + $0xc98] sm:$0xff]  ;;  %v465_v52 = vld [vmem:[#allocation2 + $0xd40] sm:$0xff] }
  0x8e   :  { %v672_v32 = vadd.f32 %v671_v21, %v158_v14  ;;  %v986_v36 = vadd.f32 %v985_v24, %v462_v17  ;;  %v942_v37 = vadd.f32 %v941_v25, %v420_v19  ;;  %v204_v53 = vld [vmem:[#allocation2 + $0x518] sm:$0xff]  ;;  %v423_v54 = vld [vmem:[#allocation2 + $0xbf0] sm:$0xff]  ;;  %v162_v55 = vld [vmem:[#allocation2 + $0x3c8] sm:$0xff] }
  0x8f   :  { %v648_v7 = vadd.f32 %v647_v60, %v135_v47  ;;  %v694_v28 = vadd.f32 %v693_v16, %v179_v11  ;;  %v964_v34 = vadd.f32 %v963_v22, %v441_v15  ;;  %v203_v47 = vld [vmem:[#allocation2 + $0x510] sm:$0xff]  ;;  %v445_v62 = vld [vmem:[#allocation2 + $0xca0] sm:$0xff]  ;;  %v466_v0 = vld [vmem:[#allocation2 + $0xd48] sm:$0xff] }
  0x90   :  { %v673_v43 = vadd.f32 %v672_v32, %v159_v26  ;;  %v987_v46 = vadd.f32 %v986_v36, %v463_v29  ;;  %v943_v49 = vadd.f32 %v942_v37, %v421_v20  ;;  %v183_v58 = vld [vmem:[#allocation2 + $0x470] sm:$0xff]  ;;  %v719_v60 = vadd.f32 %v718_v48, %v203_v47  ;;  %v205_v1 = vld [vmem:[#allocation2 + $0x520] sm:$0xff]  ;;  %v424_v2 = vld [vmem:[#allocation2 + $0xbf8] sm:$0xff] }
  0x91   :  { %v649_v18 = vadd.f32 %v648_v7, %v136_v59  ;;  %v695_v38 = vadd.f32 %v694_v28, %v180_v23  ;;  %v965_v44 = vadd.f32 %v964_v34, %v442_v27  ;;  %v163_v3 = vld [vmem:[#allocation2 + $0x3d0] sm:$0xff]  ;;  %v184_v6 = vld [vmem:[#allocation2 + $0x478] sm:$0xff]  ;;  %v446_v10 = vld [vmem:[#allocation2 + $0xca8] sm:$0xff] }
  0x92   :  { %v674_v56 = vadd.f32 %v673_v43, %v160_v31  ;;  %v988_v59 = vadd.f32 %v987_v46, %v464_v39  ;;  %v944_v61 = vadd.f32 %v943_v49, %v422_v30  ;;  %v720_v8 = vadd.f32 %v719_v60, %v204_v53  ;;  %v467_v12 = vld [vmem:[#allocation2 + $0xd50] sm:$0xff]  ;;  %v206_v13 = vld [vmem:[#allocation2 + $0x528] sm:$0xff]  ;;  %v164_v14 = vld [vmem:[#allocation2 + $0x3d8] sm:$0xff] }
  0x93   :  { %650 = vadd.xlane.f32.xlu0 %v649_v18  ;;  %v696_v51 = vadd.f32 %v695_v38, %v181_v35  ;;  %v966_v57 = vadd.f32 %v965_v44, %v443_v33  ;;  %v185_v17 = vld [vmem:[#allocation2 + $0x480] sm:$0xff]  ;;  %v447_v21 = vld [vmem:[#allocation2 + $0xcb0] sm:$0xff]  ;;  %v468_v23 = vld [vmem:[#allocation2 + $0xd58] sm:$0xff] }
  0x94   :  { %v675_v4 = vadd.f32 %v674_v56, %v161_v42  ;;  %v989_v7 = vadd.f32 %v988_v59, %v465_v52  ;;  %v945_v9 = vadd.f32 %v944_v61, %v423_v54  ;;  %v721_v19 = vadd.f32 %v720_v8, %v205_v1  ;;  %v207_v24 = vld [vmem:[#allocation2 + $0x530] sm:$0xff]  ;;  %v165_v25 = vld [vmem:[#allocation2 + $0x3e0] sm:$0xff]  ;;  %v448_v27 = vld [vmem:[#allocation2 + $0xcb8] sm:$0xff] }
  0x95   :  { %v697_v63 = vadd.f32 %v696_v51, %v182_v45  ;;  %v967_v5 = vadd.f32 %v966_v57, %v444_v50  ;;  %v186_v29 = vld [vmem:[#allocation2 + $0x488] sm:$0xff]  ;;  %v187_v33 = vld [vmem:[#allocation2 + $0x490] sm:$0xff]  ;;  %v469_v35 = vld [vmem:[#allocation2 + $0xd60] sm:$0xff] }
  0x96   :  { %v676_v15 = vadd.f32 %v675_v4, %v162_v55  ;;  %v990_v18 = vadd.f32 %v989_v7, %v466_v0  ;;  %v946_v20 = vadd.f32 %v945_v9, %v424_v2  ;;  %v722_v31 = vadd.f32 %v721_v19, %v206_v13  ;;  %v166_v32 = vld [vmem:[#allocation2 + $0x3e8] sm:$0xff]  ;;  %v208_v36 = vld [vmem:[#allocation2 + $0x538] sm:$0xff]  ;;  %v489_v41 = vld [vmem:[#allocation2 + $0xe00] sm:$0xff] }
  0x97   :  { %v698_v11 = vadd.f32 %v697_v63, %v183_v58  ;;  %v968_v16 = vadd.f32 %v967_v5, %v445_v62  ;;  %v490_v42 = vld [vmem:[#allocation2 + $0xe08] sm:$0xff]  ;;  %v491_v43 = vld [vmem:[#allocation2 + $0xe10] sm:$0xff]  ;;  %v449_v44 = vld [vmem:[#allocation2 + $0xcc0] sm:$0xff] }
  0x98   :  { %v677_v26 = vadd.f32 %v676_v15, %v163_v3  ;;  %v991_v30 = vadd.f32 %v990_v18, %v467_v12  ;;  %947 = vadd.xlane.f32.xlu1 %v946_v20  ;;  %v723_v40 = vadd.f32 %v722_v31, %v207_v24  ;;  %v470_v46 = vld [vmem:[#allocation2 + $0xd68] sm:$0xff]  ;;  %v209_v47 = vld [vmem:[#allocation2 + $0x540] sm:$0xff]  ;;  %v1015_v48 = vadd.f32 %v490_v42, %v489_v41  ;;  %v167_v49 = vld [vmem:[#allocation2 + $0x3f0] sm:$0xff] }
  0x99   :  { %v699_v22 = vadd.f32 %v698_v11, %v184_v6  ;;  %v969_v28 = vadd.f32 %v968_v16, %v446_v10  ;;  %v188_v52 = vld [vmem:[#allocation2 + $0x498] sm:$0xff]  ;;  %v450_v56 = vld [vmem:[#allocation2 + $0xcc8] sm:$0xff]  ;;  %v471_v58 = vld [vmem:[#allocation2 + $0xd70] sm:$0xff] }
  0x9a   :  { %v678_v37 = vadd.f32 %v677_v26, %v164_v14  ;;  %v992_v39 = vadd.f32 %v991_v30, %v468_v23  ;;  %v724_v54 = vadd.f32 %v723_v40, %v208_v36  ;;  %v492_v55 = vld [vmem:[#allocation2 + $0xe18] sm:$0xff]  ;;  %v210_v59 = vld [vmem:[#allocation2 + $0x548] sm:$0xff]  ;;  %v1016_v60 = vadd.f32 %v1015_v48, %v491_v43  ;;  %v189_v0 = vld [vmem:[#allocation2 + $0x4a0] sm:$0xff] }
  0x9b   :  { %v700_v34 = vadd.f32 %v699_v22, %v185_v17  ;;  %v970_v38 = vadd.f32 %v969_v28, %v447_v21  ;;  %v168_v61 = vld [vmem:[#allocation2 + $0x3f8] sm:$0xff]  ;;  %v493_v3 = vld [vmem:[#allocation2 + $0xe20] sm:$0xff]  ;;  %v451_v4 = vld [vmem:[#allocation2 + $0xcd0] sm:$0xff] }
  0x9c   :  { %v679_v50 = vadd.f32 %v678_v37, %v165_v25  ;;  %v993_v53 = vadd.f32 %v992_v39, %v469_v35  ;;  %v725_v2 = vadd.f32 %v724_v54, %v209_v47  ;;  %v472_v6 = vld [vmem:[#allocation2 + $0xd78] sm:$0xff]  ;;  %v211_v7 = vld [vmem:[#allocation2 + $0x550] sm:$0xff]  ;;  %v1017_v8 = vadd.f32 %v1016_v60, %v492_v55  ;;  %v190_v11 = vld [vmem:[#allocation2 + $0x4a8] sm:$0xff] }
  0x9d   :  { %v701_v45 = vadd.f32 %v700_v34, %v186_v29  ;;  %v971_v51 = vadd.f32 %v970_v38, %v448_v27  ;;  %v494_v14 = vld [vmem:[#allocation2 + $0xe28] sm:$0xff]  ;;  %v452_v15 = vld [vmem:[#allocation2 + $0xcd8] sm:$0xff]  ;;  %v473_v17 = vld [vmem:[#allocation2 + $0xd80] sm:$0xff] }
  0x9e   :  { %v680_v62 = vadd.f32 %v679_v50, %v166_v32  ;;  %v994_v1 = vadd.f32 %v993_v53, %v470_v46  ;;  %v726_v13 = vadd.f32 %v725_v2, %v210_v59  ;;  %v212_v18 = vld [vmem:[#allocation2 + $0x558] sm:$0xff]  ;;  %v1018_v19 = vadd.f32 %v1017_v8, %v493_v3  ;;  %v453_v21 = vld [vmem:[#allocation2 + $0xce0] sm:$0xff]  ;;  %v191_v23 = vld [vmem:[#allocation2 + $0x4b0] sm:$0xff] }
  0x9f   :  { %v702_v57 = vadd.f32 %v701_v45, %v187_v33  ;;  %v972_v63 = vadd.f32 %v971_v51, %v449_v44  ;;  %v495_v26 = vld [vmem:[#allocation2 + $0xe30] sm:$0xff]  ;;  %v454_v27 = vld [vmem:[#allocation2 + $0xce8] sm:$0xff]  ;;  %v192_v28 = vld [vmem:[#allocation2 + $0x4b8] sm:$0xff] }
  0xa0   :  { %v681_v9 = vadd.f32 %v680_v62, %v167_v49  ;;  %v995_v12 = vadd.f32 %v994_v1, %v471_v58  ;;  %v727_v25 = vadd.f32 %v726_v13, %v211_v7  ;;  %v474_v30 = vld [vmem:[#allocation2 + $0xd88] sm:$0xff]  ;;  %v213_v31 = vld [vmem:[#allocation2 + $0x560] sm:$0xff]  ;;  %v1019_v32 = vadd.f32 %v1018_v19, %v494_v14  ;;  %v475_v34 = vld [vmem:[#allocation2 + $0xd90] sm:$0xff] }
  0xa1   :  { %v703_v5 = vadd.f32 %v702_v57, %v188_v52  ;;  %v973_v10 = vadd.f32 %v972_v63, %v450_v56  ;;  %v496_v37 = vld [vmem:[#allocation2 + $0xe38] sm:$0xff]  ;;  %v233_v38 = vld [vmem:[#allocation2 + $0x600] sm:$0xff]  ;;  %v214_v40 = vld [vmem:[#allocation2 + $0x568] sm:$0xff] }
  0xa2   :  { %v682_v20 = vadd.f32 %v681_v9, %v168_v61  ;;  %v996_v24 = vadd.f32 %v995_v12, %v472_v6  ;;  %v728_v36 = vadd.f32 %v727_v25, %v212_v18  ;;  %v1020_v41 = vadd.f32 %v1019_v32, %v495_v26  ;;  %v234_v42 = vld [vmem:[#allocation2 + $0x608] sm:$0xff]  ;;  %v235_v43 = vld [vmem:[#allocation2 + $0x610] sm:$0xff]  ;;  %v193_v46 = vld [vmem:[#allocation2 + $0x4c0] sm:$0xff] }
  0xa3   :  { %v704_v16 = vadd.f32 %v703_v5, %v189_v0  ;;  %v974_v22 = vadd.f32 %v973_v10, %v451_v4  ;;  %v455_v44 = vld [vmem:[#allocation2 + $0xcf0] sm:$0xff]  ;;  %v497_v49 = vld [vmem:[#allocation2 + $0xe40] sm:$0xff]  ;;  %v751_v50 = vadd.f32 %v234_v42, %v233_v38  ;;  %v476_v52 = vld [vmem:[#allocation2 + $0xd98] sm:$0xff] }
  0xa4   :  { %683 = vadd.xlane.f32.xlu0 %v682_v20  ;;  %v997_v35 = vadd.f32 %v996_v24, %v473_v17  ;;  %v729_v48 = vadd.f32 %v728_v36, %v213_v31  ;;  %v215_v53 = vld [vmem:[#allocation2 + $0x570] sm:$0xff]  ;;  %v1021_v54 = vadd.f32 %v1020_v41, %v496_v37  ;;  %v236_v55 = vld [vmem:[#allocation2 + $0x618] sm:$0xff]  ;;  %v194_v58 = vld [vmem:[#allocation2 + $0x4c8] sm:$0xff] }
  0xa5   :  { %v705_v29 = vadd.f32 %v704_v16, %v190_v11  ;;  %v975_v33 = vadd.f32 %v974_v22, %v452_v15  ;;  %v456_v56 = vld [vmem:[#allocation2 + $0xcf8] sm:$0xff]  ;;  %v498_v61 = vld [vmem:[#allocation2 + $0xe48] sm:$0xff]  ;;  %v752_v62 = vadd.f32 %v751_v50, %v235_v43  ;;  %v477_v0 = vld [vmem:[#allocation2 + $0xda0] sm:$0xff] }
  0xa6   :  { %v998_v47 = vadd.f32 %v997_v35, %v474_v30  ;;  %v730_v60 = vadd.f32 %v729_v48, %v214_v40  ;;  %v216_v1 = vld [vmem:[#allocation2 + $0x578] sm:$0xff]  ;;  %v1022_v2 = vadd.f32 %v1021_v54, %v497_v49  ;;  %v237_v3 = vld [vmem:[#allocation2 + $0x620] sm:$0xff]  ;;  %v195_v5 = vld [vmem:[#allocation2 + $0x4d0] sm:$0xff] }
  0xa7   :  { %v706_v39 = vadd.f32 %v705_v29, %v191_v23  ;;  %v976_v45 = vadd.f32 %v975_v33, %v453_v21  ;;  %v499_v8 = vld [vmem:[#allocation2 + $0xe50] sm:$0xff]  ;;  %v753_v9 = vadd.f32 %v752_v62, %v236_v55  ;;  %v478_v11 = vld [vmem:[#allocation2 + $0xda8] sm:$0xff]  ;;  %v217_v12 = vld [vmem:[#allocation2 + $0x580] sm:$0xff] }
  0xa8   :  { %v999_v59 = vadd.f32 %v998_v47, %v475_v34  ;;  %v731_v7 = vadd.f32 %v730_v60, %v215_v53  ;;  %v1023_v13 = vadd.f32 %v1022_v2, %v498_v61  ;;  %v238_v14 = vld [vmem:[#allocation2 + $0x628] sm:$0xff]  ;;  %v196_v16 = vld [vmem:[#allocation2 + $0x4d8] sm:$0xff]  ;;  %v197_v17 = vld [vmem:[#allocation2 + $0x4e0] sm:$0xff] }
  0xa9   :  { %v707_v51 = vadd.f32 %v706_v39, %v192_v28  ;;  %v977_v57 = vadd.f32 %v976_v45, %v454_v27  ;;  %v500_v20 = vld [vmem:[#allocation2 + $0xe58] sm:$0xff]  ;;  %v754_v21 = vadd.f32 %v753_v9, %v237_v3  ;;  %v479_v23 = vld [vmem:[#allocation2 + $0xdb0] sm:$0xff]  ;;  %v218_v24 = vld [vmem:[#allocation2 + $0x588] sm:$0xff] }
  0xaa   :  { %v1000_v6 = vadd.f32 %v999_v59, %v476_v52  ;;  %v732_v19 = vadd.f32 %v731_v7, %v216_v1  ;;  %v1024_v25 = vadd.f32 %v1023_v13, %v499_v8  ;;  %v239_v26 = vld [vmem:[#allocation2 + $0x630] sm:$0xff]  ;;  %v198_v27 = vld [vmem:[#allocation2 + $0x4e8] sm:$0xff]  ;;  %v480_v28 = vld [vmem:[#allocation2 + $0xdb8] sm:$0xff] }
  0xab   :  { %v708_v63 = vadd.f32 %v707_v51, %v193_v46  ;;  %v978_v4 = vadd.f32 %v977_v57, %v455_v44  ;;  %v219_v30 = vld [vmem:[#allocation2 + $0x590] sm:$0xff]  ;;  %v501_v32 = vld [vmem:[#allocation2 + $0xe60] sm:$0xff]  ;;  %v755_v33 = vadd.f32 %v754_v21, %v238_v14  ;;  %v240_v36 = vld [vmem:[#allocation2 + $0x638] sm:$0xff] }
  0xac   :  { %v1001_v18 = vadd.f32 %v1000_v6, %v477_v0  ;;  %v733_v31 = vadd.f32 %v732_v19, %v217_v12  ;;  %v1025_v35 = vadd.f32 %v1024_v25, %v500_v20  ;;  %v521_v37 = vld [vmem:[#allocation2 + $0xf00] sm:$0xff]  ;;  %v522_v38 = vld [vmem:[#allocation2 + $0xf08] sm:$0xff]  ;;  %v523_v44 = vld [vmem:[#allocation2 + $0xf10] sm:$0xff] }
  0xad   :  { %v709_v10 = vadd.f32 %v708_v63, %v194_v58  ;;  %v979_v15 = vadd.f32 %v978_v4, %v456_v56  ;;  %v481_v39 = vld [vmem:[#allocation2 + $0xdc0] sm:$0xff]  ;;  %v502_v42 = vld [vmem:[#allocation2 + $0xe68] sm:$0xff]  ;;  %v756_v43 = vadd.f32 %v755_v33, %v239_v26  ;;  %v1048_v45 = vadd.f32 %v522_v38, %v521_v37  ;;  %v220_v47 = vld [vmem:[#allocation2 + $0x598] sm:$0xff] }
  0xae   :  { %v1002_v29 = vadd.f32 %v1001_v18, %v478_v11  ;;  %v734_v41 = vadd.f32 %v733_v31, %v218_v24  ;;  %v1026_v48 = vadd.f32 %v1025_v35, %v501_v32  ;;  %v241_v49 = vld [vmem:[#allocation2 + $0x640] sm:$0xff]  ;;  %v524_v50 = vld [vmem:[#allocation2 + $0xf18] sm:$0xff]  ;;  %v199_v51 = vld [vmem:[#allocation2 + $0x4f0] sm:$0xff] }
  0xaf   :  { %v710_v22 = vadd.f32 %v709_v10, %v195_v5  ;;  %980 = vadd.xlane.f32.xlu1 %v979_v15  ;;  %v482_v52 = vld [vmem:[#allocation2 + $0xdc8] sm:$0xff]  ;;  %v503_v55 = vld [vmem:[#allocation2 + $0xe70] sm:$0xff]  ;;  %v757_v56 = vadd.f32 %v756_v43, %v240_v36  ;;  %v1049_v57 = vadd.f32 %v1048_v45, %v523_v44  ;;  %v221_v59 = vld [vmem:[#allocation2 + $0x5a0] sm:$0xff] }
  0xb0   :  { %v1003_v40 = vadd.f32 %v1002_v29, %v479_v23  ;;  %v735_v54 = vadd.f32 %v734_v41, %v219_v30  ;;  %v1027_v60 = vadd.f32 %v1026_v48, %v502_v42  ;;  %v242_v61 = vld [vmem:[#allocation2 + $0x648] sm:$0xff]  ;;  %v525_v62 = vld [vmem:[#allocation2 + $0xf20] sm:$0xff]  ;;  %v200_v63 = vld [vmem:[#allocation2 + $0x4f8] sm:$0xff] }
  0xb1   :  { %v711_v34 = vadd.f32 %v710_v22, %v196_v16  ;;  %v483_v0 = vld [vmem:[#allocation2 + $0xdd0] sm:$0xff]  ;;  %v504_v3 = vld [vmem:[#allocation2 + $0xe78] sm:$0xff]  ;;  %v758_v4 = vadd.f32 %v757_v56, %v241_v49  ;;  %v1050_v5 = vadd.f32 %v1049_v57, %v524_v50  ;;  %v222_v7 = vld [vmem:[#allocation2 + $0x5a8] sm:$0xff] }
  0xb2   :  { %v1004_v53 = vadd.f32 %v1003_v40, %v480_v28  ;;  %v736_v2 = vadd.f32 %v735_v54, %v220_v47  ;;  %v1028_v8 = vadd.f32 %v1027_v60, %v503_v55  ;;  %v243_v9 = vld [vmem:[#allocation2 + $0x650] sm:$0xff]  ;;  %v526_v10 = vld [vmem:[#allocation2 + $0xf28] sm:$0xff]  ;;  %v484_v11 = vld [vmem:[#allocation2 + $0xdd8] sm:$0xff] }
  0xb3   :  { %v712_v46 = vadd.f32 %v711_v34, %v197_v17  ;;  %v505_v14 = vld [vmem:[#allocation2 + $0xe80] sm:$0xff]  ;;  %v759_v15 = vadd.f32 %v758_v4, %v242_v61  ;;  %v1051_v16 = vadd.f32 %v1050_v5, %v525_v62  ;;  %v223_v18 = vld [vmem:[#allocation2 + $0x5b0] sm:$0xff]  ;;  %v244_v20 = vld [vmem:[#allocation2 + $0x658] sm:$0xff] }
  0xb4   :  { %v1005_v1 = vadd.f32 %v1004_v53, %v481_v39  ;;  %v737_v13 = vadd.f32 %v736_v2, %v221_v59  ;;  %v1029_v19 = vadd.f32 %v1028_v8, %v504_v3  ;;  %v527_v21 = vld [vmem:[#allocation2 + $0xf30] sm:$0xff]  ;;  %v485_v22 = vld [vmem:[#allocation2 + $0xde0] sm:$0xff]  ;;  %v224_v24 = vld [vmem:[#allocation2 + $0x5b8] sm:$0xff] }
  0xb5   :  { %v713_v58 = vadd.f32 %v712_v46, %v198_v27  ;;  %v506_v26 = vld [vmem:[#allocation2 + $0xe88] sm:$0xff]  ;;  %v760_v27 = vadd.f32 %v759_v15, %v243_v9  ;;  %v1052_v28 = vadd.f32 %v1051_v16, %v526_v10  ;;  %v507_v30 = vld [vmem:[#allocation2 + $0xe90] sm:$0xff]  ;;  %v245_v32 = vld [vmem:[#allocation2 + $0x660] sm:$0xff] }
  0xb6   :  { %v1006_v12 = vadd.f32 %v1005_v1, %v482_v52  ;;  %v738_v25 = vadd.f32 %v737_v13, %v222_v7  ;;  %v486_v29 = vld [vmem:[#allocation2 + $0xde8] sm:$0xff]  ;;  %v1030_v31 = vadd.f32 %v1029_v19, %v505_v14  ;;  %v528_v33 = vld [vmem:[#allocation2 + $0xf38] sm:$0xff]  ;;  %v265_v38 = vld [vmem:[#allocation2 + $0x700] sm:$0xff] }
  0xb7   :  { %v714_v6 = vadd.f32 %v713_v58, %v199_v51  ;;  %v761_v36 = vadd.f32 %v760_v27, %v244_v20  ;;  %v1053_v37 = vadd.f32 %v1052_v28, %v527_v21  ;;  %v266_v39 = vld [vmem:[#allocation2 + $0x708] sm:$0xff]  ;;  %v267_v40 = vld [vmem:[#allocation2 + $0x710] sm:$0xff]  ;;  %v225_v41 = vld [vmem:[#allocation2 + $0x5c0] sm:$0xff] }
  0xb8   :  { %v1007_v23 = vadd.f32 %v1006_v12, %v483_v0  ;;  %v739_v35 = vadd.f32 %v738_v25, %v223_v18  ;;  %v1031_v42 = vadd.f32 %v1030_v31, %v506_v26  ;;  %v246_v43 = vld [vmem:[#allocation2 + $0x668] sm:$0xff]  ;;  %v529_v44 = vld [vmem:[#allocation2 + $0xf40] sm:$0xff]  ;;  %v784_v45 = vadd.f32 %v266_v39, %v265_v38  ;;  %v487_v46 = vld [vmem:[#allocation2 + $0xdf0] sm:$0xff] }
  0xb9   :  { %v715_v17 = vadd.f32 %v714_v6, %v200_v63  ;;  %v508_v49 = vld [vmem:[#allocation2 + $0xe98] sm:$0xff]  ;;  %v762_v50 = vadd.f32 %v761_v36, %v245_v32  ;;  %v1054_v51 = vadd.f32 %v1053_v37, %v528_v33  ;;  %v226_v53 = vld [vmem:[#allocation2 + $0x5c8] sm:$0xff]  ;;  %v247_v55 = vld [vmem:[#allocation2 + $0x670] sm:$0xff] }
  0xba   :  { %v1008_v34 = vadd.f32 %v1007_v23, %v484_v11  ;;  %v740_v48 = vadd.f32 %v739_v35, %v224_v24  ;;  %v268_v52 = vld [vmem:[#allocation2 + $0x718] sm:$0xff]  ;;  %v1032_v54 = vadd.f32 %v1031_v42, %v507_v30  ;;  %v530_v56 = vld [vmem:[#allocation2 + $0xf48] sm:$0xff]  ;;  %v785_v57 = vadd.f32 %v784_v45, %v267_v40  ;;  %v509_v61 = vld [vmem:[#allocation2 + $0xea0] sm:$0xff] }
  0xbb   :  { %716 = vadd.xlane.f32.xlu0 %v715_v17  ;;  %v488_v58 = vld [vmem:[#allocation2 + $0xdf8] sm:$0xff]  ;;  %v763_v62 = vadd.f32 %v762_v50, %v246_v43  ;;  %v1055_v63 = vadd.f32 %v1054_v51, %v529_v44  ;;  %v269_v0 = vld [vmem:[#allocation2 + $0x720] sm:$0xff]  ;;  %v227_v1 = vld [vmem:[#allocation2 + $0x5d0] sm:$0xff] }
  0xbc   :  { %v1009_v47 = vadd.f32 %v1008_v34, %v485_v22  ;;  %v741_v60 = vadd.f32 %v740_v48, %v225_v41  ;;  %v1033_v2 = vadd.f32 %v1032_v54, %v508_v49  ;;  %v248_v3 = vld [vmem:[#allocation2 + $0x678] sm:$0xff]  ;;  %v531_v4 = vld [vmem:[#allocation2 + $0xf50] sm:$0xff]  ;;  %v786_v5 = vadd.f32 %v785_v57, %v268_v52  ;;  %v510_v8 = vld [vmem:[#allocation2 + $0xea8] sm:$0xff] }
  0xbd   :  { %v764_v9 = vadd.f32 %v763_v62, %v247_v55  ;;  %v1056_v10 = vadd.f32 %v1055_v63, %v530_v56  ;;  %v270_v11 = vld [vmem:[#allocation2 + $0x728] sm:$0xff]  ;;  %v228_v12 = vld [vmem:[#allocation2 + $0x5d8] sm:$0xff]  ;;  %v249_v14 = vld [vmem:[#allocation2 + $0x680] sm:$0xff] }
  0xbe   :  { %v1010_v59 = vadd.f32 %v1009_v47, %v486_v29  ;;  %v742_v7 = vadd.f32 %v741_v60, %v226_v53  ;;  %v1034_v13 = vadd.f32 %v1033_v2, %v509_v61  ;;  %v532_v15 = vld [vmem:[#allocation2 + $0xf58] sm:$0xff]  ;;  %v787_v16 = vadd.f32 %v786_v5, %v269_v0  ;;  %v511_v19 = vld [vmem:[#allocation2 + $0xeb0] sm:$0xff]  ;;  %v229_v23 = vld [vmem:[#allocation2 + $0x5e0] sm:$0xff] }
  0xbf   :  { %v765_v20 = vadd.f32 %v764_v9, %v248_v3  ;;  %v1057_v21 = vadd.f32 %v1056_v10, %v531_v4  ;;  %v271_v22 = vld [vmem:[#allocation2 + $0x730] sm:$0xff]  ;;  %v250_v25 = vld [vmem:[#allocation2 + $0x688] sm:$0xff]  ;;  %v533_v26 = vld [vmem:[#allocation2 + $0xf60] sm:$0xff]  ;;  %v3139_v10 = vmov 0.0|0.0  }
  0xc0   :  { %v1011_v6 = vadd.f32 %v1010_v59, %v487_v46  ;;  %v743_v18 = vadd.f32 %v742_v7, %v227_v1  ;;  %v1035_v24 = vadd.f32 %v1034_v13, %v510_v8  ;;  %v788_v27 = vadd.f32 %v787_v16, %v270_v11  ;;  %v512_v29 = vld [vmem:[#allocation2 + $0xeb8] sm:$0xff]  ;;  %v230_v33 = vld [vmem:[#allocation2 + $0x5e8] sm:$0xff]  ;;  %v251_v35 = vld [vmem:[#allocation2 + $0x690] sm:$0xff]  ;;  %2527 = vmatprep.subr.bf16.mxu0 %v3139_v10 }
  0xc1   :  { %v766_v30 = vadd.f32 %v765_v20, %v249_v14  ;;  %v1058_v31 = vadd.f32 %v1057_v21, %v532_v15  ;;  %v272_v32 = vld [vmem:[#allocation2 + $0x738] sm:$0xff]  ;;  %v534_v36 = vld [vmem:[#allocation2 + $0xf68] sm:$0xff]  ;;  %v513_v39 = vld [vmem:[#allocation2 + $0xec0] sm:$0xff] }
  0xc2   :  { %v1012_v17 = vadd.f32 %v1011_v6, %v488_v58  ;;  %v744_v28 = vadd.f32 %v743_v18, %v228_v12  ;;  %v1036_v34 = vadd.f32 %v1035_v24, %v511_v19  ;;  %v789_v37 = vadd.f32 %v788_v27, %v271_v22  ;;  %v273_v42 = vld [vmem:[#allocation2 + $0x740] sm:$0xff]  ;;  %v231_v43 = vld [vmem:[#allocation2 + $0x5f0] sm:$0xff]  ;;  %v252_v45 = vld [vmem:[#allocation2 + $0x698] sm:$0xff] }
  0xc3   :  { %v767_v40 = vadd.f32 %v766_v30, %v250_v25  ;;  %v1059_v41 = vadd.f32 %v1058_v31, %v533_v26  ;;  %v535_v46 = vld [vmem:[#allocation2 + $0xf70] sm:$0xff]  ;;  %v514_v49 = vld [vmem:[#allocation2 + $0xec8] sm:$0xff]  ;;  %v232_v53 = vld [vmem:[#allocation2 + $0x5f8] sm:$0xff] }
  0xc4   :  { %1013 = vadd.xlane.f32.xlu1 %v1012_v17  ;;  %v745_v38 = vadd.f32 %v744_v28, %v229_v23  ;;  %v1037_v44 = vadd.f32 %v1036_v34, %v512_v29  ;;  %v790_v47 = vadd.f32 %v789_v37, %v272_v32  ;;  %v274_v52 = vld [vmem:[#allocation2 + $0x748] sm:$0xff]  ;;  %v253_v55 = vld [vmem:[#allocation2 + $0x6a0] sm:$0xff]  ;;  %v536_v56 = vld [vmem:[#allocation2 + $0xf78] sm:$0xff] }
  0xc5   :  { %v768_v50 = vadd.f32 %v767_v40, %v251_v35  ;;  %v1060_v51 = vadd.f32 %v1059_v41, %v534_v36  ;;  %v515_v59 = vld [vmem:[#allocation2 + $0xed0] sm:$0xff]  ;;  %v254_v60 = vld [vmem:[#allocation2 + $0x6a8] sm:$0xff]  ;;  %v537_v1 = vld [vmem:[#allocation2 + $0xf80] sm:$0xff] }
  0xc6   :  { %v746_v48 = vadd.f32 %v745_v38, %v230_v33  ;;  %v1038_v54 = vadd.f32 %v1037_v44, %v513_v39  ;;  %v791_v57 = vadd.f32 %v790_v47, %v273_v42  ;;  %v275_v63 = vld [vmem:[#allocation2 + $0x750] sm:$0xff]  ;;  %v1097_v3 = vld [vmem:[%s3805_s1] sm:$0xff]  ;;  %v1098_v4 = vld [vmem:[%s3805_s1 + $0x8] sm:$0xff] }
  0xc7   :  { %v769_v61 = vadd.f32 %v768_v50, %v252_v45  ;;  %v1061_v62 = vadd.f32 %v1060_v51, %v535_v46  ;;  %v516_v6 = vld [vmem:[#allocation2 + $0xed8] sm:$0xff]  ;;  %v2528_v11 = vpack.c.bf16 %v1098_v4, %v1097_v3  ;;  %v255_v13 = vld [vmem:[#allocation2 + $0x6b0] sm:$0xff]  ;;  %v538_v14 = vld [vmem:[#allocation2 + $0xf88] sm:$0xff] }
  0xc8   :  { %v747_v58 = vadd.f32 %v746_v48, %v231_v43  ;;  %v1039_v0 = vadd.f32 %v1038_v54, %v514_v49  ;;  %v792_v2 = vadd.f32 %v791_v57, %v274_v52  ;;  %v276_v9 = vld [vmem:[#allocation2 + $0x758] sm:$0xff]  ;;  %v517_v16 = vld [vmem:[#allocation2 + $0xee0] sm:$0xff]  ;;  %v539_v22 = vld [vmem:[#allocation2 + $0xf90] sm:$0xff] }
  0xc9   :  { %v770_v7 = vadd.f32 %v769_v61, %v253_v55  ;;  %v1062_v8 = vadd.f32 %v1061_v62, %v536_v56  ;;  %v277_v19 = vld [vmem:[#allocation2 + $0x760] sm:$0xff]  ;;  %2529 = vmatpush3.bf16.msra.mxu0 %v2528_v11  ;;  %v256_v21 = vld [vmem:[#allocation2 + $0x6b8] sm:$0xff]  ;;  %v518_v24 = vld [vmem:[#allocation2 + $0xee8] sm:$0xff] }
  0xca   :  { %v748_v5 = vadd.f32 %v747_v58, %v232_v53  ;;  %v1040_v12 = vadd.f32 %v1039_v0, %v515_v59  ;;  %v793_v15 = vadd.f32 %v792_v2, %v275_v63  ;;  %2530 = vmatprep.subr.bf16.mxu0 %v3139_v10  ;;  %v278_v27 = vld [vmem:[#allocation2 + $0x768] sm:$0xff]  ;;  %v257_v29 = vld [vmem:[#allocation2 + $0x6c0] sm:$0xff]  ;;  %v540_v30 = vld [vmem:[#allocation2 + $0xf98] sm:$0xff] }
  0xcb   :  { %v771_v17 = vadd.f32 %v770_v7, %v254_v60  ;;  %v1063_v18 = vadd.f32 %v1062_v8, %v537_v1  ;;  %v519_v32 = vld [vmem:[#allocation2 + $0xef0] sm:$0xff]  ;;  %v258_v37 = vld [vmem:[#allocation2 + $0x6c8] sm:$0xff]  ;;  %v541_v38 = vld [vmem:[#allocation2 + $0xfa0] sm:$0xff] }
  0xcc   :  { %749 = vadd.xlane.f32.xlu0 %v748_v5  ;;  %v1041_v20 = vadd.f32 %v1040_v12, %v516_v6  ;;  %v794_v23 = vadd.f32 %v793_v15, %v276_v9  ;;  %v279_v35 = vld [vmem:[#allocation2 + $0x770] sm:$0xff]  ;;  %v520_v40 = vld [vmem:[#allocation2 + $0xef8] sm:$0xff]  ;;  %v542_v46 = vld [vmem:[#allocation2 + $0xfa8] sm:$0xff] }
  0xcd   :  { %v772_v25 = vadd.f32 %v771_v17, %v255_v13  ;;  %v1064_v26 = vadd.f32 %v1063_v18, %v538_v14  ;;  %v280_v43 = vld [vmem:[#allocation2 + $0x778] sm:$0xff]  ;;  %v259_v45 = vld [vmem:[#allocation2 + $0x6d0] sm:$0xff]  ;;  %v281_v50 = vld [vmem:[#allocation2 + $0x780] sm:$0xff] }
  0xce   :  { %v1042_v28 = vadd.f32 %v1041_v20, %v517_v16  ;;  %v795_v31 = vadd.f32 %v794_v23, %v277_v19  ;;  %v260_v52 = vld [vmem:[#allocation2 + $0x6d8] sm:$0xff]  ;;  %v543_v53 = vld [vmem:[#allocation2 + $0xfb0] sm:$0xff]  ;;  %v282_v57 = vld [vmem:[#allocation2 + $0x788] sm:$0xff] }
  0xcf   :  { %v773_v33 = vadd.f32 %v772_v25, %v256_v21  ;;  %v1065_v34 = vadd.f32 %v1064_v26, %v539_v22  ;;  %v261_v58 = vld [vmem:[#allocation2 + $0x6e0] sm:$0xff]  ;;  %v544_v59 = vld [vmem:[#allocation2 + $0xfb8] sm:$0xff]  ;;  %v283_v63 = vld [vmem:[#allocation2 + $0x790] sm:$0xff] }
  0xd0   :  { %v1043_v36 = vadd.f32 %v1042_v28, %v518_v24  ;;  %v796_v39 = vadd.f32 %v795_v31, %v278_v27  ;;  %v262_v0 = vld [vmem:[#allocation2 + $0x6e8] sm:$0xff]  ;;  %v545_v1 = vld [vmem:[#allocation2 + $0xfc0] sm:$0xff]  ;;  %v284_v5 = vld [vmem:[#allocation2 + $0x798] sm:$0xff] }
  0xd1   :  { %v774_v41 = vadd.f32 %v773_v33, %v257_v29  ;;  %v1066_v42 = vadd.f32 %v1065_v34, %v540_v30  ;;  %v263_v6 = vld [vmem:[#allocation2 + $0x6f0] sm:$0xff]  ;;  %v546_v7 = vld [vmem:[#allocation2 + $0xfc8] sm:$0xff]  ;;  %v285_v12 = vld [vmem:[#allocation2 + $0x7a0] sm:$0xff] }
  0xd2   :  { %v1044_v44 = vadd.f32 %v1043_v36, %v519_v32  ;;  %v797_v47 = vadd.f32 %v796_v39, %v279_v35  ;;  %v264_v13 = vld [vmem:[#allocation2 + $0x6f8] sm:$0xff]  ;;  %v547_v14 = vld [vmem:[#allocation2 + $0xfd0] sm:$0xff]  ;;  %v286_v18 = vld [vmem:[#allocation2 + $0x7a8] sm:$0xff] }
  0xd3   :  { %v775_v48 = vadd.f32 %v774_v41, %v258_v37  ;;  %v1067_v49 = vadd.f32 %v1066_v42, %v541_v38  ;;  %v1099_v19 = vld [vmem:[%s3805_s1 + $0x10] sm:$0xff]  ;;  %v1100_v20 = vld [vmem:[%s3805_s1 + $0x18] sm:$0xff]  ;;  %v549_v27 = vld [vmem:[#allocation2 + $0xfe0] sm:$0xff] }
  0xd4   :  { %v1045_v51 = vadd.f32 %v1044_v44, %v520_v40  ;;  %v798_v54 = vadd.f32 %v797_v47, %v280_v43  ;;  %v548_v21 = vld [vmem:[#allocation2 + $0xfd8] sm:$0xff]  ;;  %v2531_v23 = vpack.c.bf16 %v1100_v20, %v1099_v19  ;;  %v287_v26 = vld [vmem:[#allocation2 + $0x7b0] sm:$0xff]  ;;  %v550_v31 = vld [vmem:[#allocation2 + $0xfe8] sm:$0xff] }
  0xd5   :  { %v776_v55 = vadd.f32 %v775_v48, %v259_v45  ;;  %v1068_v56 = vadd.f32 %v1067_v49, %v542_v46  ;;  %v288_v30 = vld [vmem:[#allocation2 + $0x7b8] sm:$0xff]  ;;  %v289_v34 = vld [vmem:[#allocation2 + $0x7c0] sm:$0xff]  ;;  %v551_v35 = vld [vmem:[#allocation2 + $0xff0] sm:$0xff] }
  0xd6   :  { %1046 = vadd.xlane.f32.xlu1 %v1045_v51  ;;  %v799_v60 = vadd.f32 %v798_v54, %v281_v50  ;;  %2532 = vmatpush3.bf16.msra.mxu0 %v2531_v23  ;;  %v290_v38 = vld [vmem:[#allocation2 + $0x7c8] sm:$0xff]  ;;  %v552_v39 = vld [vmem:[#allocation2 + $0xff8] sm:$0xff]  ;;  %v291_v42 = vld [vmem:[#allocation2 + $0x7d0] sm:$0xff] }
  0xd7   :  { %v777_v61 = vadd.f32 %v776_v55, %v260_v52  ;;  %v1069_v62 = vadd.f32 %v1068_v56, %v543_v53  ;;  %2533 = vmatprep.subr.bf16.mxu0 %v3139_v10  ;;  %v292_v45 = vld [vmem:[#allocation2 + $0x7d8] sm:$0xff]  ;;  %v293_v47 = vld [vmem:[#allocation2 + $0x7e0] sm:$0xff]  ;;  %v294_v49 = vld [vmem:[#allocation2 + $0x7e8] sm:$0xff] }
  0xd8   :  { %v800_v2 = vadd.f32 %v799_v60, %v282_v57  ;;  %v295_v51 = vld [vmem:[#allocation2 + $0x7f0] sm:$0xff]  ;;  %v296_v53 = vld [vmem:[#allocation2 + $0x7f8] sm:$0xff]  ;;  %v1101_v55 = vld [vmem:[%s3805_s1 + $0x20] sm:$0xff] }
  0xd9   :  { %v778_v3 = vadd.f32 %v777_v61, %v261_v58  ;;  %v1070_v4 = vadd.f32 %v1069_v62, %v544_v59  ;;  %v1102_v56 = vld [vmem:[%s3805_s1 + $0x28] sm:$0xff]  ;;  %v1103_v59 = vld [vmem:[%s3805_s1 + $0x30] sm:$0xff]  ;;  %v1104_v60 = vld [vmem:[%s3805_s1 + $0x38] sm:$0xff]  ;;  %v3141_v62 = vmov 0.0   ;;  %s3142_s1 = smov [#allocation7]  }
  0xda   :  { %v801_v8 = vadd.f32 %v800_v2, %v283_v63  ;;  %v2534_v58 = vpack.c.bf16 %v1102_v56, %v1101_v55  ;;  %v2537_v61 = vpack.c.bf16 %v1104_v60, %v1103_v59  ;;  %2519 = vmatprep.mubr.msk.f32.mxu0 %vm3140_vm0, %v3141_v62  ;;  %2522 = vmatprep.subr.mxu1 %v3141_v62  ;;  %s3774_s27 = sshll.u32 %s3142_s1, 4  ;;  %s2476_s27 = int_to_ptr.vmem [resolvable:$true] %s3774_s27 }
  0xdb   :  { %v779_v9 = vadd.f32 %v778_v3, %v262_v0  ;;  %v1071_v11 = vadd.f32 %v1070_v4, %v545_v1  ;;  %2524 = vmatprep.mubr.msk.f32.mxu1 %vm3140_vm0, %v3141_v62  ;;  %s3107_s28 = scalar_lea.vmem %s2476_s27, 65536  ;;  %p3112_p3 = scmp.lt.s32.totalorder %s2476_s27, %s2476_s27 }
  0xdc   :  { %v802_v15 = vadd.f32 %v801_v8, %v284_v5  ;;  %2535 = vmatpush3.bf16.msra.mxu0 %v2534_v58  ;;  %p3108_p2 = scmp.ne.s32.totalorder %s2476_s27, %s3107_s28  ;;  %p3113_p4 = scmp.lt.s32.totalorder %s3107_s28, %s3107_s28 }
  0xdd   :  { %v780_v16 = vadd.f32 %v779_v9, %v263_v6  ;;  %v1072_v17 = vadd.f32 %v1071_v11, %v546_v7  ;;  %2536 = vmatprep.subr.bf16.mxu0 %v3139_v10  ;;  %v1121_v7 = vlaneseq }
  0xde   :  { %v803_v22 = vadd.f32 %v802_v15, %v285_v12  ;;  %p3114_p5 = por %p3113_p4, %p3112_p3 }
  0xdf   :  { %v781_v24 = vadd.f32 %v780_v16, %v264_v13  ;;  %v1073_v25 = vadd.f32 %v1072_v17, %v547_v14  ;;  %v1122_v11 = vand.u32 127, %v1121_v7  ;;  %v3218_v12 = vshrl.u32 %v1121_v7, 7 }
  0xe0   :  { %v804_v28 = vadd.f32 %v803_v22, %v286_v18  ;;  %2538 = vmatpush3.bf16.msra.mxu0 %v2537_v61  ;;  %p3115_p6 = pnand %p3114_p5, %p3108_p2 }
  0xe1   :  { %782 = vadd.xlane.f32.xlu0 %v781_v24  ;;  %v1074_v29 = vadd.f32 %v1073_v25, %v548_v21  ;;  %v1127_v13 = vadd.s32 4294967288, %v1122_v11  ;;  %v1134_v14 = vadd.s32 4294967280, %v1122_v11  ;;  %v1141_v15 = vadd.s32 4294967272, %v1122_v11 }
  0xe2   :  { %v805_v32 = vadd.f32 %v804_v28, %v287_v26  ;;  %v1148_v17 = vadd.s32 4294967264, %v1122_v11  ;;  %v1155_v18 = vadd.s32 4294967256, %v1122_v11  ;;  %v1125_v20 = vsub.s32 %v1122_v11, %v3218_v12 }
  0xe3   :  { %v1075_v33 = vadd.f32 %v1074_v29, %v549_v27  ;;  %v1130_v22 = vsub.s32 %v1127_v13, %v3218_v12  ;;  %v1162_v23 = vadd.s32 4294967248, %v1122_v11  ;;  %v1137_v25 = vsub.s32 %v1134_v14, %v3218_v12 }
  0xe4   :  { %v806_v36 = vadd.f32 %v805_v32, %v288_v30  ;;  %v1144_v27 = vsub.s32 %v1141_v15, %v3218_v12  ;;  %v1169_v28 = vadd.s32 4294967240, %v1122_v11  ;;  %v1158_v32 = vsub.s32 %v1155_v18, %v3218_v12 }
  0xe5   :  { %v1076_v37 = vadd.f32 %v1075_v33, %v550_v31  ;;  %v1151_v31 = vsub.s32 %v1148_v17, %v3218_v12  ;;  %v1291_v17 = vld [vmem:[#allocation5] sm:$0xf] }
  0xe6   :  { %v807_v40 = vadd.f32 %v806_v36, %v289_v34  ;;  %v1165_v36 = vsub.s32 %v1162_v23, %v3218_v12  ;;  %2523 = vmatpush3.msk.msra.mxu1 %vm1296_vm10, %v1291_v17  ;;  %v2575_v17 = vld [vmem:[#allocation2 + $0x1c0] sm:$0xff] }
  0xe7   :  { %v1077_v41 = vadd.f32 %v1076_v37, %v551_v35 }
  0xe8   :  { %v808_v43 = vadd.f32 %v807_v40, %v290_v38 }
  0xe9   :  { %v1078_v44 = vadd.f32 %v1077_v41, %v552_v39 }
  0xea   :  { %v809_v46 = vadd.f32 %v808_v43, %v291_v42 }
  0xeb   :  { %1079 = vadd.xlane.f32.xlu1 %v1078_v44 }
  0xec   :  { %v810_v48 = vadd.f32 %v809_v46, %v292_v45  ;;  %v1172_v46 = vsub.s32 %v1169_v28, %v3218_v12 }
  0xee   :  { %v811_v50 = vadd.f32 %v810_v48, %v293_v47 }
  0xf0   :  { %v812_v52 = vadd.f32 %v811_v50, %v294_v49 }
  0xf2   :  { %v813_v54 = vadd.f32 %v812_v52, %v295_v51  ;;  %v849_v63 = vpop.xlane.xlu1 %848 }
  0xf3   :  { %v1089_v21 = vmul.f32 0.00024414063, %v849_v63 }
  0xf4   :  { %v814_v57 = vadd.f32 %v813_v54, %v296_v53 }
  0xf5   :  { %v585_v1 = vpop.xlane.xlu0 %584  ;;  %v1179_v33 = vrot.slane %v1089_v21, %v1125_v20 }
  0xf6   :  { %815 = vadd.xlane.f32.xlu0 %v814_v57  ;;  %v1081_v38 = vmul.f32 0.00024414063, %v585_v1 }
  0xf8   :  { %v1126_v54 = vrot.slane %v1081_v38, %v1125_v20 }
  0xff   :  { %v882_v0 = vpop.xlane.xlu1 %881 }
 0x100   :  { %v1090_v24 = vmul.f32 0.00024414063, %v882_v0 }
 0x102   :  { %v1183_v39 = vrot.slane %v1090_v24, %v1130_v22 }
 0x104   :  { %v1184_v55 = vsel %vm1132_vm1, %v1183_v39, %v1179_v33  ;;  %v2555_v39 = vld [vmem:[#allocation2 + $0x120] sm:$0xff] }
 0x10a   :  { %v618_v10 = vpop.xlane.xlu0 %617 }
 0x10b   :  { %v1082_v29 = vmul.f32 0.00024414063, %v618_v10 }
 0x10d   :  { %v1131_v47 = vrot.slane %v1082_v29, %v1130_v22  ;;  %v1413_v29 = vsub.s32 1, %v3218_v12 }
 0x10f   :  { %v1133_v61 = vsel %vm1132_vm1, %v1131_v47, %v1126_v54  ;;  %v2559_v47 = vld [vmem:[#allocation2 + $0x140] sm:$0xff] }
 0x118   :  { %v915_v2 = vpop.xlane.xlu1 %914 }
 0x119   :  { %v1091_v26 = vmul.f32 0.00024414063, %v915_v2 }
 0x11b   :  { %v1188_v43 = vrot.slane %v1091_v26, %v1137_v25  ;;  %v1378_v26 = vsub.s32 0, %v3218_v12 }
 0x11d   :  { %v1189_v58 = vsel %vm1139_vm2, %v1188_v43, %v1184_v55  ;;  %v2557_v43 = vld [vmem:[#allocation2 + $0x130] sm:$0xff]  ;;  %v2563_v55 = vld [vmem:[#allocation2 + $0x160] sm:$0xff] }
 0x120   :  { %v651_v4 = vpop.xlane.xlu0 %650 }
 0x121   :  { %v1083_v34 = vmul.f32 0.00024414063, %v651_v4 }
 0x123   :  { %v1138_v51 = vrot.slane %v1083_v34, %v1137_v25  ;;  %v2552_v34 = vld [vmem:[#allocation2 + $0x108] sm:$0xff] }
 0x125   :  { %v948_v3 = vpop.xlane.xlu1 %947  ;;  %v1140_v1 = vsel %vm1139_vm2, %v1138_v51, %v1133_v61  ;;  %v2561_v51 = vld [vmem:[#allocation2 + $0x150] sm:$0xff]  ;;  %v2566_v61 = vld [vmem:[#allocation2 + $0x178] sm:$0xff] }
 0x126   :  { %v1092_v30 = vmul.f32 0.00024414063, %v948_v3 }
 0x128   :  { %v1193_v48 = vrot.slane %v1092_v30, %v1144_v27 }
 0x12a   :  { %v1194_v62 = vsel %vm1146_vm3, %v1193_v48, %v1189_v58 }
 0x131   :  { %v684_v6 = vpop.xlane.xlu0 %683 }
 0x132   :  { %v1084_v40 = vmul.f32 0.00024414063, %v684_v6 }
 0x134   :  { %v1145_v56 = vrot.slane %v1084_v40, %v1144_v27 }
 0x136   :  { %v1147_v4 = vsel %vm1146_vm3, %v1145_v56, %v1140_v1  ;;  %v2568_v1 = vld [vmem:[#allocation2 + $0x188] sm:$0xff] }
 0x13c   :  { %v981_v5 = vpop.xlane.xlu1 %980 }
 0x13d   :  { %v1093_v35 = vmul.f32 0.00024414063, %v981_v5 }
 0x13f   :  { %v1198_v52 = vrot.slane %v1093_v35, %v1151_v31  ;;  %v2553_v35 = vld [vmem:[#allocation2 + $0x110] sm:$0xff] }
 0x141   :  { %v1199_v2 = vsel %vm1153_vm4, %v1198_v52, %v1194_v62 }
 0x148   :  { %v717_v9 = vpop.xlane.xlu0 %716 }
 0x149   :  { %v1085_v44 = vmul.f32 0.00024414063, %v717_v9 }
 0x14b   :  { %v1152_v59 = vrot.slane %v1085_v44, %v1151_v31 }
 0x14d   :  { %v1154_v7 = vsel %vm1153_vm4, %v1152_v59, %v1147_v4  ;;  %v2565_v59 = vld [vmem:[#allocation2 + $0x170] sm:$0xff]  ;;  %v2570_v4 = vld [vmem:[#allocation2 + $0x198] sm:$0xff] }
 0x151   :  { %v1014_v8 = vpop.xlane.xlu1 %1013 }
 0x152   :  { %v1094_v41 = vmul.f32 0.00024414063, %v1014_v8 }
 0x154   :  { %v1203_v57 = vrot.slane %v1094_v41, %v1158_v32  ;;  %v2556_v41 = vld [vmem:[#allocation2 + $0x128] sm:$0xff] }
 0x156   :  { %v1204_v5 = vsel %vm1160_vm5, %v1203_v57, %v1199_v2  ;;  %v2564_v57 = vld [vmem:[#allocation2 + $0x168] sm:$0xff] }
 0x159   :  { %v750_v19 = vpop.xlane.xlu0 %749 }
 0x15a   :  { %v1086_v49 = vmul.f32 0.00024414063, %v750_v19 }
 0x15c   :  { %v1159_v63 = vrot.slane %v1086_v49, %v1158_v32  ;;  %v2551_v32 = vld [vmem:[#allocation2 + $0x100] sm:$0xff]  ;;  %v2560_v49 = vld [vmem:[#allocation2 + $0x148] sm:$0xff] }
 0x15e   :  { %v1161_v9 = vsel %vm1160_vm5, %v1159_v63, %v1154_v7  ;;  %v2567_v63 = vld [vmem:[#allocation2 + $0x180] sm:$0xff] }
 0x163   :  { %v1047_v16 = vpop.xlane.xlu1 %1046 }
 0x164   :  { %v1095_v45 = vmul.f32 0.00024414063, %v1047_v16 }
 0x166   :  { %v1208_v60 = vrot.slane %v1095_v45, %v1165_v36  ;;  %v2558_v45 = vld [vmem:[#allocation2 + $0x138] sm:$0xff] }
 0x168   :  { %v1209_v8 = vsel %vm1167_vm6, %v1208_v60, %v1204_v5 }
 0x16e   :  { %v783_v42 = vpop.xlane.xlu0 %782 }
 0x16f   :  { %v1087_v53 = vmul.f32 0.00024414063, %v783_v42 }
 0x171   :  { %v1166_v10 = vrot.slane %v1087_v53, %v1165_v36  ;;  %v2562_v53 = vld [vmem:[#allocation2 + $0x158] sm:$0xff] }
 0x173   :  { %v1168_v14 = vsel %vm1167_vm6, %v1166_v10, %v1161_v9  ;;  %v2569_v10 = vld [vmem:[#allocation2 + $0x190] sm:$0xff] }
 0x178   :  { %v1080_v37 = vpop.xlane.xlu1 %1079 }
 0x179   :  { %v1096_v50 = vmul.f32 0.00024414063, %v1080_v37  ;;  %v2554_v37 = vld [vmem:[#allocation2 + $0x118] sm:$0xff] }
 0x17b   :  { %v1213_v0 = vrot.slane %v1096_v50, %v1172_v46 }
 0x17d   :  { %v1214_v13 = vsel %vm1174_vm7, %v1213_v0, %v1209_v8  ;;  %v2572_v8 = vld [vmem:[#allocation2 + $0x1a8] sm:$0xff] }
 0x183   :  { %v816_v3 = vpop.xlane.xlu0 %815 }
 0x184   :  { %v1088_v6 = vmul.f32 0.00024414063, %v816_v3 }
 0x186   :  { %v1173_v11 = vrot.slane %v1088_v6, %v1172_v46  ;;  %v2571_v6 = vld [vmem:[#allocation2 + $0x1a0] sm:$0xff] }
 0x188   :  { %v1175_v15 = vsel %vm1174_vm7, %v1173_v11, %v1168_v14  ;;  %v2573_v11 = vld [vmem:[#allocation2 + $0x1b0] sm:$0xff]  ;;  %v2574_v14 = vld [vmem:[#allocation2 + $0x1b8] sm:$0xff] }
 0x189   :  { %v1216_v16 = vsel %vm1215_vm8, %v1214_v13, %v1175_v15 }
 0x18a   :  { %2520 = vmatmul.mubr.msk.f32.vlgmr.msra.gmra.mrb[0].mxu0 %vm1217_vm9, %v1216_v16 }
 0x25d   :  { %v1286_v18 = vpop.f32.mrb[0].mxu0 }
 0x25e   :  { %v1290_v19 = vmax.f32 %v1286_v18, 0.0  ;;  %v2521_v20 = vpop.f32.mrb[1].mxu0 }
 0x260   :  { %2525 = vmatmul.mubr.msk.f32.vlgmr.msra.gmra.mrb[0].mxu1 %vm1292_vm11, %v1290_v19  ;;  %v2576_v19 = vld [vmem:[#allocation2 + $0x1c8] sm:$0xff] }
 0x333   :  { %v1366_v21 = vpop.f32.mrb[0].mxu1 }
 0x334   :  { %v2491_v22 = vmul.f32 -1.442695, %v1366_v21  ;;  %v2526_v23 = vpop.f32.mrb[1].mxu1  ;;  %v2577_v21 = vld [vmem:[#allocation2 + $0x1d0] sm:$0xff] }
 0x335   :  { %v2578_v23 = vld [vmem:[#allocation2 + $0x1d8] sm:$0xff] }
 0x336   :  { %2547 = vpow2.f32 %v2491_v22 }
 0x340   :  { %v2548_v24 = vpop.eup %2547 }
 0x341   :  { %v1373_v25 = vadd.f32 1.0, %v2548_v24 }
 0x343   :  { %2549 = vrcp.f32 %v1373_v25  ;;  %v2579_v25 = vld [vmem:[#allocation2 + $0x1e0] sm:$0xff] }
 0x34d   :  { %v2550_v27 = vpop.eup %2549 }
 0x34e   :  { %v1379_v28 = vrot.slane %v2550_v27, %v1378_v26  ;;  %v1414_v30 = vrot.slane %v2550_v27, %v1413_v29  ;;  %v2580_v27 = vld [vmem:[#allocation2 + $0x1e8] sm:$0xff]  ;;  %v2581_v29 = vld [vmem:[#allocation2 + $0x1f0] sm:$0xff] }
 0x350   :  { %1385 = vbcast.lane.b32.xlu1 %v1379_v28, 264  ;;  %1381 = vbcast.lane.b32.xlu0 %v1379_v28, 256 }
 0x354   :  { %1389 = vbcast.lane.b32.xlu1 %v1379_v28, 272  ;;  %1397 = vbcast.lane.b32.xlu0 %v1379_v28, 288 }
 0x358   :  { %1393 = vbcast.lane.b32.xlu1 %v1379_v28, 280  ;;  %1405 = vbcast.lane.b32.xlu0 %v1379_v28, 304 }
 0x35c   :  { %1401 = vbcast.lane.b32.xlu1 %v1379_v28, 296  ;;  %1416 = vbcast.lane.b32.xlu0 %v1414_v30, 256 }
 0x360   :  { %1409 = vbcast.lane.b32.xlu1 %v1379_v28, 312  ;;  %1424 = vbcast.lane.b32.xlu0 %v1414_v30, 272 }
 0x364   :  { %1420 = vbcast.lane.b32.xlu1 %v1414_v30, 264  ;;  %1432 = vbcast.lane.b32.xlu0 %v1414_v30, 288 }
 0x368   :  { %1428 = vbcast.lane.b32.xlu1 %v1414_v30, 280  ;;  %1440 = vbcast.lane.b32.xlu0 %v1414_v30, 304 }
 0x36c   :  { %1436 = vbcast.lane.b32.xlu1 %v1414_v30, 296 }
 0x370   :  { %1444 = vbcast.lane.b32.xlu1 %v1414_v30, 312 }
 0x3c2   :  { %v3242_v31 = vpop.permute.xlu1 %1385  ;;  %v3268_v16 = vpop.permute.xlu0 %1381 }
 0x3c3   :  { %v1478_v33 = vmul.f32 %v2551_v32, %v3242_v31  ;;  %v1479_v12 = vmul.f32 %v2552_v34, %v3242_v31  ;;  %v1480_v36 = vmul.f32 %v2553_v35, %v3242_v31  ;;  %v1481_v38 = vmul.f32 %v2554_v37, %v3242_v31  ;;  %v2582_v32 = vld [vmem:[#allocation2 + $0x1f8] sm:$0xff]  ;;  %v2583_v34 = vld [vmem:[#allocation2] sm:$0xff]  ;;  %v2584_v35 = vld [vmem:[#allocation2 + $0x8] sm:$0xff] }
 0x3c4   :  { %v1482_v40 = vmul.f32 %v2555_v39, %v3242_v31  ;;  %v1483_v42 = vmul.f32 %v2556_v41, %v3242_v31  ;;  %v1484_v44 = vmul.f32 %v2557_v43, %v3242_v31  ;;  %v1485_v46 = vmul.f32 %v2558_v45, %v3242_v31  ;;  %v2585_v37 = vld [vmem:[#allocation2 + $0x10] sm:$0xff]  ;;  %v2586_v39 = vld [vmem:[#allocation2 + $0x18] sm:$0xff] }
 0x3c5   :  { %v1486_v48 = vmul.f32 %v2559_v47, %v3242_v31  ;;  %v1487_v50 = vmul.f32 %v2560_v49, %v3242_v31  ;;  %v1488_v52 = vmul.f32 %v2561_v51, %v3242_v31  ;;  %v1489_v54 = vmul.f32 %v2562_v53, %v3242_v31  ;;  %1990 = vst [vmem:[#allocation7 + $0x100] sm:$0xff] %v1478_v33 }
 0x3c6   :  { %1991 = vst [vmem:[#allocation7 + $0x108] sm:$0xff] %v1479_v12  ;;  %1992 = vst [vmem:[#allocation7 + $0x110] sm:$0xff] %v1480_v36  ;;  %v1490_v56 = vmul.f32 %v2563_v55, %v3242_v31  ;;  %v1491_v58 = vmul.f32 %v2564_v57, %v3242_v31  ;;  %v1492_v60 = vmul.f32 %v2565_v59, %v3242_v31 }
 0x3c7   :  { %1993 = vst [vmem:[#allocation7 + $0x118] sm:$0xff] %v1481_v38  ;;  %v1493_v62 = vmul.f32 %v2566_v61, %v3242_v31  ;;  %1994 = vst [vmem:[#allocation7 + $0x120] sm:$0xff] %v1482_v40  ;;  %v1494_v0 = vmul.f32 %v2567_v63, %v3242_v31  ;;  %v1495_v2 = vmul.f32 %v2568_v1, %v3242_v31  ;;  %v2587_v40 = vld [vmem:[#allocation2 + $0x20] sm:$0xff] }
 0x3c8   :  { %1995 = vst [vmem:[#allocation7 + $0x128] sm:$0xff] %v1483_v42  ;;  %1996 = vst [vmem:[#allocation7 + $0x130] sm:$0xff] %v1484_v44  ;;  %v1496_v3 = vmul.f32 %v2569_v10, %v3242_v31  ;;  %v1497_v5 = vmul.f32 %v2570_v4, %v3242_v31  ;;  %v1498_v7 = vmul.f32 %v2571_v6, %v3242_v31  ;;  %v2588_v42 = vld [vmem:[#allocation2 + $0x28] sm:$0xff]  ;;  %v2589_v44 = vld [vmem:[#allocation2 + $0x30] sm:$0xff] }
 0x3c9   :  { %1997 = vst [vmem:[#allocation7 + $0x138] sm:$0xff] %v1485_v46  ;;  %1998 = vst [vmem:[#allocation7 + $0x140] sm:$0xff] %v1486_v48  ;;  %v1499_v9 = vmul.f32 %v2572_v8, %v3242_v31  ;;  %v1500_v13 = vmul.f32 %v2573_v11, %v3242_v31  ;;  %v1501_v15 = vmul.f32 %v2574_v14, %v3242_v31  ;;  %v2590_v46 = vld [vmem:[#allocation2 + $0x38] sm:$0xff]  ;;  %v2591_v48 = vld [vmem:[#allocation2 + $0x40] sm:$0xff] }
 0x3ca   :  { %1999 = vst [vmem:[#allocation7 + $0x148] sm:$0xff] %v1487_v50  ;;  %2000 = vst [vmem:[#allocation7 + $0x150] sm:$0xff] %v1488_v52  ;;  %v1502_v18 = vmul.f32 %v2575_v17, %v3242_v31  ;;  %v1503_v20 = vmul.f32 %v2576_v19, %v3242_v31  ;;  %v1504_v22 = vmul.f32 %v2577_v21, %v3242_v31  ;;  %v2592_v50 = vld [vmem:[#allocation2 + $0x48] sm:$0xff]  ;;  %v2593_v52 = vld [vmem:[#allocation2 + $0x50] sm:$0xff] }
 0x3cb   :  { %2001 = vst [vmem:[#allocation7 + $0x158] sm:$0xff] %v1489_v54  ;;  %2002 = vst [vmem:[#allocation7 + $0x160] sm:$0xff] %v1490_v56  ;;  %v1505_v24 = vmul.f32 %v2578_v23, %v3242_v31  ;;  %v1506_v26 = vmul.f32 %v2579_v25, %v3242_v31  ;;  %v1507_v28 = vmul.f32 %v2580_v27, %v3242_v31  ;;  %v2594_v54 = vld [vmem:[#allocation2 + $0x58] sm:$0xff]  ;;  %v2595_v56 = vld [vmem:[#allocation2 + $0x60] sm:$0xff] }
 0x3cc   :  { %2003 = vst [vmem:[#allocation7 + $0x168] sm:$0xff] %v1491_v58  ;;  %2004 = vst [vmem:[#allocation7 + $0x170] sm:$0xff] %v1492_v60  ;;  %v1508_v30 = vmul.f32 %v2581_v29, %v3242_v31  ;;  %v1509_v33 = vmul.f32 %v2582_v32, %v3242_v31  ;;  %v1446_v12 = vmul.f32 %v2583_v34, %v3268_v16  ;;  %v2596_v58 = vld [vmem:[#allocation2 + $0x68] sm:$0xff]  ;;  %v2597_v60 = vld [vmem:[#allocation2 + $0x70] sm:$0xff] }
 0x3cd   :  { %2005 = vst [vmem:[#allocation7 + $0x178] sm:$0xff] %v1493_v62  ;;  %2006 = vst [vmem:[#allocation7 + $0x180] sm:$0xff] %v1494_v0  ;;  %v1447_v36 = vmul.f32 %v2584_v35, %v3268_v16  ;;  %v1448_v38 = vmul.f32 %v2585_v37, %v3268_v16  ;;  %v1449_v31 = vmul.f32 %v2586_v39, %v3268_v16  ;;  %v2598_v62 = vld [vmem:[#allocation2 + $0x78] sm:$0xff]  ;;  %v2599_v0 = vld [vmem:[#allocation2 + $0x80] sm:$0xff] }
 0x3ce   :  { %2007 = vst [vmem:[#allocation7 + $0x188] sm:$0xff] %v1495_v2  ;;  %2008 = vst [vmem:[#allocation7 + $0x190] sm:$0xff] %v1496_v3  ;;  %v1450_v41 = vmul.f32 %v2587_v40, %v3268_v16  ;;  %v1451_v43 = vmul.f32 %v2588_v42, %v3268_v16  ;;  %v1452_v45 = vmul.f32 %v2589_v44, %v3268_v16  ;;  %v2600_v2 = vld [vmem:[#allocation2 + $0x88] sm:$0xff]  ;;  %v2601_v3 = vld [vmem:[#allocation2 + $0x90] sm:$0xff] }
 0x3cf   :  { %2009 = vst [vmem:[#allocation7 + $0x198] sm:$0xff] %v1497_v5  ;;  %2010 = vst [vmem:[#allocation7 + $0x1a0] sm:$0xff] %v1498_v7  ;;  %v1453_v47 = vmul.f32 %v2590_v46, %v3268_v16  ;;  %v1454_v49 = vmul.f32 %v2591_v48, %v3268_v16  ;;  %v1455_v51 = vmul.f32 %v2592_v50, %v3268_v16  ;;  %v2602_v5 = vld [vmem:[#allocation2 + $0x98] sm:$0xff]  ;;  %v2603_v7 = vld [vmem:[#allocation2 + $0xa0] sm:$0xff] }
 0x3d0   :  { %2011 = vst [vmem:[#allocation7 + $0x1a8] sm:$0xff] %v1499_v9  ;;  %2012 = vst [vmem:[#allocation7 + $0x1b0] sm:$0xff] %v1500_v13  ;;  %v1456_v53 = vmul.f32 %v2593_v52, %v3268_v16  ;;  %v1457_v55 = vmul.f32 %v2594_v54, %v3268_v16  ;;  %v1458_v57 = vmul.f32 %v2595_v56, %v3268_v16  ;;  %v2604_v9 = vld [vmem:[#allocation2 + $0xa8] sm:$0xff]  ;;  %v2605_v13 = vld [vmem:[#allocation2 + $0xb0] sm:$0xff] }
 0x3d1   :  { %2013 = vst [vmem:[#allocation7 + $0x1b8] sm:$0xff] %v1501_v15  ;;  %2014 = vst [vmem:[#allocation7 + $0x1c0] sm:$0xff] %v1502_v18  ;;  %v1459_v59 = vmul.f32 %v2596_v58, %v3268_v16  ;;  %v1460_v61 = vmul.f32 %v2597_v60, %v3268_v16  ;;  %v1461_v63 = vmul.f32 %v2598_v62, %v3268_v16  ;;  %v2606_v15 = vld [vmem:[#allocation2 + $0xb8] sm:$0xff]  ;;  %v3302_v18 = vpop.permute.xlu1 %1389  ;;  %v2607_v19 = vld [vmem:[#allocation2 + $0xc0] sm:$0xff] }
 0x3d2   :  { %2015 = vst [vmem:[#allocation7 + $0x1c8] sm:$0xff] %v1503_v20  ;;  %2016 = vst [vmem:[#allocation7 + $0x1d0] sm:$0xff] %v1504_v22  ;;  %v1462_v1 = vmul.f32 %v2599_v0, %v3268_v16  ;;  %v1463_v10 = vmul.f32 %v2600_v2, %v3268_v16  ;;  %v1464_v4 = vmul.f32 %v2601_v3, %v3268_v16  ;;  %v2608_v21 = vld [vmem:[#allocation2 + $0xc8] sm:$0xff]  ;;  %v2609_v23 = vld [vmem:[#allocation2 + $0xd0] sm:$0xff] }
 0x3d3   :  { %2017 = vst [vmem:[#allocation7 + $0x1d8] sm:$0xff] %v1505_v24  ;;  %2018 = vst [vmem:[#allocation7 + $0x1e0] sm:$0xff] %v1506_v26  ;;  %v1465_v6 = vmul.f32 %v2602_v5, %v3268_v16  ;;  %v1466_v8 = vmul.f32 %v2603_v7, %v3268_v16  ;;  %v1467_v11 = vmul.f32 %v2604_v9, %v3268_v16  ;;  %v2610_v25 = vld [vmem:[#allocation2 + $0xd8] sm:$0xff]  ;;  %v2611_v27 = vld [vmem:[#allocation2 + $0xe0] sm:$0xff] }
 0x3d4   :  { %2019 = vst [vmem:[#allocation7 + $0x1e8] sm:$0xff] %v1507_v28  ;;  %2020 = vst [vmem:[#allocation7 + $0x1f0] sm:$0xff] %v1508_v30  ;;  %v1468_v14 = vmul.f32 %v2605_v13, %v3268_v16  ;;  %v1469_v17 = vmul.f32 %v2606_v15, %v3268_v16  ;;  %v1470_v20 = vmul.f32 %v2607_v19, %v3268_v16  ;;  %v2612_v29 = vld [vmem:[#allocation2 + $0xe8] sm:$0xff]  ;;  %v2613_v32 = vld [vmem:[#allocation2 + $0xf0] sm:$0xff] }
 0x3d5   :  { %2021 = vst [vmem:[#allocation7 + $0x1f8] sm:$0xff] %v1509_v33  ;;  %1958 = vst [vmem:[#allocation7] sm:$0xff] %v1446_v12  ;;  %v1471_v22 = vmul.f32 %v2608_v21, %v3268_v16  ;;  %v1472_v24 = vmul.f32 %v2609_v23, %v3268_v16  ;;  %v1473_v26 = vmul.f32 %v2610_v25, %v3268_v16  ;;  %v2614_v34 = vld [vmem:[#allocation2 + $0xf8] sm:$0xff]  ;;  %v2615_v35 = vld [vmem:[#allocation2 + $0x200] sm:$0xff] }
 0x3d6   :  { %1959 = vst [vmem:[#allocation7 + $0x8] sm:$0xff] %v1447_v36  ;;  %1960 = vst [vmem:[#allocation7 + $0x10] sm:$0xff] %v1448_v38  ;;  %v1474_v28 = vmul.f32 %v2611_v27, %v3268_v16  ;;  %v1475_v30 = vmul.f32 %v2612_v29, %v3268_v16  ;;  %v1476_v33 = vmul.f32 %v2613_v32, %v3268_v16  ;;  %v2616_v37 = vld [vmem:[#allocation2 + $0x208] sm:$0xff]  ;;  %v2617_v39 = vld [vmem:[#allocation2 + $0x210] sm:$0xff] }
 0x3d7   :  { %1961 = vst [vmem:[#allocation7 + $0x18] sm:$0xff] %v1449_v31  ;;  %1962 = vst [vmem:[#allocation7 + $0x20] sm:$0xff] %v1450_v41  ;;  %v1477_v12 = vmul.f32 %v2614_v34, %v3268_v16  ;;  %v1510_v36 = vmul.f32 %v2615_v35, %v3302_v18  ;;  %v1511_v38 = vmul.f32 %v2616_v37, %v3302_v18  ;;  %v2618_v40 = vld [vmem:[#allocation2 + $0x218] sm:$0xff]  ;;  %v2619_v41 = vld [vmem:[#allocation2 + $0x220] sm:$0xff] }
 0x3d8   :  { %1963 = vst [vmem:[#allocation7 + $0x28] sm:$0xff] %v1451_v43  ;;  %1964 = vst [vmem:[#allocation7 + $0x30] sm:$0xff] %v1452_v45  ;;  %v1512_v31 = vmul.f32 %v2617_v39, %v3302_v18  ;;  %v1513_v16 = vmul.f32 %v2618_v40, %v3302_v18  ;;  %v1514_v42 = vmul.f32 %v2619_v41, %v3302_v18  ;;  %v2620_v43 = vld [vmem:[#allocation2 + $0x228] sm:$0xff]  ;;  %v2621_v45 = vld [vmem:[#allocation2 + $0x230] sm:$0xff] }
 0x3d9   :  { %1965 = vst [vmem:[#allocation7 + $0x38] sm:$0xff] %v1453_v47  ;;  %1966 = vst [vmem:[#allocation7 + $0x40] sm:$0xff] %v1454_v49  ;;  %v1515_v44 = vmul.f32 %v2620_v43, %v3302_v18  ;;  %v1516_v46 = vmul.f32 %v2621_v45, %v3302_v18  ;;  %v2622_v47 = vld [vmem:[#allocation2 + $0x238] sm:$0xff]  ;;  %v2623_v49 = vld [vmem:[#allocation2 + $0x240] sm:$0xff] }
 0x3da   :  { %1967 = vst [vmem:[#allocation7 + $0x48] sm:$0xff] %v1455_v51  ;;  %1968 = vst [vmem:[#allocation7 + $0x50] sm:$0xff] %v1456_v53  ;;  %v1517_v48 = vmul.f32 %v2622_v47, %v3302_v18  ;;  %v1518_v50 = vmul.f32 %v2623_v49, %v3302_v18  ;;  %v2624_v51 = vld [vmem:[#allocation2 + $0x248] sm:$0xff]  ;;  %v2625_v53 = vld [vmem:[#allocation2 + $0x250] sm:$0xff] }
 0x3db   :  { %1969 = vst [vmem:[#allocation7 + $0x58] sm:$0xff] %v1457_v55  ;;  %1970 = vst [vmem:[#allocation7 + $0x60] sm:$0xff] %v1458_v57  ;;  %v1519_v52 = vmul.f32 %v2624_v51, %v3302_v18  ;;  %v1520_v54 = vmul.f32 %v2625_v53, %v3302_v18  ;;  %v2626_v55 = vld [vmem:[#allocation2 + $0x258] sm:$0xff]  ;;  %v2627_v57 = vld [vmem:[#allocation2 + $0x260] sm:$0xff] }
 0x3dc   :  { %1971 = vst [vmem:[#allocation7 + $0x68] sm:$0xff] %v1459_v59  ;;  %1972 = vst [vmem:[#allocation7 + $0x70] sm:$0xff] %v1460_v61  ;;  %v1521_v56 = vmul.f32 %v2626_v55, %v3302_v18  ;;  %v1522_v58 = vmul.f32 %v2627_v57, %v3302_v18  ;;  %v2628_v59 = vld [vmem:[#allocation2 + $0x268] sm:$0xff]  ;;  %v2629_v61 = vld [vmem:[#allocation2 + $0x270] sm:$0xff] }
 0x3dd   :  { %1973 = vst [vmem:[#allocation7 + $0x78] sm:$0xff] %v1461_v63  ;;  %1974 = vst [vmem:[#allocation7 + $0x80] sm:$0xff] %v1462_v1  ;;  %v1523_v60 = vmul.f32 %v2628_v59, %v3302_v18  ;;  %v1524_v62 = vmul.f32 %v2629_v61, %v3302_v18  ;;  %v2630_v63 = vld [vmem:[#allocation2 + $0x278] sm:$0xff]  ;;  %v2631_v1 = vld [vmem:[#allocation2 + $0x280] sm:$0xff] }
 0x3de   :  { %1975 = vst [vmem:[#allocation7 + $0x88] sm:$0xff] %v1463_v10  ;;  %1976 = vst [vmem:[#allocation7 + $0x90] sm:$0xff] %v1464_v4  ;;  %v1525_v0 = vmul.f32 %v2630_v63, %v3302_v18  ;;  %v1526_v2 = vmul.f32 %v2631_v1, %v3302_v18  ;;  %v2632_v10 = vld [vmem:[#allocation2 + $0x288] sm:$0xff]  ;;  %v2633_v4 = vld [vmem:[#allocation2 + $0x290] sm:$0xff] }
 0x3df   :  { %1977 = vst [vmem:[#allocation7 + $0x98] sm:$0xff] %v1465_v6  ;;  %1978 = vst [vmem:[#allocation7 + $0xa0] sm:$0xff] %v1466_v8  ;;  %v1527_v3 = vmul.f32 %v2632_v10, %v3302_v18  ;;  %v1528_v5 = vmul.f32 %v2633_v4, %v3302_v18  ;;  %v2634_v6 = vld [vmem:[#allocation2 + $0x298] sm:$0xff]  ;;  %v2635_v8 = vld [vmem:[#allocation2 + $0x2a0] sm:$0xff] }
 0x3e0   :  { %1979 = vst [vmem:[#allocation7 + $0xa8] sm:$0xff] %v1467_v11  ;;  %1980 = vst [vmem:[#allocation7 + $0xb0] sm:$0xff] %v1468_v14  ;;  %v1529_v7 = vmul.f32 %v2634_v6, %v3302_v18  ;;  %v1530_v9 = vmul.f32 %v2635_v8, %v3302_v18  ;;  %v2636_v11 = vld [vmem:[#allocation2 + $0x2a8] sm:$0xff]  ;;  %v2637_v14 = vld [vmem:[#allocation2 + $0x2b0] sm:$0xff] }
 0x3e1   :  { %1981 = vst [vmem:[#allocation7 + $0xb8] sm:$0xff] %v1469_v17  ;;  %1982 = vst [vmem:[#allocation7 + $0xc0] sm:$0xff] %v1470_v20  ;;  %v1531_v13 = vmul.f32 %v2636_v11, %v3302_v18  ;;  %v1532_v15 = vmul.f32 %v2637_v14, %v3302_v18  ;;  %v2638_v17 = vld [vmem:[#allocation2 + $0x2b8] sm:$0xff]  ;;  %v3336_v20 = vpop.permute.xlu0 %1397  ;;  %v2639_v21 = vld [vmem:[#allocation2 + $0x2c0] sm:$0xff] }
 0x3e2   :  { %1983 = vst [vmem:[#allocation7 + $0xc8] sm:$0xff] %v1471_v22  ;;  %1984 = vst [vmem:[#allocation7 + $0xd0] sm:$0xff] %v1472_v24  ;;  %v1533_v19 = vmul.f32 %v2638_v17, %v3302_v18  ;;  %v1534_v22 = vmul.f32 %v2639_v21, %v3302_v18  ;;  %v2640_v23 = vld [vmem:[#allocation2 + $0x2c8] sm:$0xff]  ;;  %v2641_v25 = vld [vmem:[#allocation2 + $0x2d0] sm:$0xff] }
 0x3e3   :  { %1985 = vst [vmem:[#allocation7 + $0xd8] sm:$0xff] %v1473_v26  ;;  %1986 = vst [vmem:[#allocation7 + $0xe0] sm:$0xff] %v1474_v28  ;;  %v1535_v24 = vmul.f32 %v2640_v23, %v3302_v18  ;;  %v1536_v26 = vmul.f32 %v2641_v25, %v3302_v18  ;;  %v2642_v27 = vld [vmem:[#allocation2 + $0x2d8] sm:$0xff]  ;;  %v2643_v29 = vld [vmem:[#allocation2 + $0x2e0] sm:$0xff] }
 0x3e4   :  { %1987 = vst [vmem:[#allocation7 + $0xe8] sm:$0xff] %v1475_v30  ;;  %1988 = vst [vmem:[#allocation7 + $0xf0] sm:$0xff] %v1476_v33  ;;  %v1537_v28 = vmul.f32 %v2642_v27, %v3302_v18  ;;  %v1538_v30 = vmul.f32 %v2643_v29, %v3302_v18  ;;  %v2644_v32 = vld [vmem:[#allocation2 + $0x2e8] sm:$0xff]  ;;  %v2645_v34 = vld [vmem:[#allocation2 + $0x2f0] sm:$0xff] }
 0x3e5   :  { %1989 = vst [vmem:[#allocation7 + $0xf8] sm:$0xff] %v1477_v12  ;;  %2022 = vst [vmem:[#allocation7 + $0x200] sm:$0xff] %v1510_v36  ;;  %v1539_v33 = vmul.f32 %v2644_v32, %v3302_v18  ;;  %v1540_v12 = vmul.f32 %v2645_v34, %v3302_v18  ;;  %v2646_v35 = vld [vmem:[#allocation2 + $0x2f8] sm:$0xff]  ;;  %v2647_v37 = vld [vmem:[#allocation2 + $0x400] sm:$0xff] }
 0x3e6   :  { %2023 = vst [vmem:[#allocation7 + $0x208] sm:$0xff] %v1511_v38  ;;  %2024 = vst [vmem:[#allocation7 + $0x210] sm:$0xff] %v1512_v31  ;;  %v1541_v36 = vmul.f32 %v2646_v35, %v3302_v18  ;;  %v1574_v38 = vmul.f32 %v2647_v37, %v3336_v20  ;;  %v2648_v39 = vld [vmem:[#allocation2 + $0x408] sm:$0xff]  ;;  %v2649_v40 = vld [vmem:[#allocation2 + $0x410] sm:$0xff] }
 0x3e7   :  { %2025 = vst [vmem:[#allocation7 + $0x218] sm:$0xff] %v1513_v16  ;;  %2026 = vst [vmem:[#allocation7 + $0x220] sm:$0xff] %v1514_v42  ;;  %v1575_v31 = vmul.f32 %v2648_v39, %v3336_v20  ;;  %v1576_v16 = vmul.f32 %v2649_v40, %v3336_v20  ;;  %v2650_v41 = vld [vmem:[#allocation2 + $0x418] sm:$0xff]  ;;  %v2651_v42 = vld [vmem:[#allocation2 + $0x420] sm:$0xff] }
 0x3e8   :  { %2027 = vst [vmem:[#allocation7 + $0x228] sm:$0xff] %v1515_v44  ;;  %2028 = vst [vmem:[#allocation7 + $0x230] sm:$0xff] %v1516_v46  ;;  %v1577_v18 = vmul.f32 %v2650_v41, %v3336_v20  ;;  %v1578_v43 = vmul.f32 %v2651_v42, %v3336_v20  ;;  %v2652_v44 = vld [vmem:[#allocation2 + $0x428] sm:$0xff]  ;;  %v2653_v46 = vld [vmem:[#allocation2 + $0x430] sm:$0xff] }
 0x3e9   :  { %2029 = vst [vmem:[#allocation7 + $0x238] sm:$0xff] %v1517_v48  ;;  %2030 = vst [vmem:[#allocation7 + $0x240] sm:$0xff] %v1518_v50  ;;  %v1579_v45 = vmul.f32 %v2652_v44, %v3336_v20  ;;  %v1580_v47 = vmul.f32 %v2653_v46, %v3336_v20  ;;  %v2654_v48 = vld [vmem:[#allocation2 + $0x438] sm:$0xff]  ;;  %v2655_v50 = vld [vmem:[#allocation2 + $0x440] sm:$0xff] }
 0x3ea   :  { %2031 = vst [vmem:[#allocation7 + $0x248] sm:$0xff] %v1519_v52  ;;  %2032 = vst [vmem:[#allocation7 + $0x250] sm:$0xff] %v1520_v54  ;;  %v1581_v49 = vmul.f32 %v2654_v48, %v3336_v20  ;;  %v1582_v51 = vmul.f32 %v2655_v50, %v3336_v20  ;;  %v2656_v52 = vld [vmem:[#allocation2 + $0x448] sm:$0xff]  ;;  %v2657_v54 = vld [vmem:[#allocation2 + $0x450] sm:$0xff] }
 0x3eb   :  { %2033 = vst [vmem:[#allocation7 + $0x258] sm:$0xff] %v1521_v56  ;;  %2034 = vst [vmem:[#allocation7 + $0x260] sm:$0xff] %v1522_v58  ;;  %v1583_v53 = vmul.f32 %v2656_v52, %v3336_v20  ;;  %v1584_v55 = vmul.f32 %v2657_v54, %v3336_v20  ;;  %v2658_v56 = vld [vmem:[#allocation2 + $0x458] sm:$0xff]  ;;  %v2659_v58 = vld [vmem:[#allocation2 + $0x460] sm:$0xff] }
 0x3ec   :  { %2035 = vst [vmem:[#allocation7 + $0x268] sm:$0xff] %v1523_v60  ;;  %2036 = vst [vmem:[#allocation7 + $0x270] sm:$0xff] %v1524_v62  ;;  %v1585_v57 = vmul.f32 %v2658_v56, %v3336_v20  ;;  %v1586_v59 = vmul.f32 %v2659_v58, %v3336_v20  ;;  %v2660_v60 = vld [vmem:[#allocation2 + $0x468] sm:$0xff]  ;;  %v2661_v62 = vld [vmem:[#allocation2 + $0x470] sm:$0xff] }
 0x3ed   :  { %2037 = vst [vmem:[#allocation7 + $0x278] sm:$0xff] %v1525_v0  ;;  %2038 = vst [vmem:[#allocation7 + $0x280] sm:$0xff] %v1526_v2  ;;  %v1587_v61 = vmul.f32 %v2660_v60, %v3336_v20  ;;  %v1588_v63 = vmul.f32 %v2661_v62, %v3336_v20  ;;  %v2662_v0 = vld [vmem:[#allocation2 + $0x478] sm:$0xff]  ;;  %v2663_v2 = vld [vmem:[#allocation2 + $0x480] sm:$0xff] }
 0x3ee   :  { %2039 = vst [vmem:[#allocation7 + $0x288] sm:$0xff] %v1527_v3  ;;  %2040 = vst [vmem:[#allocation7 + $0x290] sm:$0xff] %v1528_v5  ;;  %v1589_v1 = vmul.f32 %v2662_v0, %v3336_v20  ;;  %v1590_v10 = vmul.f32 %v2663_v2, %v3336_v20  ;;  %v2664_v3 = vld [vmem:[#allocation2 + $0x488] sm:$0xff]  ;;  %v2665_v5 = vld [vmem:[#allocation2 + $0x490] sm:$0xff] }
 0x3ef   :  { %2041 = vst [vmem:[#allocation7 + $0x298] sm:$0xff] %v1529_v7  ;;  %2042 = vst [vmem:[#allocation7 + $0x2a0] sm:$0xff] %v1530_v9  ;;  %v1591_v4 = vmul.f32 %v2664_v3, %v3336_v20  ;;  %v1592_v6 = vmul.f32 %v2665_v5, %v3336_v20  ;;  %v2666_v7 = vld [vmem:[#allocation2 + $0x498] sm:$0xff]  ;;  %v2667_v9 = vld [vmem:[#allocation2 + $0x4a0] sm:$0xff] }
 0x3f0   :  { %2043 = vst [vmem:[#allocation7 + $0x2a8] sm:$0xff] %v1531_v13  ;;  %2044 = vst [vmem:[#allocation7 + $0x2b0] sm:$0xff] %v1532_v15  ;;  %v1593_v8 = vmul.f32 %v2666_v7, %v3336_v20  ;;  %v1594_v11 = vmul.f32 %v2667_v9, %v3336_v20  ;;  %v2668_v13 = vld [vmem:[#allocation2 + $0x4a8] sm:$0xff]  ;;  %v2669_v15 = vld [vmem:[#allocation2 + $0x4b0] sm:$0xff] }
 0x3f1   :  { %2045 = vst [vmem:[#allocation7 + $0x2b8] sm:$0xff] %v1533_v19  ;;  %2046 = vst [vmem:[#allocation7 + $0x2c0] sm:$0xff] %v1534_v22  ;;  %v1595_v14 = vmul.f32 %v2668_v13, %v3336_v20  ;;  %v1596_v17 = vmul.f32 %v2669_v15, %v3336_v20  ;;  %v2670_v19 = vld [vmem:[#allocation2 + $0x4b8] sm:$0xff]  ;;  %v3370_v22 = vpop.permute.xlu1 %1393  ;;  %v2671_v23 = vld [vmem:[#allocation2 + $0x4c0] sm:$0xff] }
 0x3f2   :  { %2047 = vst [vmem:[#allocation7 + $0x2c8] sm:$0xff] %v1535_v24  ;;  %2048 = vst [vmem:[#allocation7 + $0x2d0] sm:$0xff] %v1536_v26  ;;  %v1597_v21 = vmul.f32 %v2670_v19, %v3336_v20  ;;  %v1598_v24 = vmul.f32 %v2671_v23, %v3336_v20  ;;  %v2672_v25 = vld [vmem:[#allocation2 + $0x4c8] sm:$0xff]  ;;  %v2673_v27 = vld [vmem:[#allocation2 + $0x4d0] sm:$0xff] }
 0x3f3   :  { %2049 = vst [vmem:[#allocation7 + $0x2d8] sm:$0xff] %v1537_v28  ;;  %2050 = vst [vmem:[#allocation7 + $0x2e0] sm:$0xff] %v1538_v30  ;;  %v1599_v26 = vmul.f32 %v2672_v25, %v3336_v20  ;;  %v1600_v28 = vmul.f32 %v2673_v27, %v3336_v20  ;;  %v2674_v29 = vld [vmem:[#allocation2 + $0x4d8] sm:$0xff]  ;;  %v2675_v32 = vld [vmem:[#allocation2 + $0x4e0] sm:$0xff] }
 0x3f4   :  { %2051 = vst [vmem:[#allocation7 + $0x2e8] sm:$0xff] %v1539_v33  ;;  %2052 = vst [vmem:[#allocation7 + $0x2f0] sm:$0xff] %v1540_v12  ;;  %v1601_v30 = vmul.f32 %v2674_v29, %v3336_v20  ;;  %v1602_v33 = vmul.f32 %v2675_v32, %v3336_v20  ;;  %v2676_v34 = vld [vmem:[#allocation2 + $0x4e8] sm:$0xff]  ;;  %v2677_v35 = vld [vmem:[#allocation2 + $0x4f0] sm:$0xff] }
 0x3f5   :  { %2053 = vst [vmem:[#allocation7 + $0x2f8] sm:$0xff] %v1541_v36  ;;  %2086 = vst [vmem:[#allocation7 + $0x400] sm:$0xff] %v1574_v38  ;;  %v1603_v12 = vmul.f32 %v2676_v34, %v3336_v20  ;;  %v1604_v36 = vmul.f32 %v2677_v35, %v3336_v20  ;;  %v2678_v37 = vld [vmem:[#allocation2 + $0x4f8] sm:$0xff]  ;;  %v2679_v39 = vld [vmem:[#allocation2 + $0x300] sm:$0xff] }
 0x3f6   :  { %2087 = vst [vmem:[#allocation7 + $0x408] sm:$0xff] %v1575_v31  ;;  %2088 = vst [vmem:[#allocation7 + $0x410] sm:$0xff] %v1576_v16  ;;  %v1605_v38 = vmul.f32 %v2678_v37, %v3336_v20  ;;  %v1542_v31 = vmul.f32 %v2679_v39, %v3370_v22  ;;  %v2680_v40 = vld [vmem:[#allocation2 + $0x308] sm:$0xff]  ;;  %v2681_v41 = vld [vmem:[#allocation2 + $0x310] sm:$0xff] }
 0x3f7   :  { %2089 = vst [vmem:[#allocation7 + $0x418] sm:$0xff] %v1577_v18  ;;  %2090 = vst [vmem:[#allocation7 + $0x420] sm:$0xff] %v1578_v43  ;;  %v1543_v16 = vmul.f32 %v2680_v40, %v3370_v22  ;;  %v1544_v18 = vmul.f32 %v2681_v41, %v3370_v22  ;;  %v2682_v42 = vld [vmem:[#allocation2 + $0x318] sm:$0xff]  ;;  %v2683_v43 = vld [vmem:[#allocation2 + $0x320] sm:$0xff] }
 0x3f8   :  { %2091 = vst [vmem:[#allocation7 + $0x428] sm:$0xff] %v1579_v45  ;;  %2092 = vst [vmem:[#allocation7 + $0x430] sm:$0xff] %v1580_v47  ;;  %v1545_v20 = vmul.f32 %v2682_v42, %v3370_v22  ;;  %v1546_v44 = vmul.f32 %v2683_v43, %v3370_v22  ;;  %v2684_v45 = vld [vmem:[#allocation2 + $0x328] sm:$0xff]  ;;  %v2685_v47 = vld [vmem:[#allocation2 + $0x330] sm:$0xff] }
 0x3f9   :  { %2093 = vst [vmem:[#allocation7 + $0x438] sm:$0xff] %v1581_v49  ;;  %2094 = vst [vmem:[#allocation7 + $0x440] sm:$0xff] %v1582_v51  ;;  %v1547_v46 = vmul.f32 %v2684_v45, %v3370_v22  ;;  %v1548_v48 = vmul.f32 %v2685_v47, %v3370_v22  ;;  %v2686_v49 = vld [vmem:[#allocation2 + $0x338] sm:$0xff]  ;;  %v2687_v51 = vld [vmem:[#allocation2 + $0x340] sm:$0xff] }
 0x3fa   :  { %2095 = vst [vmem:[#allocation7 + $0x448] sm:$0xff] %v1583_v53  ;;  %2096 = vst [vmem:[#allocation7 + $0x450] sm:$0xff] %v1584_v55  ;;  %v1549_v50 = vmul.f32 %v2686_v49, %v3370_v22  ;;  %v1550_v52 = vmul.f32 %v2687_v51, %v3370_v22  ;;  %v2688_v53 = vld [vmem:[#allocation2 + $0x348] sm:$0xff]  ;;  %v2689_v55 = vld [vmem:[#allocation2 + $0x350] sm:$0xff] }
 0x3fb   :  { %2097 = vst [vmem:[#allocation7 + $0x458] sm:$0xff] %v1585_v57  ;;  %2098 = vst [vmem:[#allocation7 + $0x460] sm:$0xff] %v1586_v59  ;;  %v1551_v54 = vmul.f32 %v2688_v53, %v3370_v22  ;;  %v1552_v56 = vmul.f32 %v2689_v55, %v3370_v22  ;;  %v2690_v57 = vld [vmem:[#allocation2 + $0x358] sm:$0xff]  ;;  %v2691_v59 = vld [vmem:[#allocation2 + $0x360] sm:$0xff] }
 0x3fc   :  { %2099 = vst [vmem:[#allocation7 + $0x468] sm:$0xff] %v1587_v61  ;;  %2100 = vst [vmem:[#allocation7 + $0x470] sm:$0xff] %v1588_v63  ;;  %v1553_v58 = vmul.f32 %v2690_v57, %v3370_v22  ;;  %v1554_v60 = vmul.f32 %v2691_v59, %v3370_v22  ;;  %v2692_v61 = vld [vmem:[#allocation2 + $0x368] sm:$0xff]  ;;  %v2693_v63 = vld [vmem:[#allocation2 + $0x370] sm:$0xff] }
 0x3fd   :  { %2101 = vst [vmem:[#allocation7 + $0x478] sm:$0xff] %v1589_v1  ;;  %2102 = vst [vmem:[#allocation7 + $0x480] sm:$0xff] %v1590_v10  ;;  %v1555_v62 = vmul.f32 %v2692_v61, %v3370_v22  ;;  %v1556_v0 = vmul.f32 %v2693_v63, %v3370_v22  ;;  %v2694_v1 = vld [vmem:[#allocation2 + $0x378] sm:$0xff]  ;;  %v2695_v10 = vld [vmem:[#allocation2 + $0x380] sm:$0xff] }
 0x3fe   :  { %2103 = vst [vmem:[#allocation7 + $0x488] sm:$0xff] %v1591_v4  ;;  %2104 = vst [vmem:[#allocation7 + $0x490] sm:$0xff] %v1592_v6  ;;  %v1557_v2 = vmul.f32 %v2694_v1, %v3370_v22  ;;  %v1558_v3 = vmul.f32 %v2695_v10, %v3370_v22  ;;  %v2696_v4 = vld [vmem:[#allocation2 + $0x388] sm:$0xff]  ;;  %v2697_v6 = vld [vmem:[#allocation2 + $0x390] sm:$0xff] }
 0x3ff   :  { %2105 = vst [vmem:[#allocation7 + $0x498] sm:$0xff] %v1593_v8  ;;  %2106 = vst [vmem:[#allocation7 + $0x4a0] sm:$0xff] %v1594_v11  ;;  %v1559_v5 = vmul.f32 %v2696_v4, %v3370_v22  ;;  %v1560_v7 = vmul.f32 %v2697_v6, %v3370_v22  ;;  %v2698_v8 = vld [vmem:[#allocation2 + $0x398] sm:$0xff]  ;;  %v2699_v11 = vld [vmem:[#allocation2 + $0x3a0] sm:$0xff] }
 0x400   :  { %2107 = vst [vmem:[#allocation7 + $0x4a8] sm:$0xff] %v1595_v14  ;;  %2108 = vst [vmem:[#allocation7 + $0x4b0] sm:$0xff] %v1596_v17  ;;  %v1561_v9 = vmul.f32 %v2698_v8, %v3370_v22  ;;  %v1562_v13 = vmul.f32 %v2699_v11, %v3370_v22  ;;  %v2700_v14 = vld [vmem:[#allocation2 + $0x3a8] sm:$0xff]  ;;  %v2701_v17 = vld [vmem:[#allocation2 + $0x3b0] sm:$0xff] }
 0x401   :  { %2109 = vst [vmem:[#allocation7 + $0x4b8] sm:$0xff] %v1597_v21  ;;  %2110 = vst [vmem:[#allocation7 + $0x4c0] sm:$0xff] %v1598_v24  ;;  %v1563_v15 = vmul.f32 %v2700_v14, %v3370_v22  ;;  %v1564_v19 = vmul.f32 %v2701_v17, %v3370_v22  ;;  %v2702_v21 = vld [vmem:[#allocation2 + $0x3b8] sm:$0xff]  ;;  %v3404_v24 = vpop.permute.xlu0 %1405  ;;  %v2703_v25 = vld [vmem:[#allocation2 + $0x3c0] sm:$0xff] }
 0x402   :  { %2111 = vst [vmem:[#allocation7 + $0x4c8] sm:$0xff] %v1599_v26  ;;  %2112 = vst [vmem:[#allocation7 + $0x4d0] sm:$0xff] %v1600_v28  ;;  %v1565_v23 = vmul.f32 %v2702_v21, %v3370_v22  ;;  %v1566_v26 = vmul.f32 %v2703_v25, %v3370_v22  ;;  %v2704_v27 = vld [vmem:[#allocation2 + $0x3c8] sm:$0xff]  ;;  %v2705_v29 = vld [vmem:[#allocation2 + $0x3d0] sm:$0xff] }
 0x403   :  { %2113 = vst [vmem:[#allocation7 + $0x4d8] sm:$0xff] %v1601_v30  ;;  %2114 = vst [vmem:[#allocation7 + $0x4e0] sm:$0xff] %v1602_v33  ;;  %v1567_v28 = vmul.f32 %v2704_v27, %v3370_v22  ;;  %v1568_v30 = vmul.f32 %v2705_v29, %v3370_v22  ;;  %v2706_v32 = vld [vmem:[#allocation2 + $0x3d8] sm:$0xff]  ;;  %v2707_v34 = vld [vmem:[#allocation2 + $0x3e0] sm:$0xff] }
 0x404   :  { %2115 = vst [vmem:[#allocation7 + $0x4e8] sm:$0xff] %v1603_v12  ;;  %2116 = vst [vmem:[#allocation7 + $0x4f0] sm:$0xff] %v1604_v36  ;;  %v1569_v33 = vmul.f32 %v2706_v32, %v3370_v22  ;;  %v1570_v12 = vmul.f32 %v2707_v34, %v3370_v22  ;;  %v2708_v35 = vld [vmem:[#allocation2 + $0x3e8] sm:$0xff]  ;;  %v2709_v37 = vld [vmem:[#allocation2 + $0x3f0] sm:$0xff] }
 0x405   :  { %2117 = vst [vmem:[#allocation7 + $0x4f8] sm:$0xff] %v1605_v38  ;;  %2054 = vst [vmem:[#allocation7 + $0x300] sm:$0xff] %v1542_v31  ;;  %v1571_v36 = vmul.f32 %v2708_v35, %v3370_v22  ;;  %v1572_v38 = vmul.f32 %v2709_v37, %v3370_v22  ;;  %v2710_v39 = vld [vmem:[#allocation2 + $0x3f8] sm:$0xff]  ;;  %v2711_v40 = vld [vmem:[#allocation2 + $0x600] sm:$0xff] }
 0x406   :  { %2055 = vst [vmem:[#allocation7 + $0x308] sm:$0xff] %v1543_v16  ;;  %2056 = vst [vmem:[#allocation7 + $0x310] sm:$0xff] %v1544_v18  ;;  %v1573_v31 = vmul.f32 %v2710_v39, %v3370_v22  ;;  %v1638_v16 = vmul.f32 %v2711_v40, %v3404_v24  ;;  %v2712_v41 = vld [vmem:[#allocation2 + $0x608] sm:$0xff]  ;;  %v2713_v42 = vld [vmem:[#allocation2 + $0x610] sm:$0xff] }
 0x407   :  { %2057 = vst [vmem:[#allocation7 + $0x318] sm:$0xff] %v1545_v20  ;;  %2058 = vst [vmem:[#allocation7 + $0x320] sm:$0xff] %v1546_v44  ;;  %v1639_v18 = vmul.f32 %v2712_v41, %v3404_v24  ;;  %v1640_v20 = vmul.f32 %v2713_v42, %v3404_v24  ;;  %v2714_v43 = vld [vmem:[#allocation2 + $0x618] sm:$0xff]  ;;  %v2715_v44 = vld [vmem:[#allocation2 + $0x620] sm:$0xff] }
 0x408   :  { %2059 = vst [vmem:[#allocation7 + $0x328] sm:$0xff] %v1547_v46  ;;  %2060 = vst [vmem:[#allocation7 + $0x330] sm:$0xff] %v1548_v48  ;;  %v1641_v22 = vmul.f32 %v2714_v43, %v3404_v24  ;;  %v1642_v45 = vmul.f32 %v2715_v44, %v3404_v24  ;;  %v2716_v46 = vld [vmem:[#allocation2 + $0x628] sm:$0xff]  ;;  %v2717_v48 = vld [vmem:[#allocation2 + $0x630] sm:$0xff] }
 0x409   :  { %2061 = vst [vmem:[#allocation7 + $0x338] sm:$0xff] %v1549_v50  ;;  %2062 = vst [vmem:[#allocation7 + $0x340] sm:$0xff] %v1550_v52  ;;  %v1643_v47 = vmul.f32 %v2716_v46, %v3404_v24  ;;  %v1644_v49 = vmul.f32 %v2717_v48, %v3404_v24  ;;  %v2718_v50 = vld [vmem:[#allocation2 + $0x638] sm:$0xff]  ;;  %v2719_v52 = vld [vmem:[#allocation2 + $0x640] sm:$0xff] }
 0x40a   :  { %2063 = vst [vmem:[#allocation7 + $0x348] sm:$0xff] %v1551_v54  ;;  %2064 = vst [vmem:[#allocation7 + $0x350] sm:$0xff] %v1552_v56  ;;  %v1645_v51 = vmul.f32 %v2718_v50, %v3404_v24  ;;  %v1646_v53 = vmul.f32 %v2719_v52, %v3404_v24  ;;  %v2720_v54 = vld [vmem:[#allocation2 + $0x648] sm:$0xff]  ;;  %v2721_v56 = vld [vmem:[#allocation2 + $0x650] sm:$0xff] }
 0x40b   :  { %2065 = vst [vmem:[#allocation7 + $0x358] sm:$0xff] %v1553_v58  ;;  %2066 = vst [vmem:[#allocation7 + $0x360] sm:$0xff] %v1554_v60  ;;  %v1647_v55 = vmul.f32 %v2720_v54, %v3404_v24  ;;  %v1648_v57 = vmul.f32 %v2721_v56, %v3404_v24  ;;  %v2722_v58 = vld [vmem:[#allocation2 + $0x658] sm:$0xff]  ;;  %v2723_v60 = vld [vmem:[#allocation2 + $0x660] sm:$0xff] }
 0x40c   :  { %2067 = vst [vmem:[#allocation7 + $0x368] sm:$0xff] %v1555_v62  ;;  %2068 = vst [vmem:[#allocation7 + $0x370] sm:$0xff] %v1556_v0  ;;  %v1649_v59 = vmul.f32 %v2722_v58, %v3404_v24  ;;  %v1650_v61 = vmul.f32 %v2723_v60, %v3404_v24  ;;  %v2724_v62 = vld [vmem:[#allocation2 + $0x668] sm:$0xff]  ;;  %v2725_v0 = vld [vmem:[#allocation2 + $0x670] sm:$0xff] }
 0x40d   :  { %2069 = vst [vmem:[#allocation7 + $0x378] sm:$0xff] %v1557_v2  ;;  %2070 = vst [vmem:[#allocation7 + $0x380] sm:$0xff] %v1558_v3  ;;  %v1651_v63 = vmul.f32 %v2724_v62, %v3404_v24  ;;  %v1652_v1 = vmul.f32 %v2725_v0, %v3404_v24  ;;  %v2726_v2 = vld [vmem:[#allocation2 + $0x678] sm:$0xff]  ;;  %v2727_v3 = vld [vmem:[#allocation2 + $0x680] sm:$0xff] }
 0x40e   :  { %2071 = vst [vmem:[#allocation7 + $0x388] sm:$0xff] %v1559_v5  ;;  %2072 = vst [vmem:[#allocation7 + $0x390] sm:$0xff] %v1560_v7  ;;  %v1653_v10 = vmul.f32 %v2726_v2, %v3404_v24  ;;  %v1654_v4 = vmul.f32 %v2727_v3, %v3404_v24  ;;  %v2728_v5 = vld [vmem:[#allocation2 + $0x688] sm:$0xff]  ;;  %v2729_v7 = vld [vmem:[#allocation2 + $0x690] sm:$0xff] }
 0x40f   :  { %2073 = vst [vmem:[#allocation7 + $0x398] sm:$0xff] %v1561_v9  ;;  %2074 = vst [vmem:[#allocation7 + $0x3a0] sm:$0xff] %v1562_v13  ;;  %v1655_v6 = vmul.f32 %v2728_v5, %v3404_v24  ;;  %v1656_v8 = vmul.f32 %v2729_v7, %v3404_v24  ;;  %v2730_v9 = vld [vmem:[#allocation2 + $0x698] sm:$0xff]  ;;  %v2731_v13 = vld [vmem:[#allocation2 + $0x6a0] sm:$0xff] }
 0x410   :  { %2075 = vst [vmem:[#allocation7 + $0x3a8] sm:$0xff] %v1563_v15  ;;  %2076 = vst [vmem:[#allocation7 + $0x3b0] sm:$0xff] %v1564_v19  ;;  %v1657_v11 = vmul.f32 %v2730_v9, %v3404_v24  ;;  %v1658_v14 = vmul.f32 %v2731_v13, %v3404_v24  ;;  %v2732_v15 = vld [vmem:[#allocation2 + $0x6a8] sm:$0xff]  ;;  %v2733_v19 = vld [vmem:[#allocation2 + $0x6b0] sm:$0xff] }
 0x411   :  { %2077 = vst [vmem:[#allocation7 + $0x3b8] sm:$0xff] %v1565_v23  ;;  %2078 = vst [vmem:[#allocation7 + $0x3c0] sm:$0xff] %v1566_v26  ;;  %v1659_v17 = vmul.f32 %v2732_v15, %v3404_v24  ;;  %v1660_v21 = vmul.f32 %v2733_v19, %v3404_v24  ;;  %v2734_v23 = vld [vmem:[#allocation2 + $0x6b8] sm:$0xff]  ;;  %v3438_v26 = vpop.permute.xlu1 %1401  ;;  %v2735_v27 = vld [vmem:[#allocation2 + $0x6c0] sm:$0xff] }
 0x412   :  { %2079 = vst [vmem:[#allocation7 + $0x3c8] sm:$0xff] %v1567_v28  ;;  %2080 = vst [vmem:[#allocation7 + $0x3d0] sm:$0xff] %v1568_v30  ;;  %v1661_v25 = vmul.f32 %v2734_v23, %v3404_v24  ;;  %v1662_v28 = vmul.f32 %v2735_v27, %v3404_v24  ;;  %v2736_v29 = vld [vmem:[#allocation2 + $0x6c8] sm:$0xff]  ;;  %v2737_v32 = vld [vmem:[#allocation2 + $0x6d0] sm:$0xff] }
 0x413   :  { %2081 = vst [vmem:[#allocation7 + $0x3d8] sm:$0xff] %v1569_v33  ;;  %2082 = vst [vmem:[#allocation7 + $0x3e0] sm:$0xff] %v1570_v12  ;;  %v1663_v30 = vmul.f32 %v2736_v29, %v3404_v24  ;;  %v1664_v33 = vmul.f32 %v2737_v32, %v3404_v24  ;;  %v2738_v34 = vld [vmem:[#allocation2 + $0x6d8] sm:$0xff]  ;;  %v2739_v35 = vld [vmem:[#allocation2 + $0x6e0] sm:$0xff] }
 0x414   :  { %2083 = vst [vmem:[#allocation7 + $0x3e8] sm:$0xff] %v1571_v36  ;;  %2084 = vst [vmem:[#allocation7 + $0x3f0] sm:$0xff] %v1572_v38  ;;  %v1665_v12 = vmul.f32 %v2738_v34, %v3404_v24  ;;  %v1666_v36 = vmul.f32 %v2739_v35, %v3404_v24  ;;  %v2740_v37 = vld [vmem:[#allocation2 + $0x6e8] sm:$0xff]  ;;  %v2741_v39 = vld [vmem:[#allocation2 + $0x6f0] sm:$0xff] }
 0x415   :  { %2085 = vst [vmem:[#allocation7 + $0x3f8] sm:$0xff] %v1573_v31  ;;  %2150 = vst [vmem:[#allocation7 + $0x600] sm:$0xff] %v1638_v16  ;;  %v1667_v38 = vmul.f32 %v2740_v37, %v3404_v24  ;;  %v1668_v31 = vmul.f32 %v2741_v39, %v3404_v24  ;;  %v2742_v40 = vld [vmem:[#allocation2 + $0x6f8] sm:$0xff]  ;;  %v2743_v41 = vld [vmem:[#allocation2 + $0x500] sm:$0xff] }
 0x416   :  { %2151 = vst [vmem:[#allocation7 + $0x608] sm:$0xff] %v1639_v18  ;;  %2152 = vst [vmem:[#allocation7 + $0x610] sm:$0xff] %v1640_v20  ;;  %v1669_v16 = vmul.f32 %v2742_v40, %v3404_v24  ;;  %v1606_v18 = vmul.f32 %v2743_v41, %v3438_v26  ;;  %v2744_v42 = vld [vmem:[#allocation2 + $0x508] sm:$0xff]  ;;  %v2745_v43 = vld [vmem:[#allocation2 + $0x510] sm:$0xff] }
 0x417   :  { %2153 = vst [vmem:[#allocation7 + $0x618] sm:$0xff] %v1641_v22  ;;  %2154 = vst [vmem:[#allocation7 + $0x620] sm:$0xff] %v1642_v45  ;;  %v1607_v20 = vmul.f32 %v2744_v42, %v3438_v26  ;;  %v1608_v22 = vmul.f32 %v2745_v43, %v3438_v26  ;;  %v2746_v44 = vld [vmem:[#allocation2 + $0x518] sm:$0xff]  ;;  %v2747_v45 = vld [vmem:[#allocation2 + $0x520] sm:$0xff] }
 0x418   :  { %2155 = vst [vmem:[#allocation7 + $0x628] sm:$0xff] %v1643_v47  ;;  %2156 = vst [vmem:[#allocation7 + $0x630] sm:$0xff] %v1644_v49  ;;  %v1609_v24 = vmul.f32 %v2746_v44, %v3438_v26  ;;  %v1610_v46 = vmul.f32 %v2747_v45, %v3438_v26  ;;  %v2748_v47 = vld [vmem:[#allocation2 + $0x528] sm:$0xff]  ;;  %v2749_v49 = vld [vmem:[#allocation2 + $0x530] sm:$0xff] }
 0x419   :  { %2157 = vst [vmem:[#allocation7 + $0x638] sm:$0xff] %v1645_v51  ;;  %2158 = vst [vmem:[#allocation7 + $0x640] sm:$0xff] %v1646_v53  ;;  %v1611_v48 = vmul.f32 %v2748_v47, %v3438_v26  ;;  %v1612_v50 = vmul.f32 %v2749_v49, %v3438_v26  ;;  %v2750_v51 = vld [vmem:[#allocation2 + $0x538] sm:$0xff]  ;;  %v2751_v53 = vld [vmem:[#allocation2 + $0x540] sm:$0xff] }
 0x41a   :  { %2159 = vst [vmem:[#allocation7 + $0x648] sm:$0xff] %v1647_v55  ;;  %2160 = vst [vmem:[#allocation7 + $0x650] sm:$0xff] %v1648_v57  ;;  %v1613_v52 = vmul.f32 %v2750_v51, %v3438_v26  ;;  %v1614_v54 = vmul.f32 %v2751_v53, %v3438_v26  ;;  %v2752_v55 = vld [vmem:[#allocation2 + $0x548] sm:$0xff]  ;;  %v2753_v57 = vld [vmem:[#allocation2 + $0x550] sm:$0xff] }
 0x41b   :  { %2161 = vst [vmem:[#allocation7 + $0x658] sm:$0xff] %v1649_v59  ;;  %2162 = vst [vmem:[#allocation7 + $0x660] sm:$0xff] %v1650_v61  ;;  %v1615_v56 = vmul.f32 %v2752_v55, %v3438_v26  ;;  %v1616_v58 = vmul.f32 %v2753_v57, %v3438_v26  ;;  %v2754_v59 = vld [vmem:[#allocation2 + $0x558] sm:$0xff]  ;;  %v2755_v61 = vld [vmem:[#allocation2 + $0x560] sm:$0xff] }
 0x41c   :  { %2163 = vst [vmem:[#allocation7 + $0x668] sm:$0xff] %v1651_v63  ;;  %2164 = vst [vmem:[#allocation7 + $0x670] sm:$0xff] %v1652_v1  ;;  %v1617_v60 = vmul.f32 %v2754_v59, %v3438_v26  ;;  %v1618_v62 = vmul.f32 %v2755_v61, %v3438_v26  ;;  %v2756_v63 = vld [vmem:[#allocation2 + $0x568] sm:$0xff]  ;;  %v2757_v1 = vld [vmem:[#allocation2 + $0x570] sm:$0xff] }
 0x41d   :  { %2165 = vst [vmem:[#allocation7 + $0x678] sm:$0xff] %v1653_v10  ;;  %2166 = vst [vmem:[#allocation7 + $0x680] sm:$0xff] %v1654_v4  ;;  %v1619_v0 = vmul.f32 %v2756_v63, %v3438_v26  ;;  %v1620_v2 = vmul.f32 %v2757_v1, %v3438_v26  ;;  %v2758_v10 = vld [vmem:[#allocation2 + $0x578] sm:$0xff]  ;;  %v2759_v4 = vld [vmem:[#allocation2 + $0x580] sm:$0xff] }
 0x41e   :  { %2167 = vst [vmem:[#allocation7 + $0x688] sm:$0xff] %v1655_v6  ;;  %2168 = vst [vmem:[#allocation7 + $0x690] sm:$0xff] %v1656_v8  ;;  %v1621_v3 = vmul.f32 %v2758_v10, %v3438_v26  ;;  %v1622_v5 = vmul.f32 %v2759_v4, %v3438_v26  ;;  %v2760_v6 = vld [vmem:[#allocation2 + $0x588] sm:$0xff]  ;;  %v2761_v8 = vld [vmem:[#allocation2 + $0x590] sm:$0xff] }
 0x41f   :  { %2169 = vst [vmem:[#allocation7 + $0x698] sm:$0xff] %v1657_v11  ;;  %2170 = vst [vmem:[#allocation7 + $0x6a0] sm:$0xff] %v1658_v14  ;;  %v1623_v7 = vmul.f32 %v2760_v6, %v3438_v26  ;;  %v1624_v9 = vmul.f32 %v2761_v8, %v3438_v26  ;;  %v2762_v11 = vld [vmem:[#allocation2 + $0x598] sm:$0xff]  ;;  %v2763_v14 = vld [vmem:[#allocation2 + $0x5a0] sm:$0xff] }
 0x420   :  { %2171 = vst [vmem:[#allocation7 + $0x6a8] sm:$0xff] %v1659_v17  ;;  %2172 = vst [vmem:[#allocation7 + $0x6b0] sm:$0xff] %v1660_v21  ;;  %v1625_v13 = vmul.f32 %v2762_v11, %v3438_v26  ;;  %v1626_v15 = vmul.f32 %v2763_v14, %v3438_v26  ;;  %v2764_v17 = vld [vmem:[#allocation2 + $0x5a8] sm:$0xff]  ;;  %v2765_v21 = vld [vmem:[#allocation2 + $0x5b0] sm:$0xff] }
 0x421   :  { %2173 = vst [vmem:[#allocation7 + $0x6b8] sm:$0xff] %v1661_v25  ;;  %2174 = vst [vmem:[#allocation7 + $0x6c0] sm:$0xff] %v1662_v28  ;;  %v1627_v19 = vmul.f32 %v2764_v17, %v3438_v26  ;;  %v1628_v23 = vmul.f32 %v2765_v21, %v3438_v26  ;;  %v2766_v25 = vld [vmem:[#allocation2 + $0x5b8] sm:$0xff]  ;;  %v3472_v28 = vpop.permute.xlu0 %1416  ;;  %v2767_v29 = vld [vmem:[#allocation2 + $0x5c0] sm:$0xff] }
 0x422   :  { %2175 = vst [vmem:[#allocation7 + $0x6c8] sm:$0xff] %v1663_v30  ;;  %2176 = vst [vmem:[#allocation7 + $0x6d0] sm:$0xff] %v1664_v33  ;;  %v1629_v27 = vmul.f32 %v2766_v25, %v3438_v26  ;;  %v1630_v30 = vmul.f32 %v2767_v29, %v3438_v26  ;;  %v2768_v32 = vld [vmem:[#allocation2 + $0x5c8] sm:$0xff]  ;;  %v2769_v34 = vld [vmem:[#allocation2 + $0x5d0] sm:$0xff] }
 0x423   :  { %2177 = vst [vmem:[#allocation7 + $0x6d8] sm:$0xff] %v1665_v12  ;;  %2178 = vst [vmem:[#allocation7 + $0x6e0] sm:$0xff] %v1666_v36  ;;  %v1631_v33 = vmul.f32 %v2768_v32, %v3438_v26  ;;  %v1632_v12 = vmul.f32 %v2769_v34, %v3438_v26  ;;  %v2770_v35 = vld [vmem:[#allocation2 + $0x5d8] sm:$0xff]  ;;  %v2771_v37 = vld [vmem:[#allocation2 + $0x5e0] sm:$0xff] }
 0x424   :  { %2179 = vst [vmem:[#allocation7 + $0x6e8] sm:$0xff] %v1667_v38  ;;  %2180 = vst [vmem:[#allocation7 + $0x6f0] sm:$0xff] %v1668_v31  ;;  %v1633_v36 = vmul.f32 %v2770_v35, %v3438_v26  ;;  %v1634_v38 = vmul.f32 %v2771_v37, %v3438_v26  ;;  %v2772_v39 = vld [vmem:[#allocation2 + $0x5e8] sm:$0xff]  ;;  %v2773_v40 = vld [vmem:[#allocation2 + $0x5f0] sm:$0xff] }
 0x425   :  { %2181 = vst [vmem:[#allocation7 + $0x6f8] sm:$0xff] %v1669_v16  ;;  %2118 = vst [vmem:[#allocation7 + $0x500] sm:$0xff] %v1606_v18  ;;  %v1635_v31 = vmul.f32 %v2772_v39, %v3438_v26  ;;  %v1636_v16 = vmul.f32 %v2773_v40, %v3438_v26  ;;  %v2774_v41 = vld [vmem:[#allocation2 + $0x5f8] sm:$0xff]  ;;  %v2775_v42 = vld [vmem:[#allocation2 + $0x800] sm:$0xff] }
 0x426   :  { %2119 = vst [vmem:[#allocation7 + $0x508] sm:$0xff] %v1607_v20  ;;  %2120 = vst [vmem:[#allocation7 + $0x510] sm:$0xff] %v1608_v22  ;;  %v1637_v18 = vmul.f32 %v2774_v41, %v3438_v26  ;;  %v1702_v20 = vmul.f32 %v2775_v42, %v3472_v28  ;;  %v2776_v43 = vld [vmem:[#allocation2 + $0x808] sm:$0xff]  ;;  %v2777_v44 = vld [vmem:[#allocation2 + $0x810] sm:$0xff] }
 0x427   :  { %2121 = vst [vmem:[#allocation7 + $0x518] sm:$0xff] %v1609_v24  ;;  %2122 = vst [vmem:[#allocation7 + $0x520] sm:$0xff] %v1610_v46  ;;  %v1703_v22 = vmul.f32 %v2776_v43, %v3472_v28  ;;  %v1704_v24 = vmul.f32 %v2777_v44, %v3472_v28  ;;  %v2778_v45 = vld [vmem:[#allocation2 + $0x818] sm:$0xff]  ;;  %v2779_v46 = vld [vmem:[#allocation2 + $0x820] sm:$0xff] }
 0x428   :  { %2123 = vst [vmem:[#allocation7 + $0x528] sm:$0xff] %v1611_v48  ;;  %2124 = vst [vmem:[#allocation7 + $0x530] sm:$0xff] %v1612_v50  ;;  %v1705_v26 = vmul.f32 %v2778_v45, %v3472_v28  ;;  %v1706_v47 = vmul.f32 %v2779_v46, %v3472_v28  ;;  %v2780_v48 = vld [vmem:[#allocation2 + $0x828] sm:$0xff]  ;;  %v2781_v50 = vld [vmem:[#allocation2 + $0x830] sm:$0xff] }
 0x429   :  { %2125 = vst [vmem:[#allocation7 + $0x538] sm:$0xff] %v1613_v52  ;;  %2126 = vst [vmem:[#allocation7 + $0x540] sm:$0xff] %v1614_v54  ;;  %v1707_v49 = vmul.f32 %v2780_v48, %v3472_v28  ;;  %v1708_v51 = vmul.f32 %v2781_v50, %v3472_v28  ;;  %v2782_v52 = vld [vmem:[#allocation2 + $0x838] sm:$0xff]  ;;  %v2783_v54 = vld [vmem:[#allocation2 + $0x840] sm:$0xff] }
 0x42a   :  { %2127 = vst [vmem:[#allocation7 + $0x548] sm:$0xff] %v1615_v56  ;;  %2128 = vst [vmem:[#allocation7 + $0x550] sm:$0xff] %v1616_v58  ;;  %v1709_v53 = vmul.f32 %v2782_v52, %v3472_v28  ;;  %v1710_v55 = vmul.f32 %v2783_v54, %v3472_v28  ;;  %v2784_v56 = vld [vmem:[#allocation2 + $0x848] sm:$0xff]  ;;  %v2785_v58 = vld [vmem:[#allocation2 + $0x850] sm:$0xff] }
 0x42b   :  { %2129 = vst [vmem:[#allocation7 + $0x558] sm:$0xff] %v1617_v60  ;;  %2130 = vst [vmem:[#allocation7 + $0x560] sm:$0xff] %v1618_v62  ;;  %v1711_v57 = vmul.f32 %v2784_v56, %v3472_v28  ;;  %v1712_v59 = vmul.f32 %v2785_v58, %v3472_v28  ;;  %v2786_v60 = vld [vmem:[#allocation2 + $0x858] sm:$0xff]  ;;  %v2787_v62 = vld [vmem:[#allocation2 + $0x860] sm:$0xff] }
 0x42c   :  { %2131 = vst [vmem:[#allocation7 + $0x568] sm:$0xff] %v1619_v0  ;;  %2132 = vst [vmem:[#allocation7 + $0x570] sm:$0xff] %v1620_v2  ;;  %v1713_v61 = vmul.f32 %v2786_v60, %v3472_v28  ;;  %v1714_v63 = vmul.f32 %v2787_v62, %v3472_v28  ;;  %v2788_v0 = vld [vmem:[#allocation2 + $0x868] sm:$0xff]  ;;  %v2789_v2 = vld [vmem:[#allocation2 + $0x870] sm:$0xff] }
 0x42d   :  { %2133 = vst [vmem:[#allocation7 + $0x578] sm:$0xff] %v1621_v3  ;;  %2134 = vst [vmem:[#allocation7 + $0x580] sm:$0xff] %v1622_v5  ;;  %v1715_v1 = vmul.f32 %v2788_v0, %v3472_v28  ;;  %v1716_v10 = vmul.f32 %v2789_v2, %v3472_v28  ;;  %v2790_v3 = vld [vmem:[#allocation2 + $0x878] sm:$0xff]  ;;  %v2791_v5 = vld [vmem:[#allocation2 + $0x880] sm:$0xff] }
 0x42e   :  { %2135 = vst [vmem:[#allocation7 + $0x588] sm:$0xff] %v1623_v7  ;;  %2136 = vst [vmem:[#allocation7 + $0x590] sm:$0xff] %v1624_v9  ;;  %v1717_v4 = vmul.f32 %v2790_v3, %v3472_v28  ;;  %v1718_v6 = vmul.f32 %v2791_v5, %v3472_v28  ;;  %v2792_v7 = vld [vmem:[#allocation2 + $0x888] sm:$0xff]  ;;  %v2793_v9 = vld [vmem:[#allocation2 + $0x890] sm:$0xff] }
 0x42f   :  { %2137 = vst [vmem:[#allocation7 + $0x598] sm:$0xff] %v1625_v13  ;;  %2138 = vst [vmem:[#allocation7 + $0x5a0] sm:$0xff] %v1626_v15  ;;  %v1719_v8 = vmul.f32 %v2792_v7, %v3472_v28  ;;  %v1720_v11 = vmul.f32 %v2793_v9, %v3472_v28  ;;  %v2794_v13 = vld [vmem:[#allocation2 + $0x898] sm:$0xff]  ;;  %v2795_v15 = vld [vmem:[#allocation2 + $0x8a0] sm:$0xff] }
 0x430   :  { %2139 = vst [vmem:[#allocation7 + $0x5a8] sm:$0xff] %v1627_v19  ;;  %2140 = vst [vmem:[#allocation7 + $0x5b0] sm:$0xff] %v1628_v23  ;;  %v1721_v14 = vmul.f32 %v2794_v13, %v3472_v28  ;;  %v1722_v17 = vmul.f32 %v2795_v15, %v3472_v28  ;;  %v2796_v19 = vld [vmem:[#allocation2 + $0x8a8] sm:$0xff]  ;;  %v2797_v23 = vld [vmem:[#allocation2 + $0x8b0] sm:$0xff] }
 0x431   :  { %2141 = vst [vmem:[#allocation7 + $0x5b8] sm:$0xff] %v1629_v27  ;;  %2142 = vst [vmem:[#allocation7 + $0x5c0] sm:$0xff] %v1630_v30  ;;  %v1723_v21 = vmul.f32 %v2796_v19, %v3472_v28  ;;  %v1724_v25 = vmul.f32 %v2797_v23, %v3472_v28  ;;  %v2798_v27 = vld [vmem:[#allocation2 + $0x8b8] sm:$0xff]  ;;  %v3506_v30 = vpop.permute.xlu1 %1409  ;;  %v2799_v32 = vld [vmem:[#allocation2 + $0x8c0] sm:$0xff] }
 0x432   :  { %2143 = vst [vmem:[#allocation7 + $0x5c8] sm:$0xff] %v1631_v33  ;;  %2144 = vst [vmem:[#allocation7 + $0x5d0] sm:$0xff] %v1632_v12  ;;  %v1725_v29 = vmul.f32 %v2798_v27, %v3472_v28  ;;  %v1726_v33 = vmul.f32 %v2799_v32, %v3472_v28  ;;  %v2800_v34 = vld [vmem:[#allocation2 + $0x8c8] sm:$0xff]  ;;  %v2801_v35 = vld [vmem:[#allocation2 + $0x8d0] sm:$0xff] }
 0x433   :  { %2145 = vst [vmem:[#allocation7 + $0x5d8] sm:$0xff] %v1633_v36  ;;  %2146 = vst [vmem:[#allocation7 + $0x5e0] sm:$0xff] %v1634_v38  ;;  %v1727_v12 = vmul.f32 %v2800_v34, %v3472_v28  ;;  %v1728_v36 = vmul.f32 %v2801_v35, %v3472_v28  ;;  %v2802_v37 = vld [vmem:[#allocation2 + $0x8d8] sm:$0xff]  ;;  %v2803_v39 = vld [vmem:[#allocation2 + $0x8e0] sm:$0xff] }
 0x434   :  { %2147 = vst [vmem:[#allocation7 + $0x5e8] sm:$0xff] %v1635_v31  ;;  %2148 = vst [vmem:[#allocation7 + $0x5f0] sm:$0xff] %v1636_v16  ;;  %v1729_v38 = vmul.f32 %v2802_v37, %v3472_v28  ;;  %v1730_v31 = vmul.f32 %v2803_v39, %v3472_v28  ;;  %v2804_v40 = vld [vmem:[#allocation2 + $0x8e8] sm:$0xff]  ;;  %v2805_v41 = vld [vmem:[#allocation2 + $0x8f0] sm:$0xff] }
 0x435   :  { %2149 = vst [vmem:[#allocation7 + $0x5f8] sm:$0xff] %v1637_v18  ;;  %2214 = vst [vmem:[#allocation7 + $0x800] sm:$0xff] %v1702_v20  ;;  %v1731_v16 = vmul.f32 %v2804_v40, %v3472_v28  ;;  %v1732_v18 = vmul.f32 %v2805_v41, %v3472_v28  ;;  %v2806_v42 = vld [vmem:[#allocation2 + $0x8f8] sm:$0xff]  ;;  %v2807_v43 = vld [vmem:[#allocation2 + $0x700] sm:$0xff] }
 0x436   :  { %2215 = vst [vmem:[#allocation7 + $0x808] sm:$0xff] %v1703_v22  ;;  %2216 = vst [vmem:[#allocation7 + $0x810] sm:$0xff] %v1704_v24  ;;  %v1733_v20 = vmul.f32 %v2806_v42, %v3472_v28  ;;  %v1670_v22 = vmul.f32 %v2807_v43, %v3506_v30  ;;  %v2808_v44 = vld [vmem:[#allocation2 + $0x708] sm:$0xff]  ;;  %v2809_v45 = vld [vmem:[#allocation2 + $0x710] sm:$0xff] }
 0x437   :  { %2217 = vst [vmem:[#allocation7 + $0x818] sm:$0xff] %v1705_v26  ;;  %2218 = vst [vmem:[#allocation7 + $0x820] sm:$0xff] %v1706_v47  ;;  %v1671_v24 = vmul.f32 %v2808_v44, %v3506_v30  ;;  %v1672_v26 = vmul.f32 %v2809_v45, %v3506_v30  ;;  %v2810_v46 = vld [vmem:[#allocation2 + $0x718] sm:$0xff]  ;;  %v2811_v47 = vld [vmem:[#allocation2 + $0x720] sm:$0xff] }
 0x438   :  { %2219 = vst [vmem:[#allocation7 + $0x828] sm:$0xff] %v1707_v49  ;;  %2220 = vst [vmem:[#allocation7 + $0x830] sm:$0xff] %v1708_v51  ;;  %v1673_v28 = vmul.f32 %v2810_v46, %v3506_v30  ;;  %v1674_v48 = vmul.f32 %v2811_v47, %v3506_v30  ;;  %v2812_v49 = vld [vmem:[#allocation2 + $0x728] sm:$0xff]  ;;  %v2813_v51 = vld [vmem:[#allocation2 + $0x730] sm:$0xff] }
 0x439   :  { %2221 = vst [vmem:[#allocation7 + $0x838] sm:$0xff] %v1709_v53  ;;  %2222 = vst [vmem:[#allocation7 + $0x840] sm:$0xff] %v1710_v55  ;;  %v1675_v50 = vmul.f32 %v2812_v49, %v3506_v30  ;;  %v1676_v52 = vmul.f32 %v2813_v51, %v3506_v30  ;;  %v2814_v53 = vld [vmem:[#allocation2 + $0x738] sm:$0xff]  ;;  %v2815_v55 = vld [vmem:[#allocation2 + $0x740] sm:$0xff] }
 0x43a   :  { %2223 = vst [vmem:[#allocation7 + $0x848] sm:$0xff] %v1711_v57  ;;  %2224 = vst [vmem:[#allocation7 + $0x850] sm:$0xff] %v1712_v59  ;;  %v1677_v54 = vmul.f32 %v2814_v53, %v3506_v30  ;;  %v1678_v56 = vmul.f32 %v2815_v55, %v3506_v30  ;;  %v2816_v57 = vld [vmem:[#allocation2 + $0x748] sm:$0xff]  ;;  %v2817_v59 = vld [vmem:[#allocation2 + $0x750] sm:$0xff] }
 0x43b   :  { %2225 = vst [vmem:[#allocation7 + $0x858] sm:$0xff] %v1713_v61  ;;  %2226 = vst [vmem:[#allocation7 + $0x860] sm:$0xff] %v1714_v63  ;;  %v1679_v58 = vmul.f32 %v2816_v57, %v3506_v30  ;;  %v1680_v60 = vmul.f32 %v2817_v59, %v3506_v30  ;;  %v2818_v61 = vld [vmem:[#allocation2 + $0x758] sm:$0xff]  ;;  %v2819_v63 = vld [vmem:[#allocation2 + $0x760] sm:$0xff] }
 0x43c   :  { %2227 = vst [vmem:[#allocation7 + $0x868] sm:$0xff] %v1715_v1  ;;  %2228 = vst [vmem:[#allocation7 + $0x870] sm:$0xff] %v1716_v10  ;;  %v1681_v62 = vmul.f32 %v2818_v61, %v3506_v30  ;;  %v1682_v0 = vmul.f32 %v2819_v63, %v3506_v30  ;;  %v2820_v1 = vld [vmem:[#allocation2 + $0x768] sm:$0xff]  ;;  %v2821_v10 = vld [vmem:[#allocation2 + $0x770] sm:$0xff] }
 0x43d   :  { %2229 = vst [vmem:[#allocation7 + $0x878] sm:$0xff] %v1717_v4  ;;  %2230 = vst [vmem:[#allocation7 + $0x880] sm:$0xff] %v1718_v6  ;;  %v1683_v2 = vmul.f32 %v2820_v1, %v3506_v30  ;;  %v1684_v3 = vmul.f32 %v2821_v10, %v3506_v30  ;;  %v2822_v4 = vld [vmem:[#allocation2 + $0x778] sm:$0xff]  ;;  %v2823_v6 = vld [vmem:[#allocation2 + $0x780] sm:$0xff] }
 0x43e   :  { %2231 = vst [vmem:[#allocation7 + $0x888] sm:$0xff] %v1719_v8  ;;  %2232 = vst [vmem:[#allocation7 + $0x890] sm:$0xff] %v1720_v11  ;;  %v1685_v5 = vmul.f32 %v2822_v4, %v3506_v30  ;;  %v1686_v7 = vmul.f32 %v2823_v6, %v3506_v30  ;;  %v2824_v8 = vld [vmem:[#allocation2 + $0x788] sm:$0xff]  ;;  %v2825_v11 = vld [vmem:[#allocation2 + $0x790] sm:$0xff] }
 0x43f   :  { %2233 = vst [vmem:[#allocation7 + $0x898] sm:$0xff] %v1721_v14  ;;  %2234 = vst [vmem:[#allocation7 + $0x8a0] sm:$0xff] %v1722_v17  ;;  %v1687_v9 = vmul.f32 %v2824_v8, %v3506_v30  ;;  %v1688_v13 = vmul.f32 %v2825_v11, %v3506_v30  ;;  %v2826_v14 = vld [vmem:[#allocation2 + $0x798] sm:$0xff]  ;;  %v2827_v17 = vld [vmem:[#allocation2 + $0x7a0] sm:$0xff] }
 0x440   :  { %2235 = vst [vmem:[#allocation7 + $0x8a8] sm:$0xff] %v1723_v21  ;;  %2236 = vst [vmem:[#allocation7 + $0x8b0] sm:$0xff] %v1724_v25  ;;  %v1689_v15 = vmul.f32 %v2826_v14, %v3506_v30  ;;  %v1690_v19 = vmul.f32 %v2827_v17, %v3506_v30  ;;  %v2828_v21 = vld [vmem:[#allocation2 + $0x7a8] sm:$0xff]  ;;  %v2829_v25 = vld [vmem:[#allocation2 + $0x7b0] sm:$0xff] }
 0x441   :  { %2237 = vst [vmem:[#allocation7 + $0x8b8] sm:$0xff] %v1725_v29  ;;  %2238 = vst [vmem:[#allocation7 + $0x8c0] sm:$0xff] %v1726_v33  ;;  %v1691_v23 = vmul.f32 %v2828_v21, %v3506_v30  ;;  %v1692_v27 = vmul.f32 %v2829_v25, %v3506_v30  ;;  %v2830_v29 = vld [vmem:[#allocation2 + $0x7b8] sm:$0xff]  ;;  %v3540_v33 = vpop.permute.xlu0 %1424  ;;  %v2831_v34 = vld [vmem:[#allocation2 + $0x7c0] sm:$0xff] }
 0x442   :  { %2239 = vst [vmem:[#allocation7 + $0x8c8] sm:$0xff] %v1727_v12  ;;  %2240 = vst [vmem:[#allocation7 + $0x8d0] sm:$0xff] %v1728_v36  ;;  %v1693_v32 = vmul.f32 %v2830_v29, %v3506_v30  ;;  %v1694_v12 = vmul.f32 %v2831_v34, %v3506_v30  ;;  %v2832_v35 = vld [vmem:[#allocation2 + $0x7c8] sm:$0xff]  ;;  %v2833_v37 = vld [vmem:[#allocation2 + $0x7d0] sm:$0xff] }
 0x443   :  { %2241 = vst [vmem:[#allocation7 + $0x8d8] sm:$0xff] %v1729_v38  ;;  %2242 = vst [vmem:[#allocation7 + $0x8e0] sm:$0xff] %v1730_v31  ;;  %v1695_v36 = vmul.f32 %v2832_v35, %v3506_v30  ;;  %v1696_v38 = vmul.f32 %v2833_v37, %v3506_v30  ;;  %v2834_v39 = vld [vmem:[#allocation2 + $0x7d8] sm:$0xff]  ;;  %v2835_v40 = vld [vmem:[#allocation2 + $0x7e0] sm:$0xff] }
 0x444   :  { %2243 = vst [vmem:[#allocation7 + $0x8e8] sm:$0xff] %v1731_v16  ;;  %2244 = vst [vmem:[#allocation7 + $0x8f0] sm:$0xff] %v1732_v18  ;;  %v1697_v31 = vmul.f32 %v2834_v39, %v3506_v30  ;;  %v1698_v16 = vmul.f32 %v2835_v40, %v3506_v30  ;;  %v2836_v41 = vld [vmem:[#allocation2 + $0x7e8] sm:$0xff]  ;;  %v2837_v42 = vld [vmem:[#allocation2 + $0x7f0] sm:$0xff] }
 0x445   :  { %2245 = vst [vmem:[#allocation7 + $0x8f8] sm:$0xff] %v1733_v20  ;;  %2182 = vst [vmem:[#allocation7 + $0x700] sm:$0xff] %v1670_v22  ;;  %v1699_v18 = vmul.f32 %v2836_v41, %v3506_v30  ;;  %v1700_v20 = vmul.f32 %v2837_v42, %v3506_v30  ;;  %v2838_v43 = vld [vmem:[#allocation2 + $0x7f8] sm:$0xff]  ;;  %v2839_v44 = vld [vmem:[#allocation2 + $0xa00] sm:$0xff] }
 0x446   :  { %2183 = vst [vmem:[#allocation7 + $0x708] sm:$0xff] %v1671_v24  ;;  %2184 = vst [vmem:[#allocation7 + $0x710] sm:$0xff] %v1672_v26  ;;  %v1701_v22 = vmul.f32 %v2838_v43, %v3506_v30  ;;  %v1766_v24 = vmul.f32 %v2839_v44, %v3540_v33  ;;  %v2840_v45 = vld [vmem:[#allocation2 + $0xa08] sm:$0xff]  ;;  %v2841_v46 = vld [vmem:[#allocation2 + $0xa10] sm:$0xff] }
 0x447   :  { %2185 = vst [vmem:[#allocation7 + $0x718] sm:$0xff] %v1673_v28  ;;  %2186 = vst [vmem:[#allocation7 + $0x720] sm:$0xff] %v1674_v48  ;;  %v1767_v26 = vmul.f32 %v2840_v45, %v3540_v33  ;;  %v1768_v28 = vmul.f32 %v2841_v46, %v3540_v33  ;;  %v2842_v47 = vld [vmem:[#allocation2 + $0xa18] sm:$0xff]  ;;  %v2843_v48 = vld [vmem:[#allocation2 + $0xa20] sm:$0xff] }
 0x448   :  { %2187 = vst [vmem:[#allocation7 + $0x728] sm:$0xff] %v1675_v50  ;;  %2188 = vst [vmem:[#allocation7 + $0x730] sm:$0xff] %v1676_v52  ;;  %v1769_v30 = vmul.f32 %v2842_v47, %v3540_v33  ;;  %v1770_v49 = vmul.f32 %v2843_v48, %v3540_v33  ;;  %v2844_v50 = vld [vmem:[#allocation2 + $0xa28] sm:$0xff]  ;;  %v2845_v52 = vld [vmem:[#allocation2 + $0xa30] sm:$0xff] }
 0x449   :  { %2189 = vst [vmem:[#allocation7 + $0x738] sm:$0xff] %v1677_v54  ;;  %2190 = vst [vmem:[#allocation7 + $0x740] sm:$0xff] %v1678_v56  ;;  %v1771_v51 = vmul.f32 %v2844_v50, %v3540_v33  ;;  %v1772_v53 = vmul.f32 %v2845_v52, %v3540_v33  ;;  %v2846_v54 = vld [vmem:[#allocation2 + $0xa38] sm:$0xff]  ;;  %v2847_v56 = vld [vmem:[#allocation2 + $0xa40] sm:$0xff] }
 0x44a   :  { %2191 = vst [vmem:[#allocation7 + $0x748] sm:$0xff] %v1679_v58  ;;  %2192 = vst [vmem:[#allocation7 + $0x750] sm:$0xff] %v1680_v60  ;;  %v1773_v55 = vmul.f32 %v2846_v54, %v3540_v33  ;;  %v1774_v57 = vmul.f32 %v2847_v56, %v3540_v33  ;;  %v2848_v58 = vld [vmem:[#allocation2 + $0xa48] sm:$0xff]  ;;  %v2849_v60 = vld [vmem:[#allocation2 + $0xa50] sm:$0xff] }
 0x44b   :  { %2193 = vst [vmem:[#allocation7 + $0x758] sm:$0xff] %v1681_v62  ;;  %2194 = vst [vmem:[#allocation7 + $0x760] sm:$0xff] %v1682_v0  ;;  %v1775_v59 = vmul.f32 %v2848_v58, %v3540_v33  ;;  %v1776_v61 = vmul.f32 %v2849_v60, %v3540_v33  ;;  %v2850_v62 = vld [vmem:[#allocation2 + $0xa58] sm:$0xff]  ;;  %v2851_v0 = vld [vmem:[#allocation2 + $0xa60] sm:$0xff] }
 0x44c   :  { %2195 = vst [vmem:[#allocation7 + $0x768] sm:$0xff] %v1683_v2  ;;  %2196 = vst [vmem:[#allocation7 + $0x770] sm:$0xff] %v1684_v3  ;;  %v1777_v63 = vmul.f32 %v2850_v62, %v3540_v33  ;;  %v1778_v1 = vmul.f32 %v2851_v0, %v3540_v33  ;;  %v2852_v2 = vld [vmem:[#allocation2 + $0xa68] sm:$0xff]  ;;  %v2853_v3 = vld [vmem:[#allocation2 + $0xa70] sm:$0xff] }
 0x44d   :  { %2197 = vst [vmem:[#allocation7 + $0x778] sm:$0xff] %v1685_v5  ;;  %2198 = vst [vmem:[#allocation7 + $0x780] sm:$0xff] %v1686_v7  ;;  %v1779_v10 = vmul.f32 %v2852_v2, %v3540_v33  ;;  %v1780_v4 = vmul.f32 %v2853_v3, %v3540_v33  ;;  %v2854_v5 = vld [vmem:[#allocation2 + $0xa78] sm:$0xff]  ;;  %v2855_v7 = vld [vmem:[#allocation2 + $0xa80] sm:$0xff] }
 0x44e   :  { %2199 = vst [vmem:[#allocation7 + $0x788] sm:$0xff] %v1687_v9  ;;  %2200 = vst [vmem:[#allocation7 + $0x790] sm:$0xff] %v1688_v13  ;;  %v1781_v6 = vmul.f32 %v2854_v5, %v3540_v33  ;;  %v1782_v8 = vmul.f32 %v2855_v7, %v3540_v33  ;;  %v2856_v9 = vld [vmem:[#allocation2 + $0xa88] sm:$0xff]  ;;  %v2857_v13 = vld [vmem:[#allocation2 + $0xa90] sm:$0xff] }
 0x44f   :  { %2201 = vst [vmem:[#allocation7 + $0x798] sm:$0xff] %v1689_v15  ;;  %2202 = vst [vmem:[#allocation7 + $0x7a0] sm:$0xff] %v1690_v19  ;;  %v1783_v11 = vmul.f32 %v2856_v9, %v3540_v33  ;;  %v1784_v14 = vmul.f32 %v2857_v13, %v3540_v33  ;;  %v2858_v15 = vld [vmem:[#allocation2 + $0xa98] sm:$0xff]  ;;  %v2859_v19 = vld [vmem:[#allocation2 + $0xaa0] sm:$0xff] }
 0x450   :  { %2203 = vst [vmem:[#allocation7 + $0x7a8] sm:$0xff] %v1691_v23  ;;  %2204 = vst [vmem:[#allocation7 + $0x7b0] sm:$0xff] %v1692_v27  ;;  %v1785_v17 = vmul.f32 %v2858_v15, %v3540_v33  ;;  %v1786_v21 = vmul.f32 %v2859_v19, %v3540_v33  ;;  %v2860_v23 = vld [vmem:[#allocation2 + $0xaa8] sm:$0xff]  ;;  %v2861_v27 = vld [vmem:[#allocation2 + $0xab0] sm:$0xff] }
 0x451   :  { %2205 = vst [vmem:[#allocation7 + $0x7b8] sm:$0xff] %v1693_v32  ;;  %2206 = vst [vmem:[#allocation7 + $0x7c0] sm:$0xff] %v1694_v12  ;;  %v1787_v25 = vmul.f32 %v2860_v23, %v3540_v33  ;;  %v1788_v29 = vmul.f32 %v2861_v27, %v3540_v33  ;;  %v2862_v32 = vld [vmem:[#allocation2 + $0xab8] sm:$0xff]  ;;  %v3574_v12 = vpop.permute.xlu1 %1420  ;;  %v2863_v35 = vld [vmem:[#allocation2 + $0xac0] sm:$0xff] }
 0x452   :  { %2207 = vst [vmem:[#allocation7 + $0x7c8] sm:$0xff] %v1695_v36  ;;  %2208 = vst [vmem:[#allocation7 + $0x7d0] sm:$0xff] %v1696_v38  ;;  %v1789_v34 = vmul.f32 %v2862_v32, %v3540_v33  ;;  %v1790_v36 = vmul.f32 %v2863_v35, %v3540_v33  ;;  %v2864_v37 = vld [vmem:[#allocation2 + $0xac8] sm:$0xff]  ;;  %v2865_v39 = vld [vmem:[#allocation2 + $0xad0] sm:$0xff] }
 0x453   :  { %2209 = vst [vmem:[#allocation7 + $0x7d8] sm:$0xff] %v1697_v31  ;;  %2210 = vst [vmem:[#allocation7 + $0x7e0] sm:$0xff] %v1698_v16  ;;  %v1791_v38 = vmul.f32 %v2864_v37, %v3540_v33  ;;  %v1792_v31 = vmul.f32 %v2865_v39, %v3540_v33  ;;  %v2866_v40 = vld [vmem:[#allocation2 + $0xad8] sm:$0xff]  ;;  %v2867_v41 = vld [vmem:[#allocation2 + $0xae0] sm:$0xff] }
 0x454   :  { %2211 = vst [vmem:[#allocation7 + $0x7e8] sm:$0xff] %v1699_v18  ;;  %2212 = vst [vmem:[#allocation7 + $0x7f0] sm:$0xff] %v1700_v20  ;;  %v1793_v16 = vmul.f32 %v2866_v40, %v3540_v33  ;;  %v1794_v18 = vmul.f32 %v2867_v41, %v3540_v33  ;;  %v2868_v42 = vld [vmem:[#allocation2 + $0xae8] sm:$0xff]  ;;  %v2869_v43 = vld [vmem:[#allocation2 + $0xaf0] sm:$0xff] }
 0x455   :  { %2213 = vst [vmem:[#allocation7 + $0x7f8] sm:$0xff] %v1701_v22  ;;  %2278 = vst [vmem:[#allocation7 + $0xa00] sm:$0xff] %v1766_v24  ;;  %v1795_v20 = vmul.f32 %v2868_v42, %v3540_v33  ;;  %v1796_v22 = vmul.f32 %v2869_v43, %v3540_v33  ;;  %v2870_v44 = vld [vmem:[#allocation2 + $0xaf8] sm:$0xff]  ;;  %v2871_v45 = vld [vmem:[#allocation2 + $0x900] sm:$0xff] }
 0x456   :  { %2279 = vst [vmem:[#allocation7 + $0xa08] sm:$0xff] %v1767_v26  ;;  %2280 = vst [vmem:[#allocation7 + $0xa10] sm:$0xff] %v1768_v28  ;;  %v1797_v24 = vmul.f32 %v2870_v44, %v3540_v33  ;;  %v1734_v26 = vmul.f32 %v2871_v45, %v3574_v12  ;;  %v2872_v46 = vld [vmem:[#allocation2 + $0x908] sm:$0xff]  ;;  %v2873_v47 = vld [vmem:[#allocation2 + $0x910] sm:$0xff] }
 0x457   :  { %2281 = vst [vmem:[#allocation7 + $0xa18] sm:$0xff] %v1769_v30  ;;  %2282 = vst [vmem:[#allocation7 + $0xa20] sm:$0xff] %v1770_v49  ;;  %v1735_v28 = vmul.f32 %v2872_v46, %v3574_v12  ;;  %v1736_v30 = vmul.f32 %v2873_v47, %v3574_v12  ;;  %v2874_v48 = vld [vmem:[#allocation2 + $0x918] sm:$0xff]  ;;  %v2875_v49 = vld [vmem:[#allocation2 + $0x920] sm:$0xff] }
 0x458   :  { %2283 = vst [vmem:[#allocation7 + $0xa28] sm:$0xff] %v1771_v51  ;;  %2284 = vst [vmem:[#allocation7 + $0xa30] sm:$0xff] %v1772_v53  ;;  %v1737_v33 = vmul.f32 %v2874_v48, %v3574_v12  ;;  %v1738_v50 = vmul.f32 %v2875_v49, %v3574_v12  ;;  %v2876_v51 = vld [vmem:[#allocation2 + $0x928] sm:$0xff]  ;;  %v2877_v53 = vld [vmem:[#allocation2 + $0x930] sm:$0xff] }
 0x459   :  { %2285 = vst [vmem:[#allocation7 + $0xa38] sm:$0xff] %v1773_v55  ;;  %2286 = vst [vmem:[#allocation7 + $0xa40] sm:$0xff] %v1774_v57  ;;  %v1739_v52 = vmul.f32 %v2876_v51, %v3574_v12  ;;  %v1740_v54 = vmul.f32 %v2877_v53, %v3574_v12  ;;  %v2878_v55 = vld [vmem:[#allocation2 + $0x938] sm:$0xff]  ;;  %v2879_v57 = vld [vmem:[#allocation2 + $0x940] sm:$0xff] }
 0x45a   :  { %2287 = vst [vmem:[#allocation7 + $0xa48] sm:$0xff] %v1775_v59  ;;  %2288 = vst [vmem:[#allocation7 + $0xa50] sm:$0xff] %v1776_v61  ;;  %v1741_v56 = vmul.f32 %v2878_v55, %v3574_v12  ;;  %v1742_v58 = vmul.f32 %v2879_v57, %v3574_v12  ;;  %v2880_v59 = vld [vmem:[#allocation2 + $0x948] sm:$0xff]  ;;  %v2881_v61 = vld [vmem:[#allocation2 + $0x950] sm:$0xff] }
 0x45b   :  { %2289 = vst [vmem:[#allocation7 + $0xa58] sm:$0xff] %v1777_v63  ;;  %2290 = vst [vmem:[#allocation7 + $0xa60] sm:$0xff] %v1778_v1  ;;  %v1743_v60 = vmul.f32 %v2880_v59, %v3574_v12  ;;  %v1744_v62 = vmul.f32 %v2881_v61, %v3574_v12  ;;  %v2882_v63 = vld [vmem:[#allocation2 + $0x958] sm:$0xff]  ;;  %v2883_v1 = vld [vmem:[#allocation2 + $0x960] sm:$0xff] }
 0x45c   :  { %2291 = vst [vmem:[#allocation7 + $0xa68] sm:$0xff] %v1779_v10  ;;  %2292 = vst [vmem:[#allocation7 + $0xa70] sm:$0xff] %v1780_v4  ;;  %v1745_v0 = vmul.f32 %v2882_v63, %v3574_v12  ;;  %v1746_v2 = vmul.f32 %v2883_v1, %v3574_v12  ;;  %v2884_v10 = vld [vmem:[#allocation2 + $0x968] sm:$0xff]  ;;  %v2885_v4 = vld [vmem:[#allocation2 + $0x970] sm:$0xff] }
 0x45d   :  { %2293 = vst [vmem:[#allocation7 + $0xa78] sm:$0xff] %v1781_v6  ;;  %2294 = vst [vmem:[#allocation7 + $0xa80] sm:$0xff] %v1782_v8  ;;  %v1747_v3 = vmul.f32 %v2884_v10, %v3574_v12  ;;  %v1748_v5 = vmul.f32 %v2885_v4, %v3574_v12  ;;  %v2886_v6 = vld [vmem:[#allocation2 + $0x978] sm:$0xff]  ;;  %v2887_v8 = vld [vmem:[#allocation2 + $0x980] sm:$0xff] }
 0x45e   :  { %2295 = vst [vmem:[#allocation7 + $0xa88] sm:$0xff] %v1783_v11  ;;  %2296 = vst [vmem:[#allocation7 + $0xa90] sm:$0xff] %v1784_v14  ;;  %v1749_v7 = vmul.f32 %v2886_v6, %v3574_v12  ;;  %v1750_v9 = vmul.f32 %v2887_v8, %v3574_v12  ;;  %v2888_v11 = vld [vmem:[#allocation2 + $0x988] sm:$0xff]  ;;  %v2889_v14 = vld [vmem:[#allocation2 + $0x990] sm:$0xff] }
 0x45f   :  { %2297 = vst [vmem:[#allocation7 + $0xa98] sm:$0xff] %v1785_v17  ;;  %2298 = vst [vmem:[#allocation7 + $0xaa0] sm:$0xff] %v1786_v21  ;;  %v1751_v13 = vmul.f32 %v2888_v11, %v3574_v12  ;;  %v1752_v15 = vmul.f32 %v2889_v14, %v3574_v12  ;;  %v2890_v17 = vld [vmem:[#allocation2 + $0x998] sm:$0xff]  ;;  %v2891_v21 = vld [vmem:[#allocation2 + $0x9a0] sm:$0xff] }
 0x460   :  { %2299 = vst [vmem:[#allocation7 + $0xaa8] sm:$0xff] %v1787_v25  ;;  %2300 = vst [vmem:[#allocation7 + $0xab0] sm:$0xff] %v1788_v29  ;;  %v1753_v19 = vmul.f32 %v2890_v17, %v3574_v12  ;;  %v1754_v23 = vmul.f32 %v2891_v21, %v3574_v12  ;;  %v2892_v25 = vld [vmem:[#allocation2 + $0x9a8] sm:$0xff]  ;;  %v2893_v29 = vld [vmem:[#allocation2 + $0x9b0] sm:$0xff] }
 0x461   :  { %2301 = vst [vmem:[#allocation7 + $0xab8] sm:$0xff] %v1789_v34  ;;  %2302 = vst [vmem:[#allocation7 + $0xac0] sm:$0xff] %v1790_v36  ;;  %v1755_v27 = vmul.f32 %v2892_v25, %v3574_v12  ;;  %v1756_v32 = vmul.f32 %v2893_v29, %v3574_v12  ;;  %v2894_v34 = vld [vmem:[#allocation2 + $0x9b8] sm:$0xff]  ;;  %v3608_v36 = vpop.permute.xlu0 %1432  ;;  %v2895_v37 = vld [vmem:[#allocation2 + $0x9c0] sm:$0xff] }
 0x462   :  { %2303 = vst [vmem:[#allocation7 + $0xac8] sm:$0xff] %v1791_v38  ;;  %2304 = vst [vmem:[#allocation7 + $0xad0] sm:$0xff] %v1792_v31  ;;  %v1757_v35 = vmul.f32 %v2894_v34, %v3574_v12  ;;  %v1758_v38 = vmul.f32 %v2895_v37, %v3574_v12  ;;  %v2896_v39 = vld [vmem:[#allocation2 + $0x9c8] sm:$0xff]  ;;  %v2897_v40 = vld [vmem:[#allocation2 + $0x9d0] sm:$0xff] }
 0x463   :  { %2305 = vst [vmem:[#allocation7 + $0xad8] sm:$0xff] %v1793_v16  ;;  %2306 = vst [vmem:[#allocation7 + $0xae0] sm:$0xff] %v1794_v18  ;;  %v1759_v31 = vmul.f32 %v2896_v39, %v3574_v12  ;;  %v1760_v16 = vmul.f32 %v2897_v40, %v3574_v12  ;;  %v2898_v41 = vld [vmem:[#allocation2 + $0x9d8] sm:$0xff]  ;;  %v2899_v42 = vld [vmem:[#allocation2 + $0x9e0] sm:$0xff] }
 0x464   :  { %2307 = vst [vmem:[#allocation7 + $0xae8] sm:$0xff] %v1795_v20  ;;  %2308 = vst [vmem:[#allocation7 + $0xaf0] sm:$0xff] %v1796_v22  ;;  %v1761_v18 = vmul.f32 %v2898_v41, %v3574_v12  ;;  %v1762_v20 = vmul.f32 %v2899_v42, %v3574_v12  ;;  %v2900_v43 = vld [vmem:[#allocation2 + $0x9e8] sm:$0xff]  ;;  %v2901_v44 = vld [vmem:[#allocation2 + $0x9f0] sm:$0xff] }
 0x465   :  { %2309 = vst [vmem:[#allocation7 + $0xaf8] sm:$0xff] %v1797_v24  ;;  %2246 = vst [vmem:[#allocation7 + $0x900] sm:$0xff] %v1734_v26  ;;  %v1763_v22 = vmul.f32 %v2900_v43, %v3574_v12  ;;  %v1764_v24 = vmul.f32 %v2901_v44, %v3574_v12  ;;  %v2902_v45 = vld [vmem:[#allocation2 + $0x9f8] sm:$0xff]  ;;  %v2903_v46 = vld [vmem:[#allocation2 + $0xc00] sm:$0xff] }
 0x466   :  { %2247 = vst [vmem:[#allocation7 + $0x908] sm:$0xff] %v1735_v28  ;;  %2248 = vst [vmem:[#allocation7 + $0x910] sm:$0xff] %v1736_v30  ;;  %v1765_v26 = vmul.f32 %v2902_v45, %v3574_v12  ;;  %v1830_v28 = vmul.f32 %v2903_v46, %v3608_v36  ;;  %v2904_v47 = vld [vmem:[#allocation2 + $0xc08] sm:$0xff]  ;;  %v2905_v48 = vld [vmem:[#allocation2 + $0xc10] sm:$0xff] }
 0x467   :  { %2249 = vst [vmem:[#allocation7 + $0x918] sm:$0xff] %v1737_v33  ;;  %2250 = vst [vmem:[#allocation7 + $0x920] sm:$0xff] %v1738_v50  ;;  %v1831_v30 = vmul.f32 %v2904_v47, %v3608_v36  ;;  %v1832_v33 = vmul.f32 %v2905_v48, %v3608_v36  ;;  %v2906_v49 = vld [vmem:[#allocation2 + $0xc18] sm:$0xff]  ;;  %v2907_v50 = vld [vmem:[#allocation2 + $0xc20] sm:$0xff] }
 0x468   :  { %2251 = vst [vmem:[#allocation7 + $0x928] sm:$0xff] %v1739_v52  ;;  %2252 = vst [vmem:[#allocation7 + $0x930] sm:$0xff] %v1740_v54  ;;  %v1833_v12 = vmul.f32 %v2906_v49, %v3608_v36  ;;  %v1834_v51 = vmul.f32 %v2907_v50, %v3608_v36  ;;  %v2908_v52 = vld [vmem:[#allocation2 + $0xc28] sm:$0xff]  ;;  %v2909_v54 = vld [vmem:[#allocation2 + $0xc30] sm:$0xff] }
 0x469   :  { %2253 = vst [vmem:[#allocation7 + $0x938] sm:$0xff] %v1741_v56  ;;  %2254 = vst [vmem:[#allocation7 + $0x940] sm:$0xff] %v1742_v58  ;;  %v1835_v53 = vmul.f32 %v2908_v52, %v3608_v36  ;;  %v1836_v55 = vmul.f32 %v2909_v54, %v3608_v36  ;;  %v2910_v56 = vld [vmem:[#allocation2 + $0xc38] sm:$0xff]  ;;  %v2911_v58 = vld [vmem:[#allocation2 + $0xc40] sm:$0xff] }
 0x46a   :  { %2255 = vst [vmem:[#allocation7 + $0x948] sm:$0xff] %v1743_v60  ;;  %2256 = vst [vmem:[#allocation7 + $0x950] sm:$0xff] %v1744_v62  ;;  %v1837_v57 = vmul.f32 %v2910_v56, %v3608_v36  ;;  %v1838_v59 = vmul.f32 %v2911_v58, %v3608_v36  ;;  %v2912_v60 = vld [vmem:[#allocation2 + $0xc48] sm:$0xff]  ;;  %v2913_v62 = vld [vmem:[#allocation2 + $0xc50] sm:$0xff] }
 0x46b   :  { %2257 = vst [vmem:[#allocation7 + $0x958] sm:$0xff] %v1745_v0  ;;  %2258 = vst [vmem:[#allocation7 + $0x960] sm:$0xff] %v1746_v2  ;;  %v1839_v61 = vmul.f32 %v2912_v60, %v3608_v36  ;;  %v1840_v63 = vmul.f32 %v2913_v62, %v3608_v36  ;;  %v2914_v0 = vld [vmem:[#allocation2 + $0xc58] sm:$0xff]  ;;  %v2915_v2 = vld [vmem:[#allocation2 + $0xc60] sm:$0xff] }
 0x46c   :  { %2259 = vst [vmem:[#allocation7 + $0x968] sm:$0xff] %v1747_v3  ;;  %2260 = vst [vmem:[#allocation7 + $0x970] sm:$0xff] %v1748_v5  ;;  %v1841_v1 = vmul.f32 %v2914_v0, %v3608_v36  ;;  %v1842_v10 = vmul.f32 %v2915_v2, %v3608_v36  ;;  %v2916_v3 = vld [vmem:[#allocation2 + $0xc68] sm:$0xff]  ;;  %v2917_v5 = vld [vmem:[#allocation2 + $0xc70] sm:$0xff] }
 0x46d   :  { %2261 = vst [vmem:[#allocation7 + $0x978] sm:$0xff] %v1749_v7  ;;  %2262 = vst [vmem:[#allocation7 + $0x980] sm:$0xff] %v1750_v9  ;;  %v1843_v4 = vmul.f32 %v2916_v3, %v3608_v36  ;;  %v1844_v6 = vmul.f32 %v2917_v5, %v3608_v36  ;;  %v2918_v7 = vld [vmem:[#allocation2 + $0xc78] sm:$0xff]  ;;  %v2919_v9 = vld [vmem:[#allocation2 + $0xc80] sm:$0xff] }
 0x46e   :  { %2263 = vst [vmem:[#allocation7 + $0x988] sm:$0xff] %v1751_v13  ;;  %2264 = vst [vmem:[#allocation7 + $0x990] sm:$0xff] %v1752_v15  ;;  %v1845_v8 = vmul.f32 %v2918_v7, %v3608_v36  ;;  %v1846_v11 = vmul.f32 %v2919_v9, %v3608_v36  ;;  %v2920_v13 = vld [vmem:[#allocation2 + $0xc88] sm:$0xff]  ;;  %v2921_v15 = vld [vmem:[#allocation2 + $0xc90] sm:$0xff] }
 0x46f   :  { %2265 = vst [vmem:[#allocation7 + $0x998] sm:$0xff] %v1753_v19  ;;  %2266 = vst [vmem:[#allocation7 + $0x9a0] sm:$0xff] %v1754_v23  ;;  %v1847_v14 = vmul.f32 %v2920_v13, %v3608_v36  ;;  %v1848_v17 = vmul.f32 %v2921_v15, %v3608_v36  ;;  %v2922_v19 = vld [vmem:[#allocation2 + $0xc98] sm:$0xff]  ;;  %v2923_v23 = vld [vmem:[#allocation2 + $0xca0] sm:$0xff] }
 0x470   :  { %2267 = vst [vmem:[#allocation7 + $0x9a8] sm:$0xff] %v1755_v27  ;;  %2268 = vst [vmem:[#allocation7 + $0x9b0] sm:$0xff] %v1756_v32  ;;  %v1849_v21 = vmul.f32 %v2922_v19, %v3608_v36  ;;  %v1850_v25 = vmul.f32 %v2923_v23, %v3608_v36  ;;  %v2924_v27 = vld [vmem:[#allocation2 + $0xca8] sm:$0xff]  ;;  %v2925_v32 = vld [vmem:[#allocation2 + $0xcb0] sm:$0xff] }
 0x471   :  { %2269 = vst [vmem:[#allocation7 + $0x9b8] sm:$0xff] %v1757_v35  ;;  %2270 = vst [vmem:[#allocation7 + $0x9c0] sm:$0xff] %v1758_v38  ;;  %v1851_v29 = vmul.f32 %v2924_v27, %v3608_v36  ;;  %v1852_v34 = vmul.f32 %v2925_v32, %v3608_v36  ;;  %v2926_v35 = vld [vmem:[#allocation2 + $0xcb8] sm:$0xff]  ;;  %v3642_v38 = vpop.permute.xlu1 %1428  ;;  %v2927_v39 = vld [vmem:[#allocation2 + $0xcc0] sm:$0xff] }
 0x472   :  { %2271 = vst [vmem:[#allocation7 + $0x9c8] sm:$0xff] %v1759_v31  ;;  %2272 = vst [vmem:[#allocation7 + $0x9d0] sm:$0xff] %v1760_v16  ;;  %v1853_v37 = vmul.f32 %v2926_v35, %v3608_v36  ;;  %v1854_v31 = vmul.f32 %v2927_v39, %v3608_v36  ;;  %v2928_v40 = vld [vmem:[#allocation2 + $0xcc8] sm:$0xff]  ;;  %v2929_v41 = vld [vmem:[#allocation2 + $0xcd0] sm:$0xff] }
 0x473   :  { %2273 = vst [vmem:[#allocation7 + $0x9d8] sm:$0xff] %v1761_v18  ;;  %2274 = vst [vmem:[#allocation7 + $0x9e0] sm:$0xff] %v1762_v20  ;;  %v1855_v16 = vmul.f32 %v2928_v40, %v3608_v36  ;;  %v1856_v18 = vmul.f32 %v2929_v41, %v3608_v36  ;;  %v2930_v42 = vld [vmem:[#allocation2 + $0xcd8] sm:$0xff]  ;;  %v2931_v43 = vld [vmem:[#allocation2 + $0xce0] sm:$0xff] }
 0x474   :  { %2275 = vst [vmem:[#allocation7 + $0x9e8] sm:$0xff] %v1763_v22  ;;  %2276 = vst [vmem:[#allocation7 + $0x9f0] sm:$0xff] %v1764_v24  ;;  %v1857_v20 = vmul.f32 %v2930_v42, %v3608_v36  ;;  %v1858_v22 = vmul.f32 %v2931_v43, %v3608_v36  ;;  %v2932_v44 = vld [vmem:[#allocation2 + $0xce8] sm:$0xff]  ;;  %v2933_v45 = vld [vmem:[#allocation2 + $0xcf0] sm:$0xff] }
 0x475   :  { %2277 = vst [vmem:[#allocation7 + $0x9f8] sm:$0xff] %v1765_v26  ;;  %2342 = vst [vmem:[#allocation7 + $0xc00] sm:$0xff] %v1830_v28  ;;  %v1859_v24 = vmul.f32 %v2932_v44, %v3608_v36  ;;  %v1860_v26 = vmul.f32 %v2933_v45, %v3608_v36  ;;  %v2934_v46 = vld [vmem:[#allocation2 + $0xcf8] sm:$0xff]  ;;  %v2935_v47 = vld [vmem:[#allocation2 + $0xb00] sm:$0xff] }
 0x476   :  { %2343 = vst [vmem:[#allocation7 + $0xc08] sm:$0xff] %v1831_v30  ;;  %2344 = vst [vmem:[#allocation7 + $0xc10] sm:$0xff] %v1832_v33  ;;  %v1861_v28 = vmul.f32 %v2934_v46, %v3608_v36  ;;  %v1798_v30 = vmul.f32 %v2935_v47, %v3642_v38  ;;  %v2936_v48 = vld [vmem:[#allocation2 + $0xb08] sm:$0xff]  ;;  %v2937_v49 = vld [vmem:[#allocation2 + $0xb10] sm:$0xff] }
 0x477   :  { %2345 = vst [vmem:[#allocation7 + $0xc18] sm:$0xff] %v1833_v12  ;;  %2346 = vst [vmem:[#allocation7 + $0xc20] sm:$0xff] %v1834_v51  ;;  %v1799_v33 = vmul.f32 %v2936_v48, %v3642_v38  ;;  %v1800_v12 = vmul.f32 %v2937_v49, %v3642_v38  ;;  %v2938_v50 = vld [vmem:[#allocation2 + $0xb18] sm:$0xff]  ;;  %v2939_v51 = vld [vmem:[#allocation2 + $0xb20] sm:$0xff] }
 0x478   :  { %2347 = vst [vmem:[#allocation7 + $0xc28] sm:$0xff] %v1835_v53  ;;  %2348 = vst [vmem:[#allocation7 + $0xc30] sm:$0xff] %v1836_v55  ;;  %v1801_v36 = vmul.f32 %v2938_v50, %v3642_v38  ;;  %v1802_v52 = vmul.f32 %v2939_v51, %v3642_v38  ;;  %v2940_v53 = vld [vmem:[#allocation2 + $0xb28] sm:$0xff]  ;;  %v2941_v55 = vld [vmem:[#allocation2 + $0xb30] sm:$0xff] }
 0x479   :  { %2349 = vst [vmem:[#allocation7 + $0xc38] sm:$0xff] %v1837_v57  ;;  %2350 = vst [vmem:[#allocation7 + $0xc40] sm:$0xff] %v1838_v59  ;;  %v1803_v54 = vmul.f32 %v2940_v53, %v3642_v38  ;;  %v1804_v56 = vmul.f32 %v2941_v55, %v3642_v38  ;;  %v2942_v57 = vld [vmem:[#allocation2 + $0xb38] sm:$0xff]  ;;  %v2943_v59 = vld [vmem:[#allocation2 + $0xb40] sm:$0xff] }
 0x47a   :  { %2351 = vst [vmem:[#allocation7 + $0xc48] sm:$0xff] %v1839_v61  ;;  %2352 = vst [vmem:[#allocation7 + $0xc50] sm:$0xff] %v1840_v63  ;;  %v1805_v58 = vmul.f32 %v2942_v57, %v3642_v38  ;;  %v1806_v60 = vmul.f32 %v2943_v59, %v3642_v38  ;;  %v2944_v61 = vld [vmem:[#allocation2 + $0xb48] sm:$0xff]  ;;  %v2945_v63 = vld [vmem:[#allocation2 + $0xb50] sm:$0xff] }
 0x47b   :  { %2353 = vst [vmem:[#allocation7 + $0xc58] sm:$0xff] %v1841_v1  ;;  %2354 = vst [vmem:[#allocation7 + $0xc60] sm:$0xff] %v1842_v10  ;;  %v1807_v62 = vmul.f32 %v2944_v61, %v3642_v38  ;;  %v1808_v0 = vmul.f32 %v2945_v63, %v3642_v38  ;;  %v2946_v1 = vld [vmem:[#allocation2 + $0xb58] sm:$0xff]  ;;  %v2947_v10 = vld [vmem:[#allocation2 + $0xb60] sm:$0xff] }
 0x47c   :  { %2355 = vst [vmem:[#allocation7 + $0xc68] sm:$0xff] %v1843_v4  ;;  %2356 = vst [vmem:[#allocation7 + $0xc70] sm:$0xff] %v1844_v6  ;;  %v1809_v2 = vmul.f32 %v2946_v1, %v3642_v38  ;;  %v1810_v3 = vmul.f32 %v2947_v10, %v3642_v38  ;;  %v2948_v4 = vld [vmem:[#allocation2 + $0xb68] sm:$0xff]  ;;  %v2949_v6 = vld [vmem:[#allocation2 + $0xb70] sm:$0xff] }
 0x47d   :  { %2357 = vst [vmem:[#allocation7 + $0xc78] sm:$0xff] %v1845_v8  ;;  %2358 = vst [vmem:[#allocation7 + $0xc80] sm:$0xff] %v1846_v11  ;;  %v1811_v5 = vmul.f32 %v2948_v4, %v3642_v38  ;;  %v1812_v7 = vmul.f32 %v2949_v6, %v3642_v38  ;;  %v2950_v8 = vld [vmem:[#allocation2 + $0xb78] sm:$0xff]  ;;  %v2951_v11 = vld [vmem:[#allocation2 + $0xb80] sm:$0xff] }
 0x47e   :  { %2359 = vst [vmem:[#allocation7 + $0xc88] sm:$0xff] %v1847_v14  ;;  %2360 = vst [vmem:[#allocation7 + $0xc90] sm:$0xff] %v1848_v17  ;;  %v1813_v9 = vmul.f32 %v2950_v8, %v3642_v38  ;;  %v1814_v13 = vmul.f32 %v2951_v11, %v3642_v38  ;;  %v2952_v14 = vld [vmem:[#allocation2 + $0xb88] sm:$0xff]  ;;  %v2953_v17 = vld [vmem:[#allocation2 + $0xb90] sm:$0xff] }
 0x47f   :  { %2361 = vst [vmem:[#allocation7 + $0xc98] sm:$0xff] %v1849_v21  ;;  %2362 = vst [vmem:[#allocation7 + $0xca0] sm:$0xff] %v1850_v25  ;;  %v1815_v15 = vmul.f32 %v2952_v14, %v3642_v38  ;;  %v1816_v19 = vmul.f32 %v2953_v17, %v3642_v38  ;;  %v2954_v21 = vld [vmem:[#allocation2 + $0xb98] sm:$0xff]  ;;  %v2955_v25 = vld [vmem:[#allocation2 + $0xba0] sm:$0xff] }
 0x480   :  { %2363 = vst [vmem:[#allocation7 + $0xca8] sm:$0xff] %v1851_v29  ;;  %2364 = vst [vmem:[#allocation7 + $0xcb0] sm:$0xff] %v1852_v34  ;;  %v1817_v23 = vmul.f32 %v2954_v21, %v3642_v38  ;;  %v1818_v27 = vmul.f32 %v2955_v25, %v3642_v38  ;;  %v2956_v29 = vld [vmem:[#allocation2 + $0xba8] sm:$0xff]  ;;  %v2957_v34 = vld [vmem:[#allocation2 + $0xbb0] sm:$0xff] }
 0x481   :  { %2365 = vst [vmem:[#allocation7 + $0xcb8] sm:$0xff] %v1853_v37  ;;  %2366 = vst [vmem:[#allocation7 + $0xcc0] sm:$0xff] %v1854_v31  ;;  %v1819_v32 = vmul.f32 %v2956_v29, %v3642_v38  ;;  %v1820_v35 = vmul.f32 %v2957_v34, %v3642_v38  ;;  %v2958_v37 = vld [vmem:[#allocation2 + $0xbb8] sm:$0xff]  ;;  %v3676_v31 = vpop.permute.xlu0 %1440  ;;  %v2959_v40 = vld [vmem:[#allocation2 + $0xbc0] sm:$0xff] }
 0x482   :  { %2367 = vst [vmem:[#allocation7 + $0xcc8] sm:$0xff] %v1855_v16  ;;  %2368 = vst [vmem:[#allocation7 + $0xcd0] sm:$0xff] %v1856_v18  ;;  %v1821_v39 = vmul.f32 %v2958_v37, %v3642_v38  ;;  %v1822_v16 = vmul.f32 %v2959_v40, %v3642_v38  ;;  %v2960_v41 = vld [vmem:[#allocation2 + $0xbc8] sm:$0xff]  ;;  %v2961_v42 = vld [vmem:[#allocation2 + $0xbd0] sm:$0xff] }
 0x483   :  { %2369 = vst [vmem:[#allocation7 + $0xcd8] sm:$0xff] %v1857_v20  ;;  %2370 = vst [vmem:[#allocation7 + $0xce0] sm:$0xff] %v1858_v22  ;;  %v1823_v18 = vmul.f32 %v2960_v41, %v3642_v38  ;;  %v1824_v20 = vmul.f32 %v2961_v42, %v3642_v38  ;;  %v2962_v43 = vld [vmem:[#allocation2 + $0xbd8] sm:$0xff]  ;;  %v2963_v44 = vld [vmem:[#allocation2 + $0xbe0] sm:$0xff] }
 0x484   :  { %2371 = vst [vmem:[#allocation7 + $0xce8] sm:$0xff] %v1859_v24  ;;  %2372 = vst [vmem:[#allocation7 + $0xcf0] sm:$0xff] %v1860_v26  ;;  %v1825_v22 = vmul.f32 %v2962_v43, %v3642_v38  ;;  %v1826_v24 = vmul.f32 %v2963_v44, %v3642_v38  ;;  %v2964_v45 = vld [vmem:[#allocation2 + $0xbe8] sm:$0xff]  ;;  %v2965_v46 = vld [vmem:[#allocation2 + $0xbf0] sm:$0xff] }
 0x485   :  { %2373 = vst [vmem:[#allocation7 + $0xcf8] sm:$0xff] %v1861_v28  ;;  %2310 = vst [vmem:[#allocation7 + $0xb00] sm:$0xff] %v1798_v30  ;;  %v1827_v26 = vmul.f32 %v2964_v45, %v3642_v38  ;;  %v1828_v28 = vmul.f32 %v2965_v46, %v3642_v38  ;;  %v2966_v47 = vld [vmem:[#allocation2 + $0xbf8] sm:$0xff]  ;;  %v2967_v48 = vld [vmem:[#allocation2 + $0xe00] sm:$0xff] }
 0x486   :  { %2311 = vst [vmem:[#allocation7 + $0xb08] sm:$0xff] %v1799_v33  ;;  %2312 = vst [vmem:[#allocation7 + $0xb10] sm:$0xff] %v1800_v12  ;;  %v1829_v30 = vmul.f32 %v2966_v47, %v3642_v38  ;;  %v1894_v33 = vmul.f32 %v2967_v48, %v3676_v31  ;;  %v2968_v49 = vld [vmem:[#allocation2 + $0xe08] sm:$0xff]  ;;  %v2969_v50 = vld [vmem:[#allocation2 + $0xe10] sm:$0xff] }
 0x487   :  { %2313 = vst [vmem:[#allocation7 + $0xb18] sm:$0xff] %v1801_v36  ;;  %2314 = vst [vmem:[#allocation7 + $0xb20] sm:$0xff] %v1802_v52  ;;  %v1895_v12 = vmul.f32 %v2968_v49, %v3676_v31  ;;  %v1896_v36 = vmul.f32 %v2969_v50, %v3676_v31  ;;  %v2970_v51 = vld [vmem:[#allocation2 + $0xe18] sm:$0xff]  ;;  %v2971_v52 = vld [vmem:[#allocation2 + $0xe20] sm:$0xff] }
 0x488   :  { %2315 = vst [vmem:[#allocation7 + $0xb28] sm:$0xff] %v1803_v54  ;;  %2316 = vst [vmem:[#allocation7 + $0xb30] sm:$0xff] %v1804_v56  ;;  %v1897_v38 = vmul.f32 %v2970_v51, %v3676_v31  ;;  %v1898_v53 = vmul.f32 %v2971_v52, %v3676_v31  ;;  %v2972_v54 = vld [vmem:[#allocation2 + $0xe28] sm:$0xff]  ;;  %v2973_v56 = vld [vmem:[#allocation2 + $0xe30] sm:$0xff] }
 0x489   :  { %2317 = vst [vmem:[#allocation7 + $0xb38] sm:$0xff] %v1805_v58  ;;  %2318 = vst [vmem:[#allocation7 + $0xb40] sm:$0xff] %v1806_v60  ;;  %v1899_v55 = vmul.f32 %v2972_v54, %v3676_v31  ;;  %v1900_v57 = vmul.f32 %v2973_v56, %v3676_v31  ;;  %v2974_v58 = vld [vmem:[#allocation2 + $0xe38] sm:$0xff]  ;;  %v2975_v60 = vld [vmem:[#allocation2 + $0xe40] sm:$0xff] }
 0x48a   :  { %2319 = vst [vmem:[#allocation7 + $0xb48] sm:$0xff] %v1807_v62  ;;  %2320 = vst [vmem:[#allocation7 + $0xb50] sm:$0xff] %v1808_v0  ;;  %v1901_v59 = vmul.f32 %v2974_v58, %v3676_v31  ;;  %v1902_v61 = vmul.f32 %v2975_v60, %v3676_v31  ;;  %v2976_v62 = vld [vmem:[#allocation2 + $0xe48] sm:$0xff]  ;;  %v2977_v0 = vld [vmem:[#allocation2 + $0xe50] sm:$0xff] }
 0x48b   :  { %2321 = vst [vmem:[#allocation7 + $0xb58] sm:$0xff] %v1809_v2  ;;  %2322 = vst [vmem:[#allocation7 + $0xb60] sm:$0xff] %v1810_v3  ;;  %v1903_v63 = vmul.f32 %v2976_v62, %v3676_v31  ;;  %v1904_v1 = vmul.f32 %v2977_v0, %v3676_v31  ;;  %v2978_v2 = vld [vmem:[#allocation2 + $0xe58] sm:$0xff]  ;;  %v2979_v3 = vld [vmem:[#allocation2 + $0xe60] sm:$0xff] }
 0x48c   :  { %2323 = vst [vmem:[#allocation7 + $0xb68] sm:$0xff] %v1811_v5  ;;  %2324 = vst [vmem:[#allocation7 + $0xb70] sm:$0xff] %v1812_v7  ;;  %v1905_v10 = vmul.f32 %v2978_v2, %v3676_v31  ;;  %v1906_v4 = vmul.f32 %v2979_v3, %v3676_v31  ;;  %v2980_v5 = vld [vmem:[#allocation2 + $0xe68] sm:$0xff]  ;;  %v2981_v7 = vld [vmem:[#allocation2 + $0xe70] sm:$0xff] }
 0x48d   :  { %2325 = vst [vmem:[#allocation7 + $0xb78] sm:$0xff] %v1813_v9  ;;  %2326 = vst [vmem:[#allocation7 + $0xb80] sm:$0xff] %v1814_v13  ;;  %v1907_v6 = vmul.f32 %v2980_v5, %v3676_v31  ;;  %v1908_v8 = vmul.f32 %v2981_v7, %v3676_v31  ;;  %v2982_v9 = vld [vmem:[#allocation2 + $0xe78] sm:$0xff]  ;;  %v2983_v13 = vld [vmem:[#allocation2 + $0xe80] sm:$0xff] }
 0x48e   :  { %2327 = vst [vmem:[#allocation7 + $0xb88] sm:$0xff] %v1815_v15  ;;  %2328 = vst [vmem:[#allocation7 + $0xb90] sm:$0xff] %v1816_v19  ;;  %v1909_v11 = vmul.f32 %v2982_v9, %v3676_v31  ;;  %v1910_v14 = vmul.f32 %v2983_v13, %v3676_v31  ;;  %v2984_v15 = vld [vmem:[#allocation2 + $0xe88] sm:$0xff]  ;;  %v2985_v19 = vld [vmem:[#allocation2 + $0xe90] sm:$0xff] }
 0x48f   :  { %2329 = vst [vmem:[#allocation7 + $0xb98] sm:$0xff] %v1817_v23  ;;  %2330 = vst [vmem:[#allocation7 + $0xba0] sm:$0xff] %v1818_v27  ;;  %v1911_v17 = vmul.f32 %v2984_v15, %v3676_v31  ;;  %v1912_v21 = vmul.f32 %v2985_v19, %v3676_v31  ;;  %v2986_v23 = vld [vmem:[#allocation2 + $0xe98] sm:$0xff]  ;;  %v2987_v27 = vld [vmem:[#allocation2 + $0xea0] sm:$0xff] }
 0x490   :  { %2331 = vst [vmem:[#allocation7 + $0xba8] sm:$0xff] %v1819_v32  ;;  %2332 = vst [vmem:[#allocation7 + $0xbb0] sm:$0xff] %v1820_v35  ;;  %v1913_v25 = vmul.f32 %v2986_v23, %v3676_v31  ;;  %v1914_v29 = vmul.f32 %v2987_v27, %v3676_v31  ;;  %v2988_v32 = vld [vmem:[#allocation2 + $0xea8] sm:$0xff]  ;;  %v2989_v35 = vld [vmem:[#allocation2 + $0xeb0] sm:$0xff] }
 0x491   :  { %2333 = vst [vmem:[#allocation7 + $0xbb8] sm:$0xff] %v1821_v39  ;;  %2334 = vst [vmem:[#allocation7 + $0xbc0] sm:$0xff] %v1822_v16  ;;  %v1915_v34 = vmul.f32 %v2988_v32, %v3676_v31  ;;  %v1916_v37 = vmul.f32 %v2989_v35, %v3676_v31  ;;  %v2990_v39 = vld [vmem:[#allocation2 + $0xeb8] sm:$0xff]  ;;  %v3710_v16 = vpop.permute.xlu1 %1436  ;;  %v2991_v41 = vld [vmem:[#allocation2 + $0xec0] sm:$0xff] }
 0x492   :  { %2335 = vst [vmem:[#allocation7 + $0xbc8] sm:$0xff] %v1823_v18  ;;  %2336 = vst [vmem:[#allocation7 + $0xbd0] sm:$0xff] %v1824_v20  ;;  %v1917_v40 = vmul.f32 %v2990_v39, %v3676_v31  ;;  %v1918_v18 = vmul.f32 %v2991_v41, %v3676_v31  ;;  %v2992_v42 = vld [vmem:[#allocation2 + $0xec8] sm:$0xff]  ;;  %v2993_v43 = vld [vmem:[#allocation2 + $0xed0] sm:$0xff] }
 0x493   :  { %2337 = vst [vmem:[#allocation7 + $0xbd8] sm:$0xff] %v1825_v22  ;;  %2338 = vst [vmem:[#allocation7 + $0xbe0] sm:$0xff] %v1826_v24  ;;  %v1919_v20 = vmul.f32 %v2992_v42, %v3676_v31  ;;  %v1920_v22 = vmul.f32 %v2993_v43, %v3676_v31  ;;  %v2994_v44 = vld [vmem:[#allocation2 + $0xed8] sm:$0xff]  ;;  %v2995_v45 = vld [vmem:[#allocation2 + $0xee0] sm:$0xff] }
 0x494   :  { %2339 = vst [vmem:[#allocation7 + $0xbe8] sm:$0xff] %v1827_v26  ;;  %2340 = vst [vmem:[#allocation7 + $0xbf0] sm:$0xff] %v1828_v28  ;;  %v1921_v24 = vmul.f32 %v2994_v44, %v3676_v31  ;;  %v1922_v26 = vmul.f32 %v2995_v45, %v3676_v31  ;;  %v2996_v46 = vld [vmem:[#allocation2 + $0xee8] sm:$0xff]  ;;  %v2997_v47 = vld [vmem:[#allocation2 + $0xef0] sm:$0xff] }
 0x495   :  { %2341 = vst [vmem:[#allocation7 + $0xbf8] sm:$0xff] %v1829_v30  ;;  %2406 = vst [vmem:[#allocation7 + $0xe00] sm:$0xff] %v1894_v33  ;;  %v1923_v28 = vmul.f32 %v2996_v46, %v3676_v31  ;;  %v1924_v30 = vmul.f32 %v2997_v47, %v3676_v31  ;;  %v2998_v48 = vld [vmem:[#allocation2 + $0xef8] sm:$0xff]  ;;  %v2999_v49 = vld [vmem:[#allocation2 + $0xd00] sm:$0xff] }
 0x496   :  { %2407 = vst [vmem:[#allocation7 + $0xe08] sm:$0xff] %v1895_v12  ;;  %2408 = vst [vmem:[#allocation7 + $0xe10] sm:$0xff] %v1896_v36  ;;  %v1925_v33 = vmul.f32 %v2998_v48, %v3676_v31  ;;  %v1862_v12 = vmul.f32 %v2999_v49, %v3710_v16  ;;  %v3000_v50 = vld [vmem:[#allocation2 + $0xd08] sm:$0xff]  ;;  %v3001_v51 = vld [vmem:[#allocation2 + $0xd10] sm:$0xff] }
 0x497   :  { %2409 = vst [vmem:[#allocation7 + $0xe18] sm:$0xff] %v1897_v38  ;;  %2410 = vst [vmem:[#allocation7 + $0xe20] sm:$0xff] %v1898_v53  ;;  %v1863_v36 = vmul.f32 %v3000_v50, %v3710_v16  ;;  %v1864_v38 = vmul.f32 %v3001_v51, %v3710_v16  ;;  %v3002_v52 = vld [vmem:[#allocation2 + $0xd18] sm:$0xff]  ;;  %v3003_v53 = vld [vmem:[#allocation2 + $0xd20] sm:$0xff] }
 0x498   :  { %2411 = vst [vmem:[#allocation7 + $0xe28] sm:$0xff] %v1899_v55  ;;  %2412 = vst [vmem:[#allocation7 + $0xe30] sm:$0xff] %v1900_v57  ;;  %v1865_v31 = vmul.f32 %v3002_v52, %v3710_v16  ;;  %v1866_v54 = vmul.f32 %v3003_v53, %v3710_v16  ;;  %v3004_v55 = vld [vmem:[#allocation2 + $0xd28] sm:$0xff]  ;;  %v3005_v57 = vld [vmem:[#allocation2 + $0xd30] sm:$0xff] }
 0x499   :  { %2413 = vst [vmem:[#allocation7 + $0xe38] sm:$0xff] %v1901_v59  ;;  %2414 = vst [vmem:[#allocation7 + $0xe40] sm:$0xff] %v1902_v61  ;;  %v1867_v56 = vmul.f32 %v3004_v55, %v3710_v16  ;;  %v1868_v58 = vmul.f32 %v3005_v57, %v3710_v16  ;;  %v3006_v59 = vld [vmem:[#allocation2 + $0xd38] sm:$0xff]  ;;  %v3007_v61 = vld [vmem:[#allocation2 + $0xd40] sm:$0xff] }
 0x49a   :  { %2415 = vst [vmem:[#allocation7 + $0xe48] sm:$0xff] %v1903_v63  ;;  %2416 = vst [vmem:[#allocation7 + $0xe50] sm:$0xff] %v1904_v1  ;;  %v1869_v60 = vmul.f32 %v3006_v59, %v3710_v16  ;;  %v1870_v62 = vmul.f32 %v3007_v61, %v3710_v16  ;;  %v3008_v63 = vld [vmem:[#allocation2 + $0xd48] sm:$0xff]  ;;  %v3009_v1 = vld [vmem:[#allocation2 + $0xd50] sm:$0xff] }
 0x49b   :  { %2417 = vst [vmem:[#allocation7 + $0xe58] sm:$0xff] %v1905_v10  ;;  %2418 = vst [vmem:[#allocation7 + $0xe60] sm:$0xff] %v1906_v4  ;;  %v1871_v0 = vmul.f32 %v3008_v63, %v3710_v16  ;;  %v1872_v2 = vmul.f32 %v3009_v1, %v3710_v16  ;;  %v3010_v10 = vld [vmem:[#allocation2 + $0xd58] sm:$0xff]  ;;  %v3011_v4 = vld [vmem:[#allocation2 + $0xd60] sm:$0xff] }
 0x49c   :  { %2419 = vst [vmem:[#allocation7 + $0xe68] sm:$0xff] %v1907_v6  ;;  %2420 = vst [vmem:[#allocation7 + $0xe70] sm:$0xff] %v1908_v8  ;;  %v1873_v3 = vmul.f32 %v3010_v10, %v3710_v16  ;;  %v1874_v5 = vmul.f32 %v3011_v4, %v3710_v16  ;;  %v3012_v6 = vld [vmem:[#allocation2 + $0xd68] sm:$0xff]  ;;  %v3013_v8 = vld [vmem:[#allocation2 + $0xd70] sm:$0xff] }
 0x49d   :  { %2421 = vst [vmem:[#allocation7 + $0xe78] sm:$0xff] %v1909_v11  ;;  %2422 = vst [vmem:[#allocation7 + $0xe80] sm:$0xff] %v1910_v14  ;;  %v1875_v7 = vmul.f32 %v3012_v6, %v3710_v16  ;;  %v1876_v9 = vmul.f32 %v3013_v8, %v3710_v16  ;;  %v3014_v11 = vld [vmem:[#allocation2 + $0xd78] sm:$0xff]  ;;  %v3015_v14 = vld [vmem:[#allocation2 + $0xd80] sm:$0xff] }
 0x49e   :  { %2423 = vst [vmem:[#allocation7 + $0xe88] sm:$0xff] %v1911_v17  ;;  %2424 = vst [vmem:[#allocation7 + $0xe90] sm:$0xff] %v1912_v21  ;;  %v1877_v13 = vmul.f32 %v3014_v11, %v3710_v16  ;;  %v1878_v15 = vmul.f32 %v3015_v14, %v3710_v16  ;;  %v3016_v17 = vld [vmem:[#allocation2 + $0xd88] sm:$0xff]  ;;  %v3017_v21 = vld [vmem:[#allocation2 + $0xd90] sm:$0xff] }
 0x49f   :  { %2425 = vst [vmem:[#allocation7 + $0xe98] sm:$0xff] %v1913_v25  ;;  %2426 = vst [vmem:[#allocation7 + $0xea0] sm:$0xff] %v1914_v29  ;;  %v1879_v19 = vmul.f32 %v3016_v17, %v3710_v16  ;;  %v1880_v23 = vmul.f32 %v3017_v21, %v3710_v16  ;;  %v3018_v25 = vld [vmem:[#allocation2 + $0xd98] sm:$0xff]  ;;  %v3019_v29 = vld [vmem:[#allocation2 + $0xda0] sm:$0xff] }
 0x4a0   :  { %2427 = vst [vmem:[#allocation7 + $0xea8] sm:$0xff] %v1915_v34  ;;  %2428 = vst [vmem:[#allocation7 + $0xeb0] sm:$0xff] %v1916_v37  ;;  %v1881_v27 = vmul.f32 %v3018_v25, %v3710_v16  ;;  %v1882_v32 = vmul.f32 %v3019_v29, %v3710_v16  ;;  %v3020_v34 = vld [vmem:[#allocation2 + $0xda8] sm:$0xff]  ;;  %v3021_v37 = vld [vmem:[#allocation2 + $0xdb0] sm:$0xff] }
 0x4a1   :  { %2429 = vst [vmem:[#allocation7 + $0xeb8] sm:$0xff] %v1917_v40  ;;  %2430 = vst [vmem:[#allocation7 + $0xec0] sm:$0xff] %v1918_v18  ;;  %v1883_v35 = vmul.f32 %v3020_v34, %v3710_v16  ;;  %v1884_v39 = vmul.f32 %v3021_v37, %v3710_v16  ;;  %v3022_v40 = vld [vmem:[#allocation2 + $0xdb8] sm:$0xff]  ;;  %v3744_v18 = vpop.permute.xlu1 %1444  ;;  %v3023_v42 = vld [vmem:[#allocation2 + $0xdc0] sm:$0xff] }
 0x4a2   :  { %2431 = vst [vmem:[#allocation7 + $0xec8] sm:$0xff] %v1919_v20  ;;  %2432 = vst [vmem:[#allocation7 + $0xed0] sm:$0xff] %v1920_v22  ;;  %v1885_v41 = vmul.f32 %v3022_v40, %v3710_v16  ;;  %v1886_v20 = vmul.f32 %v3023_v42, %v3710_v16  ;;  %v3024_v43 = vld [vmem:[#allocation2 + $0xdc8] sm:$0xff]  ;;  %v3025_v44 = vld [vmem:[#allocation2 + $0xdd0] sm:$0xff] }
 0x4a3   :  { %2433 = vst [vmem:[#allocation7 + $0xed8] sm:$0xff] %v1921_v24  ;;  %2434 = vst [vmem:[#allocation7 + $0xee0] sm:$0xff] %v1922_v26  ;;  %v1887_v22 = vmul.f32 %v3024_v43, %v3710_v16  ;;  %v1888_v24 = vmul.f32 %v3025_v44, %v3710_v16  ;;  %v3026_v45 = vld [vmem:[#allocation2 + $0xdd8] sm:$0xff]  ;;  %v3027_v46 = vld [vmem:[#allocation2 + $0xde0] sm:$0xff] }
 0x4a4   :  { %2435 = vst [vmem:[#allocation7 + $0xee8] sm:$0xff] %v1923_v28  ;;  %2436 = vst [vmem:[#allocation7 + $0xef0] sm:$0xff] %v1924_v30  ;;  %v1889_v26 = vmul.f32 %v3026_v45, %v3710_v16  ;;  %v1890_v28 = vmul.f32 %v3027_v46, %v3710_v16  ;;  %v3028_v47 = vld [vmem:[#allocation2 + $0xde8] sm:$0xff]  ;;  %v3029_v48 = vld [vmem:[#allocation2 + $0xdf0] sm:$0xff] }
 0x4a5   :  { %2437 = vst [vmem:[#allocation7 + $0xef8] sm:$0xff] %v1925_v33  ;;  %2374 = vst [vmem:[#allocation7 + $0xd00] sm:$0xff] %v1862_v12  ;;  %v1891_v30 = vmul.f32 %v3028_v47, %v3710_v16  ;;  %v1892_v33 = vmul.f32 %v3029_v48, %v3710_v16  ;;  %v3030_v49 = vld [vmem:[#allocation2 + $0xdf8] sm:$0xff]  ;;  %v3031_v50 = vld [vmem:[#allocation2 + $0xf00] sm:$0xff] }
 0x4a6   :  { %2375 = vst [vmem:[#allocation7 + $0xd08] sm:$0xff] %v1863_v36  ;;  %2376 = vst [vmem:[#allocation7 + $0xd10] sm:$0xff] %v1864_v38  ;;  %v1893_v12 = vmul.f32 %v3030_v49, %v3710_v16  ;;  %v1926_v36 = vmul.f32 %v3031_v50, %v3744_v18  ;;  %v3032_v51 = vld [vmem:[#allocation2 + $0xf08] sm:$0xff]  ;;  %v3033_v52 = vld [vmem:[#allocation2 + $0xf10] sm:$0xff] }
 0x4a7   :  { %2377 = vst [vmem:[#allocation7 + $0xd18] sm:$0xff] %v1865_v31  ;;  %2378 = vst [vmem:[#allocation7 + $0xd20] sm:$0xff] %v1866_v54  ;;  %v1927_v38 = vmul.f32 %v3032_v51, %v3744_v18  ;;  %v1928_v31 = vmul.f32 %v3033_v52, %v3744_v18  ;;  %v3034_v53 = vld [vmem:[#allocation2 + $0xf18] sm:$0xff]  ;;  %v3035_v54 = vld [vmem:[#allocation2 + $0xf20] sm:$0xff] }
 0x4a8   :  { %2379 = vst [vmem:[#allocation7 + $0xd28] sm:$0xff] %v1867_v56  ;;  %2380 = vst [vmem:[#allocation7 + $0xd30] sm:$0xff] %v1868_v58  ;;  %v1929_v16 = vmul.f32 %v3034_v53, %v3744_v18  ;;  %v1930_v55 = vmul.f32 %v3035_v54, %v3744_v18  ;;  %v3036_v56 = vld [vmem:[#allocation2 + $0xf28] sm:$0xff]  ;;  %v3037_v58 = vld [vmem:[#allocation2 + $0xf30] sm:$0xff] }
 0x4a9   :  { %2381 = vst [vmem:[#allocation7 + $0xd38] sm:$0xff] %v1869_v60  ;;  %2382 = vst [vmem:[#allocation7 + $0xd40] sm:$0xff] %v1870_v62  ;;  %v1931_v57 = vmul.f32 %v3036_v56, %v3744_v18  ;;  %v1932_v59 = vmul.f32 %v3037_v58, %v3744_v18  ;;  %v3038_v60 = vld [vmem:[#allocation2 + $0xf38] sm:$0xff]  ;;  %v3039_v62 = vld [vmem:[#allocation2 + $0xf40] sm:$0xff] }
 0x4aa   :  { %2383 = vst [vmem:[#allocation7 + $0xd48] sm:$0xff] %v1871_v0  ;;  %2384 = vst [vmem:[#allocation7 + $0xd50] sm:$0xff] %v1872_v2  ;;  %v1933_v61 = vmul.f32 %v3038_v60, %v3744_v18  ;;  %v1934_v63 = vmul.f32 %v3039_v62, %v3744_v18  ;;  %v3040_v0 = vld [vmem:[#allocation2 + $0xf48] sm:$0xff]  ;;  %v3041_v2 = vld [vmem:[#allocation2 + $0xf50] sm:$0xff] }
 0x4ab   :  { %2385 = vst [vmem:[#allocation7 + $0xd58] sm:$0xff] %v1873_v3  ;;  %2386 = vst [vmem:[#allocation7 + $0xd60] sm:$0xff] %v1874_v5  ;;  %v1935_v1 = vmul.f32 %v3040_v0, %v3744_v18  ;;  %v1936_v10 = vmul.f32 %v3041_v2, %v3744_v18  ;;  %v3042_v3 = vld [vmem:[#allocation2 + $0xf58] sm:$0xff]  ;;  %v3043_v5 = vld [vmem:[#allocation2 + $0xf60] sm:$0xff] }
 0x4ac   :  { %2387 = vst [vmem:[#allocation7 + $0xd68] sm:$0xff] %v1875_v7  ;;  %2388 = vst [vmem:[#allocation7 + $0xd70] sm:$0xff] %v1876_v9  ;;  %v1937_v4 = vmul.f32 %v3042_v3, %v3744_v18  ;;  %v1938_v6 = vmul.f32 %v3043_v5, %v3744_v18  ;;  %v3044_v7 = vld [vmem:[#allocation2 + $0xf68] sm:$0xff]  ;;  %v3045_v9 = vld [vmem:[#allocation2 + $0xf70] sm:$0xff] }
 0x4ad   :  { %2389 = vst [vmem:[#allocation7 + $0xd78] sm:$0xff] %v1877_v13  ;;  %2390 = vst [vmem:[#allocation7 + $0xd80] sm:$0xff] %v1878_v15  ;;  %v1939_v8 = vmul.f32 %v3044_v7, %v3744_v18  ;;  %v1940_v11 = vmul.f32 %v3045_v9, %v3744_v18  ;;  %v3046_v13 = vld [vmem:[#allocation2 + $0xf78] sm:$0xff]  ;;  %v3047_v15 = vld [vmem:[#allocation2 + $0xf80] sm:$0xff] }
 0x4ae   :  { %2391 = vst [vmem:[#allocation7 + $0xd88] sm:$0xff] %v1879_v19  ;;  %2392 = vst [vmem:[#allocation7 + $0xd90] sm:$0xff] %v1880_v23  ;;  %v1941_v14 = vmul.f32 %v3046_v13, %v3744_v18  ;;  %v1942_v17 = vmul.f32 %v3047_v15, %v3744_v18  ;;  %v3048_v19 = vld [vmem:[#allocation2 + $0xf88] sm:$0xff]  ;;  %v3049_v23 = vld [vmem:[#allocation2 + $0xf90] sm:$0xff] }
 0x4af   :  { %2393 = vst [vmem:[#allocation7 + $0xd98] sm:$0xff] %v1881_v27  ;;  %2394 = vst [vmem:[#allocation7 + $0xda0] sm:$0xff] %v1882_v32  ;;  %v1943_v21 = vmul.f32 %v3048_v19, %v3744_v18  ;;  %v1944_v25 = vmul.f32 %v3049_v23, %v3744_v18  ;;  %v3050_v27 = vld [vmem:[#allocation2 + $0xf98] sm:$0xff]  ;;  %v3051_v32 = vld [vmem:[#allocation2 + $0xfa0] sm:$0xff] }
 0x4b0   :  { %2395 = vst [vmem:[#allocation7 + $0xda8] sm:$0xff] %v1883_v35  ;;  %2396 = vst [vmem:[#allocation7 + $0xdb0] sm:$0xff] %v1884_v39  ;;  %v1945_v29 = vmul.f32 %v3050_v27, %v3744_v18  ;;  %v1946_v34 = vmul.f32 %v3051_v32, %v3744_v18  ;;  %v3052_v35 = vld [vmem:[#allocation2 + $0xfa8] sm:$0xff]  ;;  %v3053_v39 = vld [vmem:[#allocation2 + $0xfb0] sm:$0xff] }
 0x4b1   :  { %2397 = vst [vmem:[#allocation7 + $0xdb8] sm:$0xff] %v1885_v41  ;;  %2398 = vst [vmem:[#allocation7 + $0xdc0] sm:$0xff] %v1886_v20  ;;  %v1947_v37 = vmul.f32 %v3052_v35, %v3744_v18  ;;  %v1948_v40 = vmul.f32 %v3053_v39, %v3744_v18  ;;  %v3054_v41 = vld [vmem:[#allocation2 + $0xfb8] sm:$0xff]  ;;  %v3055_v20 = vld [vmem:[#allocation2 + $0xfc0] sm:$0xff] }
 0x4b2   :  { %2399 = vst [vmem:[#allocation7 + $0xdc8] sm:$0xff] %v1887_v22  ;;  %2400 = vst [vmem:[#allocation7 + $0xdd0] sm:$0xff] %v1888_v24  ;;  %v1949_v42 = vmul.f32 %v3054_v41, %v3744_v18  ;;  %v1950_v43 = vmul.f32 %v3055_v20, %v3744_v18  ;;  %v3056_v22 = vld [vmem:[#allocation2 + $0xfc8] sm:$0xff]  ;;  %v3057_v24 = vld [vmem:[#allocation2 + $0xfd0] sm:$0xff] }
 0x4b3   :  { %2401 = vst [vmem:[#allocation7 + $0xdd8] sm:$0xff] %v1889_v26  ;;  %2402 = vst [vmem:[#allocation7 + $0xde0] sm:$0xff] %v1890_v28  ;;  %v1951_v44 = vmul.f32 %v3056_v22, %v3744_v18  ;;  %v1952_v45 = vmul.f32 %v3057_v24, %v3744_v18  ;;  %v3058_v26 = vld [vmem:[#allocation2 + $0xfd8] sm:$0xff]  ;;  %v3059_v28 = vld [vmem:[#allocation2 + $0xfe0] sm:$0xff] }
 0x4b4   :  { %2403 = vst [vmem:[#allocation7 + $0xde8] sm:$0xff] %v1891_v30  ;;  %2404 = vst [vmem:[#allocation7 + $0xdf0] sm:$0xff] %v1892_v33  ;;  %v1953_v46 = vmul.f32 %v3058_v26, %v3744_v18  ;;  %v1954_v47 = vmul.f32 %v3059_v28, %v3744_v18  ;;  %v3060_v30 = vld [vmem:[#allocation2 + $0xfe8] sm:$0xff]  ;;  %v3061_v33 = vld [vmem:[#allocation2 + $0xff0] sm:$0xff] }
 0x4b5   :  { %2405 = vst [vmem:[#allocation7 + $0xdf8] sm:$0xff] %v1893_v12  ;;  %2438 = vst [vmem:[#allocation7 + $0xf00] sm:$0xff] %v1926_v36  ;;  %v1955_v48 = vmul.f32 %v3060_v30, %v3744_v18  ;;  %v1956_v49 = vmul.f32 %v3061_v33, %v3744_v18  ;;  %v3062_v12 = vld [vmem:[#allocation2 + $0xff8] sm:$0xff] }
 0x4b6   :  { %2439 = vst [vmem:[#allocation7 + $0xf08] sm:$0xff] %v1927_v38  ;;  %2440 = vst [vmem:[#allocation7 + $0xf10] sm:$0xff] %v1928_v31  ;;  %v1957_v50 = vmul.f32 %v3062_v12, %v3744_v18 }
 0x4b7   :  { %2441 = vst [vmem:[#allocation7 + $0xf18] sm:$0xff] %v1929_v16  ;;  %2442 = vst [vmem:[#allocation7 + $0xf20] sm:$0xff] %v1930_v55 }
 0x4b8   :  { %2443 = vst [vmem:[#allocation7 + $0xf28] sm:$0xff] %v1931_v57  ;;  %2444 = vst [vmem:[#allocation7 + $0xf30] sm:$0xff] %v1932_v59 }
 0x4b9   :  { %2445 = vst [vmem:[#allocation7 + $0xf38] sm:$0xff] %v1933_v61  ;;  %2446 = vst [vmem:[#allocation7 + $0xf40] sm:$0xff] %v1934_v63 }
 0x4ba   :  { %2447 = vst [vmem:[#allocation7 + $0xf48] sm:$0xff] %v1935_v1  ;;  %2448 = vst [vmem:[#allocation7 + $0xf50] sm:$0xff] %v1936_v10 }
 0x4bb   :  { %2449 = vst [vmem:[#allocation7 + $0xf58] sm:$0xff] %v1937_v4  ;;  %2450 = vst [vmem:[#allocation7 + $0xf60] sm:$0xff] %v1938_v6 }
 0x4bc   :  { %2451 = vst [vmem:[#allocation7 + $0xf68] sm:$0xff] %v1939_v8  ;;  %2452 = vst [vmem:[#allocation7 + $0xf70] sm:$0xff] %v1940_v11 }
 0x4bd   :  { %2453 = vst [vmem:[#allocation7 + $0xf78] sm:$0xff] %v1941_v14  ;;  %2454 = vst [vmem:[#allocation7 + $0xf80] sm:$0xff] %v1942_v17 }
 0x4be   :  { %2455 = vst [vmem:[#allocation7 + $0xf88] sm:$0xff] %v1943_v21  ;;  %2456 = vst [vmem:[#allocation7 + $0xf90] sm:$0xff] %v1944_v25 }
 0x4bf   :  { %2457 = vst [vmem:[#allocation7 + $0xf98] sm:$0xff] %v1945_v29  ;;  %2458 = vst [vmem:[#allocation7 + $0xfa0] sm:$0xff] %v1946_v34 }
 0x4c0   :  { %2459 = vst [vmem:[#allocation7 + $0xfa8] sm:$0xff] %v1947_v37  ;;  %2460 = vst [vmem:[#allocation7 + $0xfb0] sm:$0xff] %v1948_v40 }
 0x4c1   :  { %2461 = vst [vmem:[#allocation7 + $0xfb8] sm:$0xff] %v1949_v42  ;;  %2462 = vst [vmem:[#allocation7 + $0xfc0] sm:$0xff] %v1950_v43 }
 0x4c2   :  { %2463 = vst [vmem:[#allocation7 + $0xfc8] sm:$0xff] %v1951_v44  ;;  %2464 = vst [vmem:[#allocation7 + $0xfd0] sm:$0xff] %v1952_v45 }
 0x4c3   :  { %2465 = vst [vmem:[#allocation7 + $0xfd8] sm:$0xff] %v1953_v46  ;;  %2466 = vst [vmem:[#allocation7 + $0xfe0] sm:$0xff] %v1954_v47 }
 0x4c4   :  { %2467 = vst [vmem:[#allocation7 + $0xfe8] sm:$0xff] %v1955_v48  ;;  %2468 = vst [vmem:[#allocation7 + $0xff0] sm:$0xff] %v1956_v49 }
 0x4c5   :  { %2469 = vst [vmem:[#allocation7 + $0xff8] sm:$0xff] %v1957_v50 }
 0x4c6   :  { %3118 = shalt.err (!%p3115_p6)
}
 0x4c7   :  { %s3119_s4 = scalar_lea.hbm %s3807_s3, 65536 }
 0x4c8   :  { %p3120_p7 = scmp.ne.s32.totalorder %s3807_s3, %s3119_s4  ;;  %p3123_p8 = scmp.lt.u32.totalorder %s3119_s4, %s3807_s3 }
 0x4ca   :  { %p3125_p9 = pnand %p3123_p8, %p3120_p7 }
 0x4cc   :  { %3128 = shalt.err (!%p3125_p9)
}
 0x4cd   :  { %2481 = dma.vmem_to_hbm [thread:$0]  %s2476_s27, 65536, %s3807_s3, [#allocation4], %s3136_s22, %s3136_s22, %s3137_s23  }
 0x4ce   :  { %3133 = dma.done.wait [#allocation4], 65536  }
 0x4cf   :  { %3134 = vsyncadd [#allocation4], 4294901760 }
 0x4d0   :  { %2485 = vsyncpa [#allocation3], 1 }
 0x4d1   :  { %2486 = vsyncpa [#allocation6], 1 }
 0x4d2   :  { %2487 = vsyncpa [#allocation4], 1 }

</bundles_post_ra>
